<compile_context>
chip_gen: v7x
topology: tpu7x:2x2x1
jax: 0.10.0
libtpu: 0.0.40
codegen_flags: <defaults>
</compile_context>

<pallas_src>
import functools

import jax
import jax.numpy as jnp
from jax.experimental import pallas as pl
from jax.experimental.pallas import tpu as pltpu


# ----------------------------------------------------------------------------
# Pallas kernels (all 2D, transposed layout: rows = channels, cols = pixels)
# ----------------------------------------------------------------------------
def _conv_lrelu_kernel(w_ref, a_ref, o_ref, *, leak):
    """o = LeakyReLU(W @ A), bf16 operands, f32 accumulate, bf16 out."""
    y = jnp.dot(w_ref[...], a_ref[...], preferred_element_type=jnp.float32)
    o_ref[...] = jnp.where(y > 0, y, leak * y).astype(o_ref.dtype)


def _conv_bn_lrelu_kernel(w_ref, a_ref, g_ref, b_ref, o_ref, *, leak, eps):
    """o = LeakyReLU(BN(W @ A)).  BN = training-mode batch stats per channel
    (= per row in this transposed layout), biased variance (matches torch)."""
    y = jnp.dot(w_ref[...], a_ref[...], preferred_element_type=jnp.float32)
    mean = jnp.mean(y, axis=1, keepdims=True)
    diff = y - mean
    var = jnp.mean(diff * diff, axis=1, keepdims=True)
    y = diff * jax.lax.rsqrt(var + eps) * g_ref[...] + b_ref[...]
    o_ref[...] = jnp.where(y > 0, y, leak * y).astype(o_ref.dtype)


def _final_kernel(w5_ref, a5_ref, g5_ref, b5_ref,
                  pw_ref, pb_ref, gp_ref, bp_ref,
                  textT_ref, wimg_ref, wtxt_ref, sel_ref,
                  o_ref, *, leak, eps):
    """Fused: conv5+BN+LReLU  |  projector Linear+BN1d+LReLU  |  4x4 valid conv + sigmoid."""
    # ---- conv5 + BN + LeakyReLU, transposed: (C5, M5) with M5 = N*4*4 ----
    y5 = jnp.dot(w5_ref[...], a5_ref[...], preferred_element_type=jnp.float32)
    m5 = jnp.mean(y5, axis=1, keepdims=True)
    d5 = y5 - m5
    v5 = jnp.mean(d5 * d5, axis=1, keepdims=True)
    y5 = d5 * jax.lax.rsqrt(v5 + eps) * g5_ref[...] + b5_ref[...]
    y5 = jnp.where(y5 > 0, y5, leak * y5)

    # ---- d_projector, transposed: pT = W @ textT + b  -> (t_dim, N) ----
    p = jnp.dot(pw_ref[...], textT_ref[...],
                preferred_element_type=jnp.float32) + pb_ref[...]
    pm = jnp.mean(p, axis=1, keepdims=True)        # BN1d over the batch (columns)
    pd = p - pm
    pv = jnp.mean(pd * pd, axis=1, keepdims=True)
    p = pd * jax.lax.rsqrt(pv + eps) * gp_ref[...] + bp_ref[...]
    p = jnp.where(p > 0, p, leak * p)

    # ---- discriminator_output: 4x4 valid conv over concat([img, replicated_text]) ----
    # image part: per-(c, pixel) weighted sum, then per-batch column-group sum via sel.
    img = jnp.dot(jnp.sum(y5 * wimg_ref[...], axis=0, keepdims=True), sel_ref[...],
                  preferred_element_type=jnp.float32)           # (1, N)
    # text part: the embedding is constant over the 4x4 grid -> dot with summed weights.
    txt = jnp.dot(wtxt_ref[...], p, preferred_element_type=jnp.float32)  # (1, N)
    z = img + txt
    o_ref[...] = 1.0 / (1.0 + jnp.exp(-z))         # sigmoid (saturates, never NaN)


# ----------------------------------------------------------------------------
# Pallas wrappers
# ----------------------------------------------------------------------------
def conv_lrelu(w, a, *, leak, m_tile=2048):
    """Block-1 conv (no BN). Gridded over the pixel (lane) axis; 'parallel' so it
    can shard across both v7x TensorCores (harmless no-op on v5e/v6e)."""
    C, K = w.shape
    K2, M = a.shape
    assert K == K2
    if M % m_tile != 0:
        m_tile = M
    grid = (M // m_tile,)
    return pl.pallas_call(
        functools.partial(_conv_lrelu_kernel, leak=leak),
        out_shape=jax.ShapeDtypeStruct((C, M), jnp.bfloat16),
        grid=grid,
        in_specs=[
            pl.BlockSpec((C, K), lambda j: (0, 0)),
            pl.BlockSpec((K, m_tile), lambda j: (0, j)),
        ],
        out_specs=pl.BlockSpec((C, m_tile), lambda j: (0, j)),
        compiler_params=pltpu.CompilerParams(dimension_semantics=("parallel",)),
    )(w, a)


def conv_bn_lrelu(w, a, gamma, beta, *, leak, eps=1e-5):
    """Fused conv + BatchNorm2d + LeakyReLU for one block (single VMEM-resident tile;
    the whole output is at most (32, 2048) so one block is plenty)."""
    C, K = w.shape
    K2, M = a.shape
    assert K == K2
    g = gamma.reshape(C, 1).astype(jnp.float32)
    b = beta.reshape(C, 1).astype(jnp.float32)
    return pl.pallas_call(
        functools.partial(_conv_bn_lrelu_kernel, leak=leak, eps=eps),
        out_shape=jax.ShapeDtypeStruct((C, M), jnp.bfloat16),
        in_specs=[
            pl.BlockSpec((C, K), lambda: (0, 0)),
            pl.BlockSpec((K, M), lambda: (0, 0)),
            pl.BlockSpec((C, 1), lambda: (0, 0)),
            pl.BlockSpec((C, 1), lambda: (0, 0)),
        ],
        out_specs=pl.BlockSpec((C, M), lambda: (0, 0)),
    )(w, a, g, b)


def final_block(w5, a5, g5, b5, proj_w, proj_b, gp, bp,
                textT, wimg, wtxt, sel, *, leak, eps=1e-5):
    """Fused block 5 + projector + output conv + sigmoid.  Output shape (1, N)."""
    N = textT.shape[1]

    def full(x):
        return pl.BlockSpec(x.shape, lambda: (0, 0))

    return pl.pallas_call(
        functools.partial(_final_kernel, leak=leak, eps=eps),
        out_shape=jax.ShapeDtypeStruct((1, N), jnp.float32),
        in_specs=[full(w5), full(a5), full(g5), full(b5),
                  full(proj_w), full(proj_b), full(gp), full(bp),
                  full(textT), full(wimg), full(wtxt), full(sel)],
        out_specs=pl.BlockSpec((1, N), lambda: (0, 0)),
    )(w5, a5, g5, b5, proj_w, proj_b, gp, bp, textT, wimg, wtxt, sel)


# ----------------------------------------------------------------------------
# XLA glue: transposed im2col (lane-dense patch matrix, (Cin*kh*kw, N*Ho*Wo))
# ----------------------------------------------------------------------------
def im2col_T(x_cnhw, kh=4, kw=4, stride=2, pad=1):
    C, N, H, W = x_cnhw.shape
    Ho = (H + 2 * pad - kh) // stride + 1
    Wo = (W + 2 * pad - kw) // stride + 1
    xp = jnp.pad(x_cnhw, ((0, 0), (0, 0), (pad, pad), (pad, pad)))
    cols = []
    for di in range(kh):
        for dj in range(kw):
            cols.append(xp[:, :, di:di + stride * Ho:stride, dj:dj + stride * Wo:stride])
    p = jnp.stack(cols, axis=1)                      # (C, kh*kw, N, Ho, Wo)
    # row order (cin, di, dj) matches torch weight.reshape(Cout, Cin*kh*kw)
    return p.reshape(C * kh * kw, N * Ho * Wo), Ho, Wo


# ----------------------------------------------------------------------------
# Full forward pass (semantics of Discriminator.forward, training-mode BN)
# ----------------------------------------------------------------------------
@functools.partial(jax.jit, static_argnames=("leak",))
def discriminator_forward(params, images_nchw, text_embed, leak=0.2):
    N = images_nchw.shape[0]
    x = jnp.transpose(images_nchw, (1, 0, 2, 3)).astype(jnp.bfloat16)  # (Cin, N, H, W)

    # block 1: Conv(k4,s2,p1, no bias) + LeakyReLU   (no BN, matches torch)
    a, H, W = im2col_T(x)
    w1 = params["conv1"].reshape(params["conv1"].shape[0], -1).astype(jnp.bfloat16)
    y = conv_lrelu(w1, a, leak=leak)                                   # (df, N*64*64)

    # blocks 2..4: fused Conv + BatchNorm2d + LeakyReLU
    for i in (2, 3, 4):
        wi = params[f"conv{i}"].reshape(params[f"conv{i}"].shape[0], -1).astype(jnp.bfloat16)
        a, H, W = im2col_T(y.reshape(y.shape[0], N, H, W))
        y = conv_bn_lrelu(wi, a, params[f"bn{i}_g"], params[f"bn{i}_b"], leak=leak)

    # block 5 + d_projector + discriminator_output, all fused in one kernel
    a5, H5, W5 = im2col_T(y.reshape(y.shape[0], N, H, W))              # (512, N*16)
    w5 = params["conv5"].reshape(params["conv5"].shape[0], -1).astype(jnp.bfloat16)
    C5 = w5.shape[0]
    g5 = params["bn5_g"].reshape(C5, 1).astype(jnp.float32)
    b5 = params["bn5_b"].reshape(C5, 1).astype(jnp.float32)

    t_dim = params["proj_w"].shape[0]
    proj_w = params["proj_w"].astype(jnp.float32)                      # (t_dim, cap_len)
    proj_b = params["proj_b"].reshape(t_dim, 1).astype(jnp.float32)
    gp = params["bnp_g"].reshape(t_dim, 1).astype(jnp.float32)
    bp = params["bnp_b"].reshape(t_dim, 1).astype(jnp.float32)
    textT = text_embed.astype(jnp.float32).T                           # (cap_len, N)

    wout = params["conv_out"][0].astype(jnp.float32)                   # (C5+t_dim, 4, 4)
    wimg = jnp.tile(wout[:C5].reshape(C5, H5 * W5), (1, N))            # (C5, N*16)
    wtxt = wout[C5:].reshape(t_dim, H5 * W5).sum(axis=1)[None, :]      # (1, t_dim)
    sel = jnp.repeat(jnp.eye(N, dtype=jnp.float32), H5 * W5, axis=0)   # (N*16, N)

    out = final_block(w5, a5, g5, b5, proj_w, proj_b, gp, bp,
                      textT, wimg, wtxt, sel, leak=leak)               # (1, N)
    return out.reshape(-1)                                             # (N,)


# ----------------------------------------------------------------------------
# Deterministic parameter construction + smoke test
# ----------------------------------------------------------------------------
if __name__ == "__main__":
    options = dict(image_channels=3, num_df=4, caption_vec_len=8, t_dim=8, leak=0.2)
    B, IMG = 2, 128
    df = options["num_df"]

    key = jax.random.PRNGKey(0)
    keys = jax.random.split(key, 12)

    def w_init(k, shape):
        return (0.02 * jax.random.normal(k, shape)).astype(jnp.float32)

    chans = [options["image_channels"], df, df * 2, df * 4, df * 8, df * 16]
    params = {}
    for i in range(5):
        params[f"conv{i + 1}"] = w_init(keys[i], (chans[i + 1], chans[i], 4, 4))
    for i in range(2, 6):
        C = chans[i]
        params[f"bn{i}_g"] = jnp.ones((C,), jnp.float32)
        params[f"bn{i}_b"] = jnp.zeros((C,), jnp.float32)
    # Linear weight kept in torch layout: (out_features=t_dim, in_features=caption_vec_len)
    params["proj_w"] = w_init(keys[5], (options["t_dim"], options["caption_vec_len"]))
    params["proj_b"] = w_init(keys[6], (options["t_dim"],))
    params["bnp_g"] = jnp.ones((options["t_dim"],), jnp.float32)
    params["bnp_b"] = jnp.zeros((options["t_dim"],), jnp.float32)
    params["conv_out"] = w_init(keys[7], (1, df * 16 + options["t_dim"], 4, 4))

    images = jax.random.normal(keys[8], (B, options["image_channels"], IMG, IMG),
                               dtype=jnp.float32)
    text_embed = jax.random.normal(keys[9], (B, options["caption_vec_len"]),
                                   dtype=jnp.float32)

    out = discriminator_forward(params, images, text_embed, leak=options["leak"])
    out = jax.block_until_ready(out)
    assert out.shape == (B,), out.shape
    assert bool(jnp.all(jnp.isfinite(out)))
    assert bool(jnp.all((out >= 0.0) & (out <= 1.0)))  # sigmoid range
    print("KERNEL_OK")
</pallas_src>

<mosaic_0001>
module attributes {stable_mosaic.version = 11 : i64} {
  func.func @_conv_lrelu_kernel(%arg0: i32, %arg1: memref<4x48xbf16, #tpu.memory_space<vmem>>, %arg2: memref<48x2048xbf16, #tpu.memory_space<vmem>>, %arg3: memref<4x2048xbf16, #tpu.memory_space<vmem>>) attributes {dimension_semantics = [#tpu.dimension_semantics<parallel>], iteration_bounds = array<i64: 4>, scalar_prefetch = 0 : i64, scratch_operands = 0 : i64, tpu.core_type = #tpu.core_type<tc>, window_params = [{pipeline_mode = #tpu.pipeline_mode<synchronous>, transform_indices = @transform_0, window_bounds = array<i64: 4, 48>}, {transform_indices = @transform_1, window_bounds = array<i64: 48, 2048>}, {transform_indices = @transform_2, window_bounds = array<i64: 4, 2048>}]} {
    %c0 = arith.constant 0 : index
    %c0_0 = arith.constant 0 : index
    %0 = vector.load %arg1[%c0, %c0_0] : memref<4x48xbf16, #tpu.memory_space<vmem>>, vector<4x48xbf16>
    %c0_1 = arith.constant 0 : index
    %c0_2 = arith.constant 0 : index
    %1 = vector.load %arg2[%c0_1, %c0_2] : memref<48x2048xbf16, #tpu.memory_space<vmem>>, vector<48x2048xbf16>
    %cst = arith.constant dense<0.000000e+00> : vector<4x2048xf32>
    %2 = tpu.matmul %0, %1, %cst {dimension_numbers = #tpu.dot_dimension_numbers<[1], [0], [0], [1], [0, 0, 1, 1], [], []>} : vector<4x48xbf16>, vector<48x2048xbf16>, vector<4x2048xf32> -> vector<4x2048xf32>
    %cst_3 = arith.constant 0.000000e+00 : f32
    %3 = vector.broadcast %cst_3 : f32 to vector<4x2048xf32>
    %4 = arith.cmpf ogt, %2, %3 : vector<4x2048xf32>
    %cst_4 = arith.constant 2.000000e-01 : f32
    %5 = vector.broadcast %cst_4 : f32 to vector<4x2048xf32>
    %6 = arith.mulf %5, %2 : vector<4x2048xf32>
    %7 = arith.select %4, %2, %6 : vector<4x2048xi1>, vector<4x2048xf32>
    %8 = arith.truncf %7 : vector<4x2048xf32> to vector<4x2048xbf16>
    %c0_5 = arith.constant 0 : index
    %c0_6 = arith.constant 0 : index
    %9 = vector.load %arg3[%c0_5, %c0_6] : memref<4x2048xbf16, #tpu.memory_space<vmem>>, vector<4x2048xbf16>
    tpu.vector_store %arg3[%c0_5, %c0_6], %8 {strides = array<i32>} : memref<4x2048xbf16, #tpu.memory_space<vmem>>, vector<4x2048xbf16>,
    return
  }
  func.func @transform_0(%arg0: i32) -> (i32, i32) {
    %c0_i32 = arith.constant 0 : i32
    %c0_i32_0 = arith.constant 0 : i32
    %c0_i32_1 = arith.constant 0 : i32
    return %c0_i32, %c0_i32_0 : i32, i32
  }
  func.func @transform_1(%arg0: i32) -> (i32, i32) {
    %c0_i32 = arith.constant 0 : i32
    %c0_i32_0 = arith.constant 0 : i32
    return %c0_i32, %arg0 : i32, i32
  }
  func.func @transform_2(%arg0: i32) -> (i32, i32) {
    %c0_i32 = arith.constant 0 : i32
    %c0_i32_0 = arith.constant 0 : i32
    return %c0_i32, %arg0 : i32, i32
  }
}

module attributes {stable_mosaic.version = 11 : i64} {
  func.func @_conv_bn_lrelu_kernel(%arg0: memref<8x64xbf16, #tpu.memory_space<vmem>>, %arg1: memref<64x2048xbf16, #tpu.memory_space<vmem>>, %arg2: memref<8x1xf32, #tpu.memory_space<vmem>>, %arg3: memref<8x1xf32, #tpu.memory_space<vmem>>, %arg4: memref<8x2048xbf16, #tpu.memory_space<vmem>>) attributes {dimension_semantics = [], scalar_prefetch = 0 : i64, scratch_operands = 0 : i64, tpu.core_type = #tpu.core_type<tc>} {
    %c0 = arith.constant 0 : index
    %c0_0 = arith.constant 0 : index
    %0 = vector.load %arg0[%c0, %c0_0] : memref<8x64xbf16, #tpu.memory_space<vmem>>, vector<8x64xbf16>
    %c0_1 = arith.constant 0 : index
    %c0_2 = arith.constant 0 : index
    %1 = vector.load %arg1[%c0_1, %c0_2] : memref<64x2048xbf16, #tpu.memory_space<vmem>>, vector<64x2048xbf16>
    %cst = arith.constant dense<0.000000e+00> : vector<8x2048xf32>
    %2 = tpu.matmul %0, %1, %cst {dimension_numbers = #tpu.dot_dimension_numbers<[1], [0], [0], [1], [0, 0, 1, 1], [], []>} : vector<8x64xbf16>, vector<64x2048xbf16>, vector<8x2048xf32> -> vector<8x2048xf32>
    %cst_3 = arith.constant dense<0.000000e+00> : vector<8xf32>
    %3 = vector.multi_reduction <add>, %2, %cst_3 [1] : vector<8x2048xf32> to vector<8xf32>
    %4 = vector.shape_cast %3 : vector<8xf32> to vector<8x1xf32>
    %cst_4 = arith.constant 2.048000e+03 : f32
    %5 = vector.broadcast %cst_4 : f32 to vector<8x1xf32>
    %6 = arith.divf %4, %5 : vector<8x1xf32>
    %7 = vector.broadcast %6 : vector<8x1xf32> to vector<8x2048xf32>
    %8 = arith.subf %2, %7 : vector<8x2048xf32>
    %9 = arith.mulf %8, %8 : vector<8x2048xf32>
    %cst_5 = arith.constant dense<0.000000e+00> : vector<8xf32>
    %10 = vector.multi_reduction <add>, %9, %cst_5 [1] : vector<8x2048xf32> to vector<8xf32>
    %11 = vector.shape_cast %10 : vector<8xf32> to vector<8x1xf32>
    %cst_6 = arith.constant 2.048000e+03 : f32
    %12 = vector.broadcast %cst_6 : f32 to vector<8x1xf32>
    %13 = arith.divf %11, %12 : vector<8x1xf32>
    %cst_7 = arith.constant 9.99999974E-6 : f32
    %14 = vector.broadcast %cst_7 : f32 to vector<8x1xf32>
    %15 = arith.addf %13, %14 : vector<8x1xf32>
    %16 = math.rsqrt %15 : vector<8x1xf32>
    %17 = vector.broadcast %16 : vector<8x1xf32> to vector<8x2048xf32>
    %18 = arith.mulf %8, %17 : vector<8x2048xf32>
    %c0_8 = arith.constant 0 : index
    %c0_9 = arith.constant 0 : index
    %19 = vector.load %arg2[%c0_8, %c0_9] : memref<8x1xf32, #tpu.memory_space<vmem>>, vector<8x1xf32>
    %20 = vector.broadcast %19 : vector<8x1xf32> to vector<8x2048xf32>
    %21 = arith.mulf %18, %20 : vector<8x2048xf32>
    %c0_10 = arith.constant 0 : index
    %c0_11 = arith.constant 0 : index
    %22 = vector.load %arg3[%c0_10, %c0_11] : memref<8x1xf32, #tpu.memory_space<vmem>>, vector<8x1xf32>
    %23 = vector.broadcast %22 : vector<8x1xf32> to vector<8x2048xf32>
    %24 = arith.addf %21, %23 : vector<8x2048xf32>
    %cst_12 = arith.constant 0.000000e+00 : f32
    %25 = vector.broadcast %cst_12 : f32 to vector<8x2048xf32>
    %26 = arith.cmpf ogt, %24, %25 : vector<8x2048xf32>
    %cst_13 = arith.constant 2.000000e-01 : f32
    %27 = vector.broadcast %cst_13 : f32 to vector<8x2048xf32>
    %28 = arith.mulf %27, %24 : vector<8x2048xf32>
    %29 = arith.select %26, %24, %28 : vector<8x2048xi1>, vector<8x2048xf32>
    %30 = arith.truncf %29 : vector<8x2048xf32> to vector<8x2048xbf16>
    %c0_14 = arith.constant 0 : index
    %c0_15 = arith.constant 0 : index
    %31 = vector.load %arg4[%c0_14, %c0_15] : memref<8x2048xbf16, #tpu.memory_space<vmem>>, vector<8x2048xbf16>
    tpu.vector_store %arg4[%c0_14, %c0_15], %30 {strides = array<i32>} : memref<8x2048xbf16, #tpu.memory_space<vmem>>, vector<8x2048xbf16>,
    return
  }
}

module attributes {stable_mosaic.version = 11 : i64} {
  func.func @_conv_bn_lrelu_kernel(%arg0: memref<16x128xbf16, #tpu.memory_space<vmem>>, %arg1: memref<128x512xbf16, #tpu.memory_space<vmem>>, %arg2: memref<16x1xf32, #tpu.memory_space<vmem>>, %arg3: memref<16x1xf32, #tpu.memory_space<vmem>>, %arg4: memref<16x512xbf16, #tpu.memory_space<vmem>>) attributes {dimension_semantics = [], scalar_prefetch = 0 : i64, scratch_operands = 0 : i64, tpu.core_type = #tpu.core_type<tc>} {
    %c0 = arith.constant 0 : index
    %c0_0 = arith.constant 0 : index
    %0 = vector.load %arg0[%c0, %c0_0] : memref<16x128xbf16, #tpu.memory_space<vmem>>, vector<16x128xbf16>
    %c0_1 = arith.constant 0 : index
    %c0_2 = arith.constant 0 : index
    %1 = vector.load %arg1[%c0_1, %c0_2] : memref<128x512xbf16, #tpu.memory_space<vmem>>, vector<128x512xbf16>
    %cst = arith.constant dense<0.000000e+00> : vector<16x512xf32>
    %2 = tpu.matmul %0, %1, %cst {dimension_numbers = #tpu.dot_dimension_numbers<[1], [0], [0], [1], [0, 0, 1, 1], [], []>} : vector<16x128xbf16>, vector<128x512xbf16>, vector<16x512xf32> -> vector<16x512xf32>
    %cst_3 = arith.constant dense<0.000000e+00> : vector<16xf32>
    %3 = vector.multi_reduction <add>, %2, %cst_3 [1] : vector<16x512xf32> to vector<16xf32>
    %4 = vector.shape_cast %3 : vector<16xf32> to vector<16x1xf32>
    %cst_4 = arith.constant 5.120000e+02 : f32
    %5 = vector.broadcast %cst_4 : f32 to vector<16x1xf32>
    %6 = arith.divf %4, %5 : vector<16x1xf32>
    %7 = vector.broadcast %6 : vector<16x1xf32> to vector<16x512xf32>
    %8 = arith.subf %2, %7 : vector<16x512xf32>
    %9 = arith.mulf %8, %8 : vector<16x512xf32>
    %cst_5 = arith.constant dense<0.000000e+00> : vector<16xf32>
    %10 = vector.multi_reduction <add>, %9, %cst_5 [1] : vector<16x512xf32> to vector<16xf32>
    %11 = vector.shape_cast %10 : vector<16xf32> to vector<16x1xf32>
    %cst_6 = arith.constant 5.120000e+02 : f32
    %12 = vector.broadcast %cst_6 : f32 to vector<16x1xf32>
    %13 = arith.divf %11, %12 : vector<16x1xf32>
    %cst_7 = arith.constant 9.99999974E-6 : f32
    %14 = vector.broadcast %cst_7 : f32 to vector<16x1xf32>
    %15 = arith.addf %13, %14 : vector<16x1xf32>
    %16 = math.rsqrt %15 : vector<16x1xf32>
    %17 = vector.broadcast %16 : vector<16x1xf32> to vector<16x512xf32>
    %18 = arith.mulf %8, %17 : vector<16x512xf32>
    %c0_8 = arith.constant 0 : index
    %c0_9 = arith.constant 0 : index
    %19 = vector.load %arg2[%c0_8, %c0_9] : memref<16x1xf32, #tpu.memory_space<vmem>>, vector<16x1xf32>
    %20 = vector.broadcast %19 : vector<16x1xf32> to vector<16x512xf32>
    %21 = arith.mulf %18, %20 : vector<16x512xf32>
    %c0_10 = arith.constant 0 : index
    %c0_11 = arith.constant 0 : index
    %22 = vector.load %arg3[%c0_10, %c0_11] : memref<16x1xf32, #tpu.memory_space<vmem>>, vector<16x1xf32>
    %23 = vector.broadcast %22 : vector<16x1xf32> to vector<16x512xf32>
    %24 = arith.addf %21, %23 : vector<16x512xf32>
    %cst_12 = arith.constant 0.000000e+00 : f32
    %25 = vector.broadcast %cst_12 : f32 to vector<16x512xf32>
    %26 = arith.cmpf ogt, %24, %25 : vector<16x512xf32>
    %cst_13 = arith.constant 2.000000e-01 : f32
    %27 = vector.broadcast %cst_13 : f32 to vector<16x512xf32>
    %28 = arith.mulf %27, %24 : vector<16x512xf32>
    %29 = arith.select %26, %24, %28 : vector<16x512xi1>, vector<16x512xf32>
    %30 = arith.truncf %29 : vector<16x512xf32> to vector<16x512xbf16>
    %c0_14 = arith.constant 0 : index
    %c0_15 = arith.constant 0 : index
    %31 = vector.load %arg4[%c0_14, %c0_15] : memref<16x512xbf16, #tpu.memory_space<vmem>>, vector<16x512xbf16>
    tpu.vector_store %arg4[%c0_14, %c0_15], %30 {strides = array<i32>} : memref<16x512xbf16, #tpu.memory_space<vmem>>, vector<16x512xbf16>,
    return
  }
}

module attributes {stable_mosaic.version = 11 : i64} {
  func.func @_conv_bn_lrelu_kernel(%arg0: memref<32x256xbf16, #tpu.memory_space<vmem>>, %arg1: memref<256x128xbf16, #tpu.memory_space<vmem>>, %arg2: memref<32x1xf32, #tpu.memory_space<vmem>>, %arg3: memref<32x1xf32, #tpu.memory_space<vmem>>, %arg4: memref<32x128xbf16, #tpu.memory_space<vmem>>) attributes {dimension_semantics = [], scalar_prefetch = 0 : i64, scratch_operands = 0 : i64, tpu.core_type = #tpu.core_type<tc>} {
    %c0 = arith.constant 0 : index
    %c0_0 = arith.constant 0 : index
    %0 = vector.load %arg0[%c0, %c0_0] : memref<32x256xbf16, #tpu.memory_space<vmem>>, vector<32x256xbf16>
    %c0_1 = arith.constant 0 : index
    %c0_2 = arith.constant 0 : index
    %1 = vector.load %arg1[%c0_1, %c0_2] : memref<256x128xbf16, #tpu.memory_space<vmem>>, vector<256x128xbf16>
    %cst = arith.constant dense<0.000000e+00> : vector<32x128xf32>
    %2 = tpu.matmul %0, %1, %cst {dimension_numbers = #tpu.dot_dimension_numbers<[1], [0], [0], [1], [0, 0, 1, 1], [], []>} : vector<32x256xbf16>, vector<256x128xbf16>, vector<32x128xf32> -> vector<32x128xf32>
    %cst_3 = arith.constant dense<0.000000e+00> : vector<32xf32>
    %3 = vector.multi_reduction <add>, %2, %cst_3 [1] : vector<32x128xf32> to vector<32xf32>
    %4 = vector.shape_cast %3 : vector<32xf32> to vector<32x1xf32>
    %cst_4 = arith.constant 1.280000e+02 : f32
    %5 = vector.broadcast %cst_4 : f32 to vector<32x1xf32>
    %6 = arith.divf %4, %5 : vector<32x1xf32>
    %7 = vector.broadcast %6 : vector<32x1xf32> to vector<32x128xf32>
    %8 = arith.subf %2, %7 : vector<32x128xf32>
    %9 = arith.mulf %8, %8 : vector<32x128xf32>
    %cst_5 = arith.constant dense<0.000000e+00> : vector<32xf32>
    %10 = vector.multi_reduction <add>, %9, %cst_5 [1] : vector<32x128xf32> to vector<32xf32>
    %11 = vector.shape_cast %10 : vector<32xf32> to vector<32x1xf32>
    %cst_6 = arith.constant 1.280000e+02 : f32
    %12 = vector.broadcast %cst_6 : f32 to vector<32x1xf32>
    %13 = arith.divf %11, %12 : vector<32x1xf32>
    %cst_7 = arith.constant 9.99999974E-6 : f32
    %14 = vector.broadcast %cst_7 : f32 to vector<32x1xf32>
    %15 = arith.addf %13, %14 : vector<32x1xf32>
    %16 = math.rsqrt %15 : vector<32x1xf32>
    %17 = vector.broadcast %16 : vector<32x1xf32> to vector<32x128xf32>
    %18 = arith.mulf %8, %17 : vector<32x128xf32>
    %c0_8 = arith.constant 0 : index
    %c0_9 = arith.constant 0 : index
    %19 = vector.load %arg2[%c0_8, %c0_9] : memref<32x1xf32, #tpu.memory_space<vmem>>, vector<32x1xf32>
    %20 = vector.broadcast %19 : vector<32x1xf32> to vector<32x128xf32>
    %21 = arith.mulf %18, %20 : vector<32x128xf32>
    %c0_10 = arith.constant 0 : index
    %c0_11 = arith.constant 0 : index
    %22 = vector.load %arg3[%c0_10, %c0_11] : memref<32x1xf32, #tpu.memory_space<vmem>>, vector<32x1xf32>
    %23 = vector.broadcast %22 : vector<32x1xf32> to vector<32x128xf32>
    %24 = arith.addf %21, %23 : vector<32x128xf32>
    %cst_12 = arith.constant 0.000000e+00 : f32
    %25 = vector.broadcast %cst_12 : f32 to vector<32x128xf32>
    %26 = arith.cmpf ogt, %24, %25 : vector<32x128xf32>
    %cst_13 = arith.constant 2.000000e-01 : f32
    %27 = vector.broadcast %cst_13 : f32 to vector<32x128xf32>
    %28 = arith.mulf %27, %24 : vector<32x128xf32>
    %29 = arith.select %26, %24, %28 : vector<32x128xi1>, vector<32x128xf32>
    %30 = arith.truncf %29 : vector<32x128xf32> to vector<32x128xbf16>
    %c0_14 = arith.constant 0 : index
    %c0_15 = arith.constant 0 : index
    %31 = vector.load %arg4[%c0_14, %c0_15] : memref<32x128xbf16, #tpu.memory_space<vmem>>, vector<32x128xbf16>
    tpu.vector_store %arg4[%c0_14, %c0_15], %30 {strides = array<i32>} : memref<32x128xbf16, #tpu.memory_space<vmem>>, vector<32x128xbf16>,
    return
  }
}

module attributes {stable_mosaic.version = 11 : i64} {
  func.func @_final_kernel(%arg0: memref<64x512xbf16, #tpu.memory_space<vmem>>, %arg1: memref<512x32xbf16, #tpu.memory_space<vmem>>, %arg2: memref<64x1xf32, #tpu.memory_space<vmem>>, %arg3: memref<64x1xf32, #tpu.memory_space<vmem>>, %arg4: memref<8x8xf32, #tpu.memory_space<vmem>>, %arg5: memref<8x1xf32, #tpu.memory_space<vmem>>, %arg6: memref<8x1xf32, #tpu.memory_space<vmem>>, %arg7: memref<8x1xf32, #tpu.memory_space<vmem>>, %arg8: memref<8x2xf32, #tpu.memory_space<vmem>>, %arg9: memref<64x32xf32, #tpu.memory_space<vmem>>, %arg10: memref<1x8xf32, #tpu.memory_space<vmem>>, %arg11: memref<32x2xf32, #tpu.memory_space<vmem>>, %arg12: memref<1x2xf32, #tpu.memory_space<vmem>>) attributes {dimension_semantics = [], scalar_prefetch = 0 : i64, scratch_operands = 0 : i64, tpu.core_type = #tpu.core_type<tc>} {
    %c0 = arith.constant 0 : index
    %c0_0 = arith.constant 0 : index
    %0 = vector.load %arg0[%c0, %c0_0] : memref<64x512xbf16, #tpu.memory_space<vmem>>, vector<64x512xbf16>
    %c0_1 = arith.constant 0 : index
    %c0_2 = arith.constant 0 : index
    %1 = vector.load %arg1[%c0_1, %c0_2] : memref<512x32xbf16, #tpu.memory_space<vmem>>, vector<512x32xbf16>
    %cst = arith.constant dense<0.000000e+00> : vector<64x32xf32>
    %2 = tpu.matmul %0, %1, %cst {dimension_numbers = #tpu.dot_dimension_numbers<[1], [0], [0], [1], [0, 0, 1, 1], [], []>} : vector<64x512xbf16>, vector<512x32xbf16>, vector<64x32xf32> -> vector<64x32xf32>
    %cst_3 = arith.constant dense<0.000000e+00> : vector<64xf32>
    %3 = vector.multi_reduction <add>, %2, %cst_3 [1] : vector<64x32xf32> to vector<64xf32>
    %4 = vector.shape_cast %3 : vector<64xf32> to vector<64x1xf32>
    %cst_4 = arith.constant 3.200000e+01 : f32
    %5 = vector.broadcast %cst_4 : f32 to vector<64x1xf32>
    %6 = arith.divf %4, %5 : vector<64x1xf32>
    %7 = vector.broadcast %6 : vector<64x1xf32> to vector<64x32xf32>
    %8 = arith.subf %2, %7 : vector<64x32xf32>
    %9 = arith.mulf %8, %8 : vector<64x32xf32>
    %cst_5 = arith.constant dense<0.000000e+00> : vector<64xf32>
    %10 = vector.multi_reduction <add>, %9, %cst_5 [1] : vector<64x32xf32> to vector<64xf32>
    %11 = vector.shape_cast %10 : vector<64xf32> to vector<64x1xf32>
    %cst_6 = arith.constant 3.200000e+01 : f32
    %12 = vector.broadcast %cst_6 : f32 to vector<64x1xf32>
    %13 = arith.divf %11, %12 : vector<64x1xf32>
    %cst_7 = arith.constant 9.99999974E-6 : f32
    %14 = vector.broadcast %cst_7 : f32 to vector<64x1xf32>
    %15 = arith.addf %13, %14 : vector<64x1xf32>
    %16 = math.rsqrt %15 : vector<64x1xf32>
    %17 = vector.broadcast %16 : vector<64x1xf32> to vector<64x32xf32>
    %18 = arith.mulf %8, %17 : vector<64x32xf32>
    %c0_8 = arith.constant 0 : index
    %c0_9 = arith.constant 0 : index
    %19 = vector.load %arg2[%c0_8, %c0_9] : memref<64x1xf32, #tpu.memory_space<vmem>>, vector<64x1xf32>
    %20 = vector.broadcast %19 : vector<64x1xf32> to vector<64x32xf32>
    %21 = arith.mulf %18, %20 : vector<64x32xf32>
    %c0_10 = arith.constant 0 : index
    %c0_11 = arith.constant 0 : index
    %22 = vector.load %arg3[%c0_10, %c0_11] : memref<64x1xf32, #tpu.memory_space<vmem>>, vector<64x1xf32>
    %23 = vector.broadcast %22 : vector<64x1xf32> to vector<64x32xf32>
    %24 = arith.addf %21, %23 : vector<64x32xf32>
    %cst_12 = arith.constant 0.000000e+00 : f32
    %25 = vector.broadcast %cst_12 : f32 to vector<64x32xf32>
    %26 = arith.cmpf ogt, %24, %25 : vector<64x32xf32>
    %cst_13 = arith.constant 2.000000e-01 : f32
    %27 = vector.broadcast %cst_13 : f32 to vector<64x32xf32>
    %28 = arith.mulf %27, %24 : vector<64x32xf32>
    %29 = arith.select %26, %24, %28 : vector<64x32xi1>, vector<64x32xf32>
    %c0_14 = arith.constant 0 : index
    %c0_15 = arith.constant 0 : index
    %30 = vector.load %arg4[%c0_14, %c0_15] : memref<8x8xf32, #tpu.memory_space<vmem>>, vector<8x8xf32>
    %c0_16 = arith.constant 0 : index
    %c0_17 = arith.constant 0 : index
    %31 = vector.load %arg8[%c0_16, %c0_17] : memref<8x2xf32, #tpu.memory_space<vmem>>, vector<8x2xf32>
    %cst_18 = arith.constant dense<0.000000e+00> : vector<8x2xf32>
    %32 = tpu.matmul %30, %31, %cst_18 {dimension_numbers = #tpu.dot_dimension_numbers<[1], [0], [0], [1], [0, 0, 1, 1], [], []>} : vector<8x8xf32>, vector<8x2xf32>, vector<8x2xf32> -> vector<8x2xf32>
    %c0_19 = arith.constant 0 : index
    %c0_20 = arith.constant 0 : index
    %33 = vector.load %arg5[%c0_19, %c0_20] : memref<8x1xf32, #tpu.memory_space<vmem>>, vector<8x1xf32>
    %34 = vector.broadcast %33 : vector<8x1xf32> to vector<8x2xf32>
    %35 = arith.addf %32, %34 : vector<8x2xf32>
    %cst_21 = arith.constant dense<0.000000e+00> : vector<8xf32>
    %36 = vector.multi_reduction <add>, %35, %cst_21 [1] : vector<8x2xf32> to vector<8xf32>
    %37 = vector.shape_cast %36 : vector<8xf32> to vector<8x1xf32>
    %cst_22 = arith.constant 2.000000e+00 : f32
    %38 = vector.broadcast %cst_22 : f32 to vector<8x1xf32>
    %39 = arith.divf %37, %38 : vector<8x1xf32>
    %40 = vector.broadcast %39 : vector<8x1xf32> to vector<8x2xf32>
    %41 = arith.subf %35, %40 : vector<8x2xf32>
    %42 = arith.mulf %41, %41 : vector<8x2xf32>
    %cst_23 = arith.constant dense<0.000000e+00> : vector<8xf32>
    %43 = vector.multi_reduction <add>, %42, %cst_23 [1] : vector<8x2xf32> to vector<8xf32>
    %44 = vector.shape_cast %43 : vector<8xf32> to vector<8x1xf32>
    %cst_24 = arith.constant 2.000000e+00 : f32
    %45 = vector.broadcast %cst_24 : f32 to vector<8x1xf32>
    %46 = arith.divf %44, %45 : vector<8x1xf32>
    %cst_25 = arith.constant 9.99999974E-6 : f32
    %47 = vector.broadcast %cst_25 : f32 to vector<8x1xf32>
    %48 = arith.addf %46, %47 : vector<8x1xf32>
    %49 = math.rsqrt %48 : vector<8x1xf32>
    %50 = vector.broadcast %49 : vector<8x1xf32> to vector<8x2xf32>
    %51 = arith.mulf %41, %50 : vector<8x2xf32>
    %c0_26 = arith.constant 0 : index
    %c0_27 = arith.constant 0 : index
    %52 = vector.load %arg6[%c0_26, %c0_27] : memref<8x1xf32, #tpu.memory_space<vmem>>, vector<8x1xf32>
    %53 = vector.broadcast %52 : vector<8x1xf32> to vector<8x2xf32>
    %54 = arith.mulf %51, %53 : vector<8x2xf32>
    %c0_28 = arith.constant 0 : index
    %c0_29 = arith.constant 0 : index
    %55 = vector.load %arg7[%c0_28, %c0_29] : memref<8x1xf32, #tpu.memory_space<vmem>>, vector<8x1xf32>
    %56 = vector.broadcast %55 : vector<8x1xf32> to vector<8x2xf32>
    %57 = arith.addf %54, %56 : vector<8x2xf32>
    %cst_30 = arith.constant 0.000000e+00 : f32
    %58 = vector.broadcast %cst_30 : f32 to vector<8x2xf32>
    %59 = arith.cmpf ogt, %57, %58 : vector<8x2xf32>
    %cst_31 = arith.constant 2.000000e-01 : f32
    %60 = vector.broadcast %cst_31 : f32 to vector<8x2xf32>
    %61 = arith.mulf %60, %57 : vector<8x2xf32>
    %62 = arith.select %59, %57, %61 : vector<8x2xi1>, vector<8x2xf32>
    %c0_32 = arith.constant 0 : index
    %c0_33 = arith.constant 0 : index
    %63 = vector.load %arg9[%c0_32, %c0_33] : memref<64x32xf32, #tpu.memory_space<vmem>>, vector<64x32xf32>
    %64 = arith.mulf %29, %63 : vector<64x32xf32>
    %cst_34 = arith.constant dense<0.000000e+00> : vector<32xf32>
    %65 = vector.multi_reduction <add>, %64, %cst_34 [0] : vector<64x32xf32> to vector<32xf32>
    %66 = vector.shape_cast %65 : vector<32xf32> to vector<1x32xf32>
    %c0_35 = arith.constant 0 : index
    %c0_36 = arith.constant 0 : index
    %67 = vector.load %arg11[%c0_35, %c0_36] : memref<32x2xf32, #tpu.memory_space<vmem>>, vector<32x2xf32>
    %cst_37 = arith.constant dense<0.000000e+00> : vector<1x2xf32>
    %68 = tpu.matmul %66, %67, %cst_37 {dimension_numbers = #tpu.dot_dimension_numbers<[1], [0], [0], [1], [0, 0, 1, 1], [], []>} : vector<1x32xf32>, vector<32x2xf32>, vector<1x2xf32> -> vector<1x2xf32>
    %c0_38 = arith.constant 0 : index
    %c0_39 = arith.constant 0 : index
    %69 = vector.load %arg10[%c0_38, %c0_39] : memref<1x8xf32, #tpu.memory_space<vmem>>, vector<1x8xf32>
    %cst_40 = arith.constant dense<0.000000e+00> : vector<1x2xf32>
    %70 = tpu.matmul %69, %62, %cst_40 {dimension_numbers = #tpu.dot_dimension_numbers<[1], [0], [0], [1], [0, 0, 1, 1], [], []>} : vector<1x8xf32>, vector<8x2xf32>, vector<1x2xf32> -> vector<1x2xf32>
    %71 = arith.addf %68, %70 : vector<1x2xf32>
    %cst_41 = arith.constant 0.000000e+00 : f32
    %72 = vector.broadcast %cst_41 : f32 to vector<1x2xf32>
    %73 = arith.subf %72, %71 : vector<1x2xf32>
    %74 = math.exp %73 : vector<1x2xf32>
    %cst_42 = arith.constant 1.000000e+00 : f32
    %75 = vector.broadcast %cst_42 : f32 to vector<1x2xf32>
    %76 = arith.addf %75, %74 : vector<1x2xf32>
    %cst_43 = arith.constant 1.000000e+00 : f32
    %77 = vector.broadcast %cst_43 : f32 to vector<1x2xf32>
    %78 = arith.divf %77, %76 : vector<1x2xf32>
    %c0_44 = arith.constant 0 : index
    %c0_45 = arith.constant 0 : index
    %79 = vector.load %arg12[%c0_44, %c0_45] : memref<1x2xf32, #tpu.memory_space<vmem>>, vector<1x2xf32>
    tpu.vector_store %arg12[%c0_44, %c0_45], %78 {strides = array<i32>} : memref<1x2xf32, #tpu.memory_space<vmem>>, vector<1x2xf32>,
    return
  }
}

</mosaic_0001>

<bundles_post_ra>
// kernel: discriminator_forward.5
= control target key start
LH: loop header
LB: loop body
LE: loop exit
PB: predicated region body
PF: predicated region fallthrough
CT: control target
= control target key end

     0   :  { %s1245_s9 = smov 0   ;;  %s1247_s10 = smov 0   ;;  %s1492_s0 = inlined_call_operand.vmem [shape: bf16[4,48], index: 0, kind: input, shape index: {}]   ;;  %s1493_s1 = inlined_call_operand.vmem [shape: bf16[48,8192], index: 1, kind: input, shape index: {}]   ;;  %s1494_s2 = inlined_call_operand.vmem [shape: bf16[4,8192], index: 2, kind: output, shape index: {}]  }
   0x1   :  { %s1249_s11 = smov 0  }
   0x2 LB: > { %s1100_s12 = sadd.s32 4294967295, %s1226_s11   ;;  %s1262_s13 = sadd.s32 1, %s1226_s11   ;;  %s1226_s11 = sphi %s1249_s11, %s1497_s11   ;;  %s1222_s10 = sphi %s1247_s10, %s1496_s10   ;;  %s1218_s9 = sphi %s1245_s9, %s1495_s9  }
   0x3   : > { %s37_s14 = ssub.s32 %s1226_s11, %s1262_s13  ;;  %s40_s15 = sadd.s32 1, %s1222_s10 }
   0x4   : > { %p38_p0 = scmp.eq.s32.totalorder %s37_s14, 0  ;;  %p47_p1 = scmp.ne.s32.totalorder %s1222_s10, %s1218_s9 }
   0x5   : > { %p48_p2 = scmp.eq.s32.totalorder %s1226_s11, 0  ;;  %p1103_p4 = scmp.ge.s32.totalorder %s1226_s11, 4 }
   0x6   : > { %s1271_s16 = scalar_select %p38_p0, %s1222_s10, %s40_s15  }
   0x7   : > { %p49_p3 = por %p48_p2, %p47_p1  ;;  %102 = sbr.rel (%p1103_p4) target bundleno = 43 (0x2b), region = 20 }
   0xe   : > { %105 = sbr.rel (!%p49_p3) target bundleno = 43 (0x2b), region = 24  ;;  %s107_s17 = sand.u32 (%p49_p3), 1, %s1222_s10  }
   0xf   : > { %s1175_s18 = sshll.u32 (%p49_p3), %s1226_s11, 6  ;;  %s1176_s19 = smul.u32 (%p49_p3), 384, %s107_s17 }
  0x10   : > { %s1279_s22 = scalar_lea.vmem (%p49_p3), %s1493_s1, %s1175_s18 }
  0x11   : > { %v125_v0 = vld [vmem:[%s1279_s22] sm:$0xff] (%p49_p3)  ;;  %v127_v1 = vld [vmem:[%s1279_s22 + $0x8] sm:$0xff] (%p49_p3)  ;;  %v129_v2 = vld [vmem:[%s1279_s22 + $0x10] sm:$0xff] (%p49_p3)  ;;  %s1287_s23 = scalar_lea.vmem (%p49_p3), [#allocation2], %s1176_s19 }
  0x12   : > { %v131_v3 = vld [vmem:[%s1279_s22 + $0x18] sm:$0xff] (%p49_p3)  ;;  %v133_v4 = vld [vmem:[%s1279_s22 + $0x20] sm:$0xff] (%p49_p3)  ;;  %v135_v5 = vld [vmem:[%s1279_s22 + $0x28] sm:$0xff] (%p49_p3)  ;;  %126 = vst [vmem:[%s1287_s23] sm:$0xff] (%p49_p3), %v125_v0 }
  0x13   : > { %128 = vst [vmem:[%s1287_s23 + $0x8] sm:$0xff] (%p49_p3), %v127_v1  ;;  %130 = vst [vmem:[%s1287_s23 + $0x10] sm:$0xff] (%p49_p3), %v129_v2  ;;  %v137_v6 = vld [vmem:[%s1279_s22 + $0x30] sm:$0xff] (%p49_p3)  ;;  %v139_v7 = vld [vmem:[%s1279_s22 + $0x38] sm:$0xff] (%p49_p3) }
  0x14   : > { %132 = vst [vmem:[%s1287_s23 + $0x18] sm:$0xff] (%p49_p3), %v131_v3  ;;  %134 = vst [vmem:[%s1287_s23 + $0x20] sm:$0xff] (%p49_p3), %v133_v4  ;;  %v141_v8 = vld [vmem:[%s1279_s22 + $0x100] sm:$0xff] (%p49_p3)  ;;  %v143_v9 = vld [vmem:[%s1279_s22 + $0x108] sm:$0xff] (%p49_p3) }
  0x15   : > { %136 = vst [vmem:[%s1287_s23 + $0x28] sm:$0xff] %v135_v5  ;;  %138 = vst [vmem:[%s1287_s23 + $0x30] sm:$0xff] %v137_v6  ;;  %v145_v10 = vld [vmem:[%s1279_s22 + $0x110] sm:$0xff]  ;;  %v147_v11 = vld [vmem:[%s1279_s22 + $0x118] sm:$0xff] }
  0x16   : > { %140 = vst [vmem:[%s1287_s23 + $0x38] sm:$0xff] %v139_v7  ;;  %142 = vst [vmem:[%s1287_s23 + $0x40] sm:$0xff] %v141_v8  ;;  %v149_v12 = vld [vmem:[%s1279_s22 + $0x120] sm:$0xff]  ;;  %v151_v13 = vld [vmem:[%s1279_s22 + $0x128] sm:$0xff] }
  0x17   : > { %144 = vst [vmem:[%s1287_s23 + $0x48] sm:$0xff] %v143_v9  ;;  %146 = vst [vmem:[%s1287_s23 + $0x50] sm:$0xff] %v145_v10  ;;  %v153_v14 = vld [vmem:[%s1279_s22 + $0x130] sm:$0xff]  ;;  %v155_v15 = vld [vmem:[%s1279_s22 + $0x138] sm:$0xff] }
  0x18   : > { %148 = vst [vmem:[%s1287_s23 + $0x58] sm:$0xff] %v147_v11  ;;  %150 = vst [vmem:[%s1287_s23 + $0x60] sm:$0xff] %v149_v12  ;;  %v157_v16 = vld [vmem:[%s1279_s22 + $0x200] sm:$0xff]  ;;  %v159_v17 = vld [vmem:[%s1279_s22 + $0x208] sm:$0xff] }
  0x19   : > { %152 = vst [vmem:[%s1287_s23 + $0x68] sm:$0xff] %v151_v13  ;;  %154 = vst [vmem:[%s1287_s23 + $0x70] sm:$0xff] %v153_v14  ;;  %v161_v18 = vld [vmem:[%s1279_s22 + $0x210] sm:$0xff]  ;;  %v163_v19 = vld [vmem:[%s1279_s22 + $0x218] sm:$0xff] }
  0x1a   : > { %156 = vst [vmem:[%s1287_s23 + $0x78] sm:$0xff] %v155_v15  ;;  %158 = vst [vmem:[%s1287_s23 + $0x80] sm:$0xff] %v157_v16  ;;  %v165_v20 = vld [vmem:[%s1279_s22 + $0x220] sm:$0xff]  ;;  %v167_v21 = vld [vmem:[%s1279_s22 + $0x228] sm:$0xff] }
  0x1b   : > { %160 = vst [vmem:[%s1287_s23 + $0x88] sm:$0xff] %v159_v17  ;;  %162 = vst [vmem:[%s1287_s23 + $0x90] sm:$0xff] %v161_v18  ;;  %v169_v22 = vld [vmem:[%s1279_s22 + $0x230] sm:$0xff]  ;;  %v171_v23 = vld [vmem:[%s1279_s22 + $0x238] sm:$0xff] }
  0x1c   : > { %164 = vst [vmem:[%s1287_s23 + $0x98] sm:$0xff] %v163_v19  ;;  %166 = vst [vmem:[%s1287_s23 + $0xa0] sm:$0xff] %v165_v20  ;;  %v173_v24 = vld [vmem:[%s1279_s22 + $0x300] sm:$0xff]  ;;  %v175_v25 = vld [vmem:[%s1279_s22 + $0x308] sm:$0xff] }
  0x1d   : > { %168 = vst [vmem:[%s1287_s23 + $0xa8] sm:$0xff] %v167_v21  ;;  %170 = vst [vmem:[%s1287_s23 + $0xb0] sm:$0xff] %v169_v22  ;;  %v177_v26 = vld [vmem:[%s1279_s22 + $0x310] sm:$0xff]  ;;  %v179_v27 = vld [vmem:[%s1279_s22 + $0x318] sm:$0xff] }
  0x1e   : > { %172 = vst [vmem:[%s1287_s23 + $0xb8] sm:$0xff] %v171_v23  ;;  %174 = vst [vmem:[%s1287_s23 + $0xc0] sm:$0xff] %v173_v24  ;;  %v181_v28 = vld [vmem:[%s1279_s22 + $0x320] sm:$0xff]  ;;  %v183_v29 = vld [vmem:[%s1279_s22 + $0x328] sm:$0xff] }
  0x1f   : > { %176 = vst [vmem:[%s1287_s23 + $0xc8] sm:$0xff] %v175_v25  ;;  %178 = vst [vmem:[%s1287_s23 + $0xd0] sm:$0xff] %v177_v26  ;;  %v185_v30 = vld [vmem:[%s1279_s22 + $0x330] sm:$0xff]  ;;  %v187_v31 = vld [vmem:[%s1279_s22 + $0x338] sm:$0xff] }
  0x20   : > { %180 = vst [vmem:[%s1287_s23 + $0xd8] sm:$0xff] %v179_v27  ;;  %182 = vst [vmem:[%s1287_s23 + $0xe0] sm:$0xff] %v181_v28  ;;  %v189_v32 = vld [vmem:[%s1279_s22 + $0x400] sm:$0xff]  ;;  %v191_v33 = vld [vmem:[%s1279_s22 + $0x408] sm:$0xff] }
  0x21   : > { %184 = vst [vmem:[%s1287_s23 + $0xe8] sm:$0xff] %v183_v29  ;;  %186 = vst [vmem:[%s1287_s23 + $0xf0] sm:$0xff] %v185_v30  ;;  %v193_v34 = vld [vmem:[%s1279_s22 + $0x410] sm:$0xff]  ;;  %v195_v35 = vld [vmem:[%s1279_s22 + $0x418] sm:$0xff] }
  0x22   : > { %188 = vst [vmem:[%s1287_s23 + $0xf8] sm:$0xff] %v187_v31  ;;  %190 = vst [vmem:[%s1287_s23 + $0x100] sm:$0xff] %v189_v32  ;;  %v197_v36 = vld [vmem:[%s1279_s22 + $0x420] sm:$0xff]  ;;  %v199_v37 = vld [vmem:[%s1279_s22 + $0x428] sm:$0xff] }
  0x23   : > { %192 = vst [vmem:[%s1287_s23 + $0x108] sm:$0xff] %v191_v33  ;;  %194 = vst [vmem:[%s1287_s23 + $0x110] sm:$0xff] %v193_v34  ;;  %v201_v38 = vld [vmem:[%s1279_s22 + $0x430] sm:$0xff]  ;;  %v203_v39 = vld [vmem:[%s1279_s22 + $0x438] sm:$0xff] }
  0x24   : > { %196 = vst [vmem:[%s1287_s23 + $0x118] sm:$0xff] %v195_v35  ;;  %198 = vst [vmem:[%s1287_s23 + $0x120] sm:$0xff] %v197_v36  ;;  %v205_v40 = vld [vmem:[%s1279_s22 + $0x500] sm:$0xff]  ;;  %v207_v41 = vld [vmem:[%s1279_s22 + $0x508] sm:$0xff] }
  0x25   : > { %200 = vst [vmem:[%s1287_s23 + $0x128] sm:$0xff] %v199_v37  ;;  %202 = vst [vmem:[%s1287_s23 + $0x130] sm:$0xff] %v201_v38  ;;  %v209_v42 = vld [vmem:[%s1279_s22 + $0x510] sm:$0xff]  ;;  %v211_v43 = vld [vmem:[%s1279_s22 + $0x518] sm:$0xff] }
  0x26   : > { %204 = vst [vmem:[%s1287_s23 + $0x138] sm:$0xff] %v203_v39  ;;  %206 = vst [vmem:[%s1287_s23 + $0x140] sm:$0xff] %v205_v40  ;;  %v213_v44 = vld [vmem:[%s1279_s22 + $0x520] sm:$0xff]  ;;  %v215_v45 = vld [vmem:[%s1279_s22 + $0x528] sm:$0xff] }
  0x27   : > { %208 = vst [vmem:[%s1287_s23 + $0x148] sm:$0xff] %v207_v41  ;;  %210 = vst [vmem:[%s1287_s23 + $0x150] sm:$0xff] %v209_v42  ;;  %v217_v46 = vld [vmem:[%s1279_s22 + $0x530] sm:$0xff]  ;;  %v219_v47 = vld [vmem:[%s1279_s22 + $0x538] sm:$0xff] }
  0x28   : > { %212 = vst [vmem:[%s1287_s23 + $0x158] sm:$0xff] %v211_v43  ;;  %214 = vst [vmem:[%s1287_s23 + $0x160] sm:$0xff] %v213_v44 }
  0x29   : > { %216 = vst [vmem:[%s1287_s23 + $0x168] sm:$0xff] %v215_v45  ;;  %218 = vst [vmem:[%s1287_s23 + $0x170] sm:$0xff] %v217_v46 }
  0x2a   : > { %220 = vst [vmem:[%s1287_s23 + $0x178] sm:$0xff] %v219_v47 }
  0x2b PF: > { %p1106_p5 = scmp.ge.s32.totalorder %s1226_s11, 1  ;;  %p225_p6 = scmp.lt.s32.totalorder %s1226_s11, 5 }
  0x2d   : > { %p226_p7 = pnand %p1106_p5, %p225_p6 }
  0x2e   : > { %s232_s24 = sand.u32 (!%p226_p7), 1, %s1218_s9   ;;  %v1228_v48 = vmov (!%p226_p7), 0   ;;  %v1409_v19 = vld [vmem:[%s1492_s0] sm:$0x3] (!%p226_p7)  ;;  %vm550_vm0 = vcmask (!%p226_p7), 392192   ;;  %s1107_s29 = sshll.u32 (!%p226_p7), %s1100_s12, 4 }
  0x2f   : > { %229 = sbr.rel (%p226_p7) target bundleno = 327 (0x147), region = 47  ;;  %586 = vmatprep.mubr.bf16.mxu0 (!%p226_p7), %v1228_v48  ;;  %627 = vmatprep.mubr.bf16.mxu1 (!%p226_p7), %v1228_v48  ;;  %p255_p8 = scmp.lt.s32.totalorder (!%p226_p7), %s1107_s29, 63 }
  0x30   : > { %s1177_s25 = smul.u32 (!%p226_p7), 384, %s232_s24 }
  0x32   : > { %s1384_s26 = scalar_lea.vmem (!%p226_p7), [#allocation2], %s1177_s25 }
  0x33   : > { %v262_v49 = vld [vmem:[%s1384_s26] sm:$0xff] (!%p226_p7)  ;;  %v263_v51 = vld [vmem:[%s1384_s26 + $0x8] sm:$0xff] (!%p226_p7)  ;;  %v264_v7 = vld [vmem:[%s1384_s26 + $0x10] sm:$0xff] (!%p226_p7) }
  0x34   : > { %v270_v50 = vld [vmem:[%s1384_s26 + $0x40] sm:$0xff] (!%p226_p7)  ;;  %v271_v53 = vld [vmem:[%s1384_s26 + $0x48] sm:$0xff] (!%p226_p7)  ;;  %v272_v8 = vld [vmem:[%s1384_s26 + $0x50] sm:$0xff] (!%p226_p7) }
  0x35   : > { %v1110_v52 = vcombine.high (!%p226_p7), %v262_v49, %v270_v50  ;;  %v1109_v54 = vcombine.low (!%p226_p7), %v262_v49, %v270_v50  ;;  %v278_v55 = vld [vmem:[%s1384_s26 + $0x80] sm:$0xff] (!%p226_p7)  ;;  %v1112_v57 = vcombine.high (!%p226_p7), %v263_v51, %v271_v53  ;;  %v1111_v58 = vcombine.low (!%p226_p7), %v263_v51, %v271_v53  ;;  %v279_v60 = vld [vmem:[%s1384_s26 + $0x88] sm:$0xff] (!%p226_p7)  ;;  %v265_v9 = vld [vmem:[%s1384_s26 + $0x18] sm:$0xff] (!%p226_p7) }
  0x36   : > { %v286_v56 = vld [vmem:[%s1384_s26 + $0xc0] sm:$0xff]  ;;  %v287_v61 = vld [vmem:[%s1384_s26 + $0xc8] sm:$0xff]  ;;  %v273_v10 = vld [vmem:[%s1384_s26 + $0x58] sm:$0xff]  ;;  %v1114_v13 = vcombine.high %v264_v7, %v272_v8  ;;  %v1113_v20 = vcombine.low %v264_v7, %v272_v8  ;;  %s1499_s29 = smov (!%p255_p8, %s1107_s29), 63 }
  0x37   : > { %v1126_v59 = vcombine.high %v278_v55, %v286_v56  ;;  %v294_v62 = vld [vmem:[%s1384_s26 + $0x100] sm:$0xff]  ;;  %554 = vmatprep.subr.bf16.mxu0 %v1110_v52  ;;  %v1128_v63 = vcombine.high %v279_v60, %v287_v61  ;;  %v295_v1 = vld [vmem:[%s1384_s26 + $0x108] sm:$0xff]  ;;  %595 = vmatprep.subr.bf16.mxu1 %v1112_v57  ;;  %v1125_v3 = vcombine.low %v278_v55, %v286_v56  ;;  %v280_v15 = vld [vmem:[%s1384_s26 + $0x90] sm:$0xff]  ;;  %s1108_s30 = sshll.u32 %s1499_s29, 1 }
  0x38   : > { %v302_v0 = vld [vmem:[%s1384_s26 + $0x140] sm:$0xff]  ;;  %v303_v2 = vld [vmem:[%s1384_s26 + $0x148] sm:$0xff]  ;;  %555 = vmatpush1.bf16.msra.mxu0 %v1109_v54  ;;  %596 = vmatpush1.bf16.msra.mxu1 %v1111_v58  ;;  %v1127_v4 = vcombine.low %v279_v60, %v287_v61  ;;  %v1116_v14 = vcombine.high %v265_v9, %v273_v10  ;;  %v288_v16 = vld [vmem:[%s1384_s26 + $0xd0] sm:$0xff]  ;;  %v1115_v21 = vcombine.low %v265_v9, %v273_v10  ;;  %s1470_s5 = scalar_lea.vmem %s1494_s2, %s1108_s30 }
  0x39   : > { %556 = vmatprep.subr.bf16.mxu0 %v1126_v59  ;;  %v1142_v5 = vcombine.high %v294_v62, %v302_v0  ;;  %597 = vmatprep.subr.bf16.mxu1 %v1128_v63  ;;  %v1144_v6 = vcombine.high %v295_v1, %v303_v2  ;;  %v1141_v11 = vcombine.low %v294_v62, %v302_v0  ;;  %v281_v17 = vld [vmem:[%s1384_s26 + $0x98] sm:$0xff]  ;;  %v296_v24 = vld [vmem:[%s1384_s26 + $0x110] sm:$0xff]  ;;  %v266_v32 = vld [vmem:[%s1384_s26 + $0x20] sm:$0xff] }
  0x3a   : > { %v1143_v12 = vcombine.low %v295_v1, %v303_v2  ;;  %v289_v18 = vld [vmem:[%s1384_s26 + $0xd8] sm:$0xff]  ;;  %v1130_v22 = vcombine.high %v280_v15, %v288_v16  ;;  %v304_v25 = vld [vmem:[%s1384_s26 + $0x150] sm:$0xff]  ;;  %v1129_v28 = vcombine.low %v280_v15, %v288_v16  ;;  %v274_v33 = vld [vmem:[%s1384_s26 + $0x60] sm:$0xff] }
  0x3b   : > { %v1132_v23 = vcombine.high %v281_v17, %v289_v18  ;;  %v297_v26 = vld [vmem:[%s1384_s26 + $0x118] sm:$0xff]  ;;  %v1131_v29 = vcombine.low %v281_v17, %v289_v18  ;;  %v1146_v30 = vcombine.high %v296_v24, %v304_v25  ;;  %v267_v34 = vld [vmem:[%s1384_s26 + $0x28] sm:$0xff]  ;;  %v1145_v36 = vcombine.low %v296_v24, %v304_v25  ;;  %v282_v40 = vld [vmem:[%s1384_s26 + $0xa0] sm:$0xff] }
  0x3c   : > { %557 = vmatpush1.bf16.msra.mxu0 %v1125_v3  ;;  %598 = vmatpush1.bf16.msra.mxu1 %v1127_v4  ;;  %v305_v27 = vld [vmem:[%s1384_s26 + $0x158] sm:$0xff]  ;;  %v275_v35 = vld [vmem:[%s1384_s26 + $0x68] sm:$0xff]  ;;  %v1118_v38 = vcombine.high %v266_v32, %v274_v33  ;;  %v290_v41 = vld [vmem:[%s1384_s26 + $0xe0] sm:$0xff]  ;;  %v1117_v44 = vcombine.low %v266_v32, %v274_v33 }
  0x3d   : > { %558 = vmatprep.subr.bf16.mxu0 %v1142_v5  ;;  %599 = vmatprep.subr.bf16.mxu1 %v1144_v6  ;;  %v1148_v31 = vcombine.high %v297_v26, %v305_v27  ;;  %v1147_v37 = vcombine.low %v297_v26, %v305_v27  ;;  %v1120_v39 = vcombine.high %v267_v34, %v275_v35  ;;  %v283_v42 = vld [vmem:[%s1384_s26 + $0xa8] sm:$0xff]  ;;  %v298_v49 = vld [vmem:[%s1384_s26 + $0x120] sm:$0xff]  ;;  %v268_v57 = vld [vmem:[%s1384_s26 + $0x30] sm:$0xff] }
  0x3e   : > { %v291_v43 = vld [vmem:[%s1384_s26 + $0xe8] sm:$0xff]  ;;  %v1119_v45 = vcombine.low %v267_v34, %v275_v35  ;;  %v1134_v46 = vcombine.high %v282_v40, %v290_v41  ;;  %v306_v50 = vld [vmem:[%s1384_s26 + $0x160] sm:$0xff]  ;;  %v1133_v53 = vcombine.low %v282_v40, %v290_v41  ;;  %v276_v58 = vld [vmem:[%s1384_s26 + $0x70] sm:$0xff] }
  0x3f   : > { %v1136_v47 = vcombine.high %v283_v42, %v291_v43  ;;  %v299_v51 = vld [vmem:[%s1384_s26 + $0x128] sm:$0xff]  ;;  %v1135_v54 = vcombine.low %v283_v42, %v291_v43  ;;  %v1150_v55 = vcombine.high %v298_v49, %v306_v50  ;;  %v269_v59 = vld [vmem:[%s1384_s26 + $0x38] sm:$0xff]  ;;  %v1149_v61 = vcombine.low %v298_v49, %v306_v50  ;;  %v284_v1 = vld [vmem:[%s1384_s26 + $0xb0] sm:$0xff] }
  0x40   : > { %559 = vmatpush1.bf16.msra.mxu0 %v1141_v11  ;;  %600 = vmatpush1.bf16.msra.mxu1 %v1143_v12  ;;  %v307_v52 = vld [vmem:[%s1384_s26 + $0x168] sm:$0xff]  ;;  %v277_v60 = vld [vmem:[%s1384_s26 + $0x78] sm:$0xff]  ;;  %v1122_v63 = vcombine.high %v268_v57, %v276_v58  ;;  %v292_v2 = vld [vmem:[%s1384_s26 + $0xf0] sm:$0xff]  ;;  %v1121_v5 = vcombine.low %v268_v57, %v276_v58 }
  0x41   : > { %636 = vmatprep.subr.bf16.mxu0 %v1114_v13  ;;  %677 = vmatprep.subr.bf16.mxu1 %v1116_v14  ;;  %v1152_v56 = vcombine.high %v299_v51, %v307_v52  ;;  %v1151_v62 = vcombine.low %v299_v51, %v307_v52  ;;  %v1124_v0 = vcombine.high %v269_v59, %v277_v60  ;;  %v285_v3 = vld [vmem:[%s1384_s26 + $0xb8] sm:$0xff]  ;;  %v300_v9 = vld [vmem:[%s1384_s26 + $0x130] sm:$0xff] }
  0x42   : > { %v293_v4 = vld [vmem:[%s1384_s26 + $0xf8] sm:$0xff]  ;;  %v1123_v6 = vcombine.low %v269_v59, %v277_v60  ;;  %v1138_v7 = vcombine.high %v284_v1, %v292_v2  ;;  %v308_v10 = vld [vmem:[%s1384_s26 + $0x170] sm:$0xff]  ;;  %v1137_v13 = vcombine.low %v284_v1, %v292_v2 }
  0x43   : > { %1157 = vmatmul.mubr.msk.bf16.vlgmr.msra.gmra.mrb[0].mxu0 %vm550_vm0, %v1409_v19  ;;  %1158 = vmatmul.mubr.msk.bf16.vlgmr.msra.gmra.mrb[0].mxu1 %vm550_vm0, %v1409_v19  ;;  %v1140_v8 = vcombine.high %v285_v3, %v293_v4  ;;  %v301_v11 = vld [vmem:[%s1384_s26 + $0x138] sm:$0xff]  ;;  %v1139_v14 = vcombine.low %v285_v3, %v293_v4  ;;  %v1154_v15 = vcombine.high %v300_v9, %v308_v10 }
  0x44   : > { %637 = vmatpush1.bf16.msra.mxu0 %v1113_v20  ;;  %678 = vmatpush1.bf16.msra.mxu1 %v1115_v21  ;;  %v309_v12 = vld [vmem:[%s1384_s26 + $0x178] sm:$0xff]  ;;  %v1153_v17 = vcombine.low %v300_v9, %v308_v10  ;;  %v1229_v20 = vmov 1983009808  }
  0x45   : > { %638 = vmatprep.subr.bf16.mxu0 %v1130_v22  ;;  %679 = vmatprep.subr.bf16.mxu1 %v1132_v23  ;;  %v1156_v16 = vcombine.high %v301_v11, %v309_v12  ;;  %v1155_v18 = vcombine.low %v301_v11, %v309_v12  ;;  %v965_v21 = vunpack.c.l.s4 %v1229_v20  ;;  %v967_v22 = vlaneseq }
  0x46   : > { %668 = vmatprep.mubr.bf16.mxu0 %v1228_v48  ;;  %709 = vmatprep.mubr.bf16.mxu1 %v1228_v48 }
  0x47   : > { %v968_v23 = vshrl.u32 %v967_v22, 7 }
  0x48   : > { %639 = vmatpush1.bf16.msra.mxu0 %v1129_v28  ;;  %680 = vmatpush1.bf16.msra.mxu1 %v1131_v29 }
  0x49   : > { %640 = vmatprep.subr.bf16.mxu0 %v1146_v30  ;;  %681 = vmatprep.subr.bf16.mxu1 %v1148_v31 }
  0x4c   : > { %641 = vmatpush1.bf16.msra.mxu0 %v1145_v36  ;;  %682 = vmatpush1.bf16.msra.mxu1 %v1147_v37 }
  0x4d   : > { %718 = vmatprep.subr.bf16.mxu0 %v1118_v38  ;;  %759 = vmatprep.subr.bf16.mxu1 %v1120_v39 }
  0x4f   : > { %1159 = vmatmul.mubr.msk.bf16.vlgmr.msra.gmra.mrb[4].mxu0 %vm550_vm0, %v1409_v19  ;;  %1160 = vmatmul.mubr.msk.bf16.vlgmr.msra.gmra.mrb[4].mxu1 %vm550_vm0, %v1409_v19 }
  0x50   : > { %719 = vmatpush1.bf16.msra.mxu0 %v1117_v44  ;;  %760 = vmatpush1.bf16.msra.mxu1 %v1119_v45 }
  0x51   : > { %720 = vmatprep.subr.bf16.mxu0 %v1134_v46  ;;  %761 = vmatprep.subr.bf16.mxu1 %v1136_v47 }
  0x52   : > { %750 = vmatprep.mubr.bf16.mxu0 %v1228_v48  ;;  %791 = vmatprep.mubr.bf16.mxu1 %v1228_v48 }
  0x54   : > { %721 = vmatpush1.bf16.msra.mxu0 %v1133_v53  ;;  %762 = vmatpush1.bf16.msra.mxu1 %v1135_v54 }
  0x55   : > { %722 = vmatprep.subr.bf16.mxu0 %v1150_v55  ;;  %763 = vmatprep.subr.bf16.mxu1 %v1152_v56 }
  0x58   : > { %723 = vmatpush1.bf16.msra.mxu0 %v1149_v61  ;;  %764 = vmatpush1.bf16.msra.mxu1 %v1151_v62 }
  0x59   : > { %800 = vmatprep.subr.bf16.mxu0 %v1122_v63  ;;  %841 = vmatprep.subr.bf16.mxu1 %v1124_v0 }
  0x5b   : > { %1161 = vmatmul.mubr.msk.bf16.vlgmr.msra.gmra.mrb[8].mxu0 %vm550_vm0, %v1409_v19  ;;  %1162 = vmatmul.mubr.msk.bf16.vlgmr.msra.gmra.mrb[8].mxu1 %vm550_vm0, %v1409_v19 }
  0x5c   : > { %801 = vmatpush1.bf16.msra.mxu0 %v1121_v5  ;;  %842 = vmatpush1.bf16.msra.mxu1 %v1123_v6 }
  0x5d   : > { %802 = vmatprep.subr.bf16.mxu0 %v1138_v7  ;;  %843 = vmatprep.subr.bf16.mxu1 %v1140_v8 }
  0x5e   : > { %832 = vmatprep.mubr.bf16.mxu0 %v1228_v48  ;;  %873 = vmatprep.mubr.bf16.mxu1 %v1228_v48  ;;  %v966_v48 = vunpack.c.0.s8 %v965_v21 }
  0x60   : > { %803 = vmatpush1.bf16.msra.mxu0 %v1137_v13  ;;  %844 = vmatpush1.bf16.msra.mxu1 %v1139_v14  ;;  %v1463_v31 = vsub.s32 %v966_v48, %v968_v23 }
  0x61   : > { %804 = vmatprep.subr.bf16.mxu0 %v1154_v15  ;;  %845 = vmatprep.subr.bf16.mxu1 %v1156_v16 }
  0x64   : > { %805 = vmatpush1.bf16.msra.mxu0 %v1153_v17  ;;  %846 = vmatpush1.bf16.msra.mxu1 %v1155_v18 }
  0x67   : > { %1163 = vmatmul.mubr.msk.bf16.vlgmr.msra.gmra.mrb[12].mxu0 %vm550_vm0, %v1409_v19  ;;  %1164 = vmatmul.mubr.msk.bf16.vlgmr.msra.gmra.mrb[12].mxu1 %vm550_vm0, %v1409_v19 }
 0x116   : > { %v588_v24 = vpop.f32.mrb[0].mxu0  ;;  %v629_v26 = vpop.f32.mrb[0].mxu1 }
 0x117   : > { %vm882_vm1 = vcmp.gt.f32.partialorder %v588_v24, 0.0  ;;  %v898_v25 = vmul.f32 0.2, %v588_v24  ;;  %v590_v27 = vpop.f32.mrb[1].mxu0  ;;  %vm884_vm2 = vcmp.gt.f32.partialorder %v629_v26, 0.0  ;;  %v631_v19 = vpop.f32.mrb[1].mxu1 }
 0x118   : > { %v900_v28 = vmul.f32 0.2, %v629_v26  ;;  %vm883_vm3 = vcmp.gt.f32.partialorder %v590_v27, 0.0  ;;  %v899_v29 = vmul.f32 0.2, %v590_v27  ;;  %v592_v32 = vpop.f32.mrb[2].mxu0 }
 0x119   : > { %v914_v30 = vsel %vm882_vm1, %v588_v24, %v898_v25  ;;  %vm885_vm4 = vcmp.gt.f32.partialorder %v631_v19, 0.0  ;;  %v901_v35 = vmul.f32 0.2, %v631_v19  ;;  %v633_v36 = vpop.f32.mrb[2].mxu1  ;;  %v593_v37 = vpop.f32.mrb[3].mxu0 }
 0x11a   : > { %v916_v33 = vsel %vm884_vm2, %v629_v26, %v900_v28  ;;  %v915_v34 = vsel %vm883_vm3, %v590_v27, %v899_v29  ;;  %v634_v39 = vpop.f32.mrb[3].mxu1 }
 0x11b   : > { %v1165_v38 = vpack.c.bf16 %v915_v34, %v914_v30  ;;  %v917_v40 = vsel %vm885_vm4, %v631_v19, %v901_v35 }
 0x11c   : > { %v1166_v42 = vpack.c.bf16 %v917_v40, %v916_v33 }
 0x11d   : > { %v970_v41 = vrot.slane %v1165_v38, %v1463_v31 }
 0x11e   : > { %v977_v43 = vrot.slane %v1166_v42, %v1463_v31 }
 0x120   : > { %v978_v44 = vcombine.low %v970_v41, %v977_v43 }
 0x122   : > { %v670_v45 = vpop.f32.mrb[4].mxu0  ;;  %1034 = vst [vmem:[%s1470_s5] sm:$0xff] %v978_v44  ;;  %v711_v47 = vpop.f32.mrb[4].mxu1 }
 0x123   : > { %vm886_vm5 = vcmp.gt.f32.partialorder %v670_v45, 0.0  ;;  %v902_v46 = vmul.f32 0.2, %v670_v45  ;;  %v672_v49 = vpop.f32.mrb[5].mxu0  ;;  %vm888_vm6 = vcmp.gt.f32.partialorder %v711_v47, 0.0  ;;  %v713_v53 = vpop.f32.mrb[5].mxu1 }
 0x124   : > { %v904_v50 = vmul.f32 0.2, %v711_v47  ;;  %vm887_vm7 = vcmp.gt.f32.partialorder %v672_v49, 0.0  ;;  %v903_v51 = vmul.f32 0.2, %v672_v49  ;;  %v674_v54 = vpop.f32.mrb[6].mxu0 }
 0x125   : > { %v918_v52 = vsel %vm886_vm5, %v670_v45, %v902_v46  ;;  %vm889_vm8 = vcmp.gt.f32.partialorder %v713_v53, 0.0  ;;  %v905_v57 = vmul.f32 0.2, %v713_v53  ;;  %v715_v58 = vpop.f32.mrb[6].mxu1  ;;  %v675_v59 = vpop.f32.mrb[7].mxu0 }
 0x126   : > { %v920_v55 = vsel %vm888_vm6, %v711_v47, %v904_v50  ;;  %v919_v56 = vsel %vm887_vm7, %v672_v49, %v903_v51  ;;  %v716_v61 = vpop.f32.mrb[7].mxu1 }
 0x127   : > { %v1167_v60 = vpack.c.bf16 %v919_v56, %v918_v52  ;;  %v921_v62 = vsel %vm889_vm8, %v713_v53, %v905_v57 }
 0x128   : > { %v1168_v0 = vpack.c.bf16 %v921_v62, %v920_v55 }
 0x129   : > { %v987_v63 = vrot.slane %v1167_v60, %v1463_v31 }
 0x12a   : > { %v994_v1 = vrot.slane %v1168_v0, %v1463_v31 }
 0x12c   : > { %v995_v2 = vcombine.low %v987_v63, %v994_v1 }
 0x12e   : > { %v752_v3 = vpop.f32.mrb[8].mxu0  ;;  %1035 = vst [vmem:[%s1470_s5 + $0x8] sm:$0xff] %v995_v2  ;;  %v793_v5 = vpop.f32.mrb[8].mxu1 }
 0x12f   : > { %vm890_vm9 = vcmp.gt.f32.partialorder %v752_v3, 0.0  ;;  %v906_v4 = vmul.f32 0.2, %v752_v3  ;;  %v754_v6 = vpop.f32.mrb[9].mxu0  ;;  %vm892_vm10 = vcmp.gt.f32.partialorder %v793_v5, 0.0  ;;  %v795_v10 = vpop.f32.mrb[9].mxu1 }
 0x130   : > { %v908_v7 = vmul.f32 0.2, %v793_v5  ;;  %vm891_vm11 = vcmp.gt.f32.partialorder %v754_v6, 0.0  ;;  %v907_v8 = vmul.f32 0.2, %v754_v6  ;;  %v756_v11 = vpop.f32.mrb[10].mxu0 }
 0x131   : > { %v922_v9 = vsel %vm890_vm9, %v752_v3, %v906_v4  ;;  %vm893_vm12 = vcmp.gt.f32.partialorder %v795_v10, 0.0  ;;  %v909_v14 = vmul.f32 0.2, %v795_v10  ;;  %v797_v15 = vpop.f32.mrb[10].mxu1  ;;  %v757_v16 = vpop.f32.mrb[11].mxu0 }
 0x132   : > { %v924_v12 = vsel %vm892_vm10, %v793_v5, %v908_v7  ;;  %v923_v13 = vsel %vm891_vm11, %v754_v6, %v907_v8  ;;  %v798_v18 = vpop.f32.mrb[11].mxu1 }
 0x133   : > { %v1169_v17 = vpack.c.bf16 %v923_v13, %v922_v9  ;;  %v925_v20 = vsel %vm893_vm12, %v795_v10, %v909_v14 }
 0x134   : > { %v1170_v22 = vpack.c.bf16 %v925_v20, %v924_v12 }
 0x135   : > { %v1004_v21 = vrot.slane %v1169_v17, %v1463_v31 }
 0x136   : > { %v1011_v48 = vrot.slane %v1170_v22, %v1463_v31 }
 0x138   : > { %v1012_v23 = vcombine.low %v1004_v21, %v1011_v48 }
 0x13a   : > { %v834_v24 = vpop.f32.mrb[12].mxu0  ;;  %1036 = vst [vmem:[%s1470_s5 + $0x10] sm:$0xff] %v1012_v23  ;;  %v875_v26 = vpop.f32.mrb[12].mxu1 }
 0x13b   : > { %vm894_vm13 = vcmp.gt.f32.partialorder %v834_v24, 0.0  ;;  %v910_v25 = vmul.f32 0.2, %v834_v24  ;;  %v836_v27 = vpop.f32.mrb[13].mxu0  ;;  %vm896_vm14 = vcmp.gt.f32.partialorder %v875_v26, 0.0  ;;  %v877_v19 = vpop.f32.mrb[13].mxu1 }
 0x13c   : > { %v912_v28 = vmul.f32 0.2, %v875_v26  ;;  %vm895_vm15 = vcmp.gt.f32.partialorder %v836_v27, 0.0  ;;  %v911_v29 = vmul.f32 0.2, %v836_v27  ;;  %v838_v32 = vpop.f32.mrb[14].mxu0 }
 0x13d   : > { %v926_v30 = vsel %vm894_vm13, %v834_v24, %v910_v25  ;;  %vm897_vm0 = vcmp.gt.f32.partialorder %v877_v19, 0.0  ;;  %v913_v35 = vmul.f32 0.2, %v877_v19  ;;  %v879_v36 = vpop.f32.mrb[14].mxu1  ;;  %v839_v37 = vpop.f32.mrb[15].mxu0 }
 0x13e   : > { %v928_v33 = vsel %vm896_vm14, %v875_v26, %v912_v28  ;;  %v927_v34 = vsel %vm895_vm15, %v836_v27, %v911_v29  ;;  %v880_v39 = vpop.f32.mrb[15].mxu1 }
 0x13f   : > { %v1171_v38 = vpack.c.bf16 %v927_v34, %v926_v30  ;;  %v929_v40 = vsel %vm897_vm0, %v877_v19, %v913_v35 }
 0x140   : > { %v1172_v42 = vpack.c.bf16 %v929_v40, %v928_v33 }
 0x141   : > { %v1021_v41 = vrot.slane %v1171_v38, %v1463_v31 }
 0x142   : > { %v1028_v43 = vrot.slane %v1172_v42, %v1463_v31 }
 0x144   : > { %v1029_v44 = vcombine.low %v1021_v41, %v1028_v43 }
 0x146   : > { %1037 = vst [vmem:[%s1470_s5 + $0x18] sm:$0xff] %v1029_v44 }
 0x147 PF: > { %p9_p9 = scmp.ge.s32.totalorder %s1262_s13, 6   ;;  %s1495_s9 = smov %s1222_s10 }
 0x148   : > { %s1496_s10 = smov %s1271_s16  ;;  %s1497_s11 = smov %s1262_s13 }
 0x149   :  { %11 = sbr.rel (!%p9_p9) target bundleno = 2 (0x2), region = 86 }

// kernel: discriminator_forward.6
= control target key start
LH: loop header
LB: loop body
LE: loop exit
PB: predicated region body
PF: predicated region fallthrough
CT: control target
= control target key end

     0   :  { %v1083_v3 = vmov 0   ;;  %vm403_vm0 = vcmask 523264   ;;  %s1378_s1 = inlined_call_operand.vmem [shape: bf16[64,2048], index: 1, kind: input, shape index: {}]   ;;  %s1379_s0 = inlined_call_operand.vmem [shape: bf16[8,64], index: 0, kind: input, shape index: {}]   ;;  %s1380_s2 = inlined_call_operand.vmem [shape: f32[8,1], index: 2, kind: input, shape index: {}]   ;;  %s1381_s3 = inlined_call_operand.vmem [shape: f32[8,1], index: 3, kind: input, shape index: {}]   ;;  %s1382_s4 = inlined_call_operand.vmem [shape: bf16[8,2048], index: 4, kind: output, shape index: {}]  }
   0x1   :  { %v19_v0 = vld [vmem:[%s1378_s1] sm:$0xff]  ;;  %v20_v2 = vld [vmem:[%s1378_s1 + $0x8] sm:$0xff]  ;;  %439 = vmatprep.mubr.bf16.mxu0 %v1083_v3  ;;  %480 = vmatprep.mubr.bf16.mxu1 %v1083_v3  ;;  %v21_v31 = vld [vmem:[%s1378_s1 + $0x10] sm:$0xff] }
   0x2   :  { %v27_v1 = vld [vmem:[%s1378_s1 + $0x40] sm:$0xff]  ;;  %v28_v6 = vld [vmem:[%s1378_s1 + $0x48] sm:$0xff]  ;;  %1079 = vset.pattern.permute.xlu1 %v1083_v3  ;;  %1080 = vset.pattern.permute.xlu0 %v1083_v3  ;;  %v29_v32 = vld [vmem:[%s1378_s1 + $0x50] sm:$0xff] }
   0x3   :  { %v991_v4 = vcombine.high %v19_v0, %v27_v1  ;;  %v990_v5 = vcombine.low %v19_v0, %v27_v1  ;;  %v35_v7 = vld [vmem:[%s1378_s1 + $0x80] sm:$0xff]  ;;  %v993_v9 = vcombine.high %v20_v2, %v28_v6  ;;  %v992_v10 = vcombine.low %v20_v2, %v28_v6  ;;  %v36_v12 = vld [vmem:[%s1378_s1 + $0x88] sm:$0xff]  ;;  %v22_v33 = vld [vmem:[%s1378_s1 + $0x18] sm:$0xff] }
   0x4   :  { %v43_v8 = vld [vmem:[%s1378_s1 + $0xc0] sm:$0xff]  ;;  %v44_v13 = vld [vmem:[%s1378_s1 + $0xc8] sm:$0xff]  ;;  %v30_v34 = vld [vmem:[%s1378_s1 + $0x58] sm:$0xff]  ;;  %v995_v37 = vcombine.high %v21_v31, %v29_v32  ;;  %v994_v44 = vcombine.low %v21_v31, %v29_v32 }
   0x5   :  { %v1007_v11 = vcombine.high %v35_v7, %v43_v8  ;;  %v51_v14 = vld [vmem:[%s1378_s1 + $0x100] sm:$0xff]  ;;  %407 = vmatprep.subr.bf16.mxu0 %v991_v4  ;;  %v1009_v15 = vcombine.high %v36_v12, %v44_v13  ;;  %v52_v17 = vld [vmem:[%s1378_s1 + $0x108] sm:$0xff]  ;;  %448 = vmatprep.subr.bf16.mxu1 %v993_v9  ;;  %v1006_v19 = vcombine.low %v35_v7, %v43_v8  ;;  %v37_v39 = vld [vmem:[%s1378_s1 + $0x90] sm:$0xff] }
   0x6   :  { %v59_v16 = vld [vmem:[%s1378_s1 + $0x140] sm:$0xff]  ;;  %v60_v18 = vld [vmem:[%s1378_s1 + $0x148] sm:$0xff]  ;;  %408 = vmatpush1.bf16.msra.mxu0 %v990_v5  ;;  %449 = vmatpush1.bf16.msra.mxu1 %v992_v10  ;;  %v1008_v20 = vcombine.low %v36_v12, %v44_v13  ;;  %v997_v38 = vcombine.high %v22_v33, %v30_v34  ;;  %v45_v40 = vld [vmem:[%s1378_s1 + $0xd0] sm:$0xff]  ;;  %v996_v45 = vcombine.low %v22_v33, %v30_v34 }
   0x7   :  { %409 = vmatprep.subr.bf16.mxu0 %v1007_v11  ;;  %v1023_v21 = vcombine.high %v51_v14, %v59_v16  ;;  %450 = vmatprep.subr.bf16.mxu1 %v1009_v15  ;;  %v1025_v22 = vcombine.high %v52_v17, %v60_v18  ;;  %v67_v23 = vld [vmem:[%s1378_s1 + $0x180] sm:$0xff]  ;;  %v68_v25 = vld [vmem:[%s1378_s1 + $0x188] sm:$0xff]  ;;  %v1022_v27 = vcombine.low %v51_v14, %v59_v16  ;;  %v38_v41 = vld [vmem:[%s1378_s1 + $0x98] sm:$0xff] }
   0x8   :  { %v75_v24 = vld [vmem:[%s1378_s1 + $0x1c0] sm:$0xff]  ;;  %v76_v26 = vld [vmem:[%s1378_s1 + $0x1c8] sm:$0xff]  ;;  %v1024_v28 = vcombine.low %v52_v17, %v60_v18  ;;  %v46_v42 = vld [vmem:[%s1378_s1 + $0xd8] sm:$0xff]  ;;  %v1011_v46 = vcombine.high %v37_v39, %v45_v40  ;;  %v1010_v52 = vcombine.low %v37_v39, %v45_v40 }
   0x9   :  { %v1039_v29 = vcombine.high %v67_v23, %v75_v24  ;;  %v1041_v30 = vcombine.high %v68_v25, %v76_v26  ;;  %v1038_v35 = vcombine.low %v67_v23, %v75_v24  ;;  %v1040_v36 = vcombine.low %v68_v25, %v76_v26  ;;  %v1188_v43 = vld [vmem:[%s1379_s0] sm:$0xf]  ;;  %v53_v48 = vld [vmem:[%s1378_s1 + $0x110] sm:$0xff]  ;;  %v54_v50 = vld [vmem:[%s1378_s1 + $0x118] sm:$0xff] }
   0xa   :  { %410 = vmatpush1.bf16.msra.mxu0 %v1006_v19  ;;  %451 = vmatpush1.bf16.msra.mxu1 %v1008_v20  ;;  %v1013_v47 = vcombine.high %v38_v41, %v46_v42  ;;  %v61_v49 = vld [vmem:[%s1378_s1 + $0x150] sm:$0xff]  ;;  %v62_v51 = vld [vmem:[%s1378_s1 + $0x158] sm:$0xff]  ;;  %v1012_v53 = vcombine.low %v38_v41, %v46_v42  ;;  %v23_v0 = vld [vmem:[%s1378_s1 + $0x20] sm:$0xff] }
   0xb   :  { %411 = vmatprep.subr.bf16.mxu0 %v1023_v21  ;;  %452 = vmatprep.subr.bf16.mxu1 %v1025_v22  ;;  %v1027_v54 = vcombine.high %v53_v48, %v61_v49  ;;  %v1029_v55 = vcombine.high %v54_v50, %v62_v51  ;;  %v69_v56 = vld [vmem:[%s1378_s1 + $0x190] sm:$0xff]  ;;  %v70_v58 = vld [vmem:[%s1378_s1 + $0x198] sm:$0xff]  ;;  %v1026_v60 = vcombine.low %v53_v48, %v61_v49  ;;  %v31_v1 = vld [vmem:[%s1378_s1 + $0x60] sm:$0xff] }
   0xc   :  { %v77_v57 = vld [vmem:[%s1378_s1 + $0x1d0] sm:$0xff]  ;;  %v78_v59 = vld [vmem:[%s1378_s1 + $0x1d8] sm:$0xff]  ;;  %v1028_v61 = vcombine.low %v54_v50, %v62_v51  ;;  %v24_v2 = vld [vmem:[%s1378_s1 + $0x28] sm:$0xff]  ;;  %v999_v7 = vcombine.high %v23_v0, %v31_v1  ;;  %v998_v13 = vcombine.low %v23_v0, %v31_v1 }
   0xd   :  { %v1043_v62 = vcombine.high %v69_v56, %v77_v57  ;;  %v1045_v63 = vcombine.high %v70_v58, %v78_v59  ;;  %v32_v4 = vld [vmem:[%s1378_s1 + $0x68] sm:$0xff]  ;;  %v1042_v5 = vcombine.low %v69_v56, %v77_v57  ;;  %v1044_v6 = vcombine.low %v70_v58, %v78_v59  ;;  %v39_v9 = vld [vmem:[%s1378_s1 + $0xa0] sm:$0xff]  ;;  %v25_v33 = vld [vmem:[%s1378_s1 + $0x30] sm:$0xff] }
   0xe   :  { %412 = vmatpush1.bf16.msra.mxu0 %v1022_v27  ;;  %453 = vmatpush1.bf16.msra.mxu1 %v1024_v28  ;;  %v1001_v8 = vcombine.high %v24_v2, %v32_v4  ;;  %v47_v10 = vld [vmem:[%s1378_s1 + $0xe0] sm:$0xff]  ;;  %v40_v11 = vld [vmem:[%s1378_s1 + $0xa8] sm:$0xff]  ;;  %v1000_v14 = vcombine.low %v24_v2, %v32_v4  ;;  %v33_v34 = vld [vmem:[%s1378_s1 + $0x70] sm:$0xff] }
   0xf   :  { %413 = vmatprep.subr.bf16.mxu0 %v1039_v29  ;;  %454 = vmatprep.subr.bf16.mxu1 %v1041_v30  ;;  %v48_v12 = vld [vmem:[%s1378_s1 + $0xe8] sm:$0xff]  ;;  %v1015_v15 = vcombine.high %v39_v9, %v47_v10  ;;  %v55_v17 = vld [vmem:[%s1378_s1 + $0x120] sm:$0xff]  ;;  %v1014_v21 = vcombine.low %v39_v9, %v47_v10  ;;  %v1003_v39 = vcombine.high %v25_v33, %v33_v34  ;;  %v41_v41 = vld [vmem:[%s1378_s1 + $0xb0] sm:$0xff] }
  0x10   :  { %v1017_v16 = vcombine.high %v40_v11, %v48_v12  ;;  %v63_v18 = vld [vmem:[%s1378_s1 + $0x160] sm:$0xff]  ;;  %v56_v19 = vld [vmem:[%s1378_s1 + $0x128] sm:$0xff]  ;;  %v1016_v22 = vcombine.low %v40_v11, %v48_v12  ;;  %v49_v42 = vld [vmem:[%s1378_s1 + $0xf0] sm:$0xff] }
  0x11   :  { %v64_v20 = vld [vmem:[%s1378_s1 + $0x168] sm:$0xff]  ;;  %v1031_v23 = vcombine.high %v55_v17, %v63_v18  ;;  %v71_v25 = vld [vmem:[%s1378_s1 + $0x1a0] sm:$0xff]  ;;  %v1030_v29 = vcombine.low %v55_v17, %v63_v18  ;;  %v1019_v48 = vcombine.high %v41_v41, %v49_v42  ;;  %v57_v50 = vld [vmem:[%s1378_s1 + $0x130] sm:$0xff] }
  0x12   :  { %414 = vmatpush1.bf16.msra.mxu0 %v1038_v35  ;;  %455 = vmatpush1.bf16.msra.mxu1 %v1040_v36  ;;  %v1033_v24 = vcombine.high %v56_v19, %v64_v20  ;;  %v79_v26 = vld [vmem:[%s1378_s1 + $0x1e0] sm:$0xff]  ;;  %v72_v27 = vld [vmem:[%s1378_s1 + $0x1a8] sm:$0xff]  ;;  %v1032_v30 = vcombine.low %v56_v19, %v64_v20  ;;  %v26_v35 = vld [vmem:[%s1378_s1 + $0x38] sm:$0xff] }
  0x13   :  { %489 = vmatprep.subr.bf16.mxu0 %v995_v37  ;;  %530 = vmatprep.subr.bf16.mxu1 %v997_v38  ;;  %v80_v28 = vld [vmem:[%s1378_s1 + $0x1e8] sm:$0xff]  ;;  %v1047_v31 = vcombine.high %v71_v25, %v79_v26  ;;  %v34_v36 = vld [vmem:[%s1378_s1 + $0x78] sm:$0xff]  ;;  %v1046_v37 = vcombine.low %v71_v25, %v79_v26  ;;  %v65_v51 = vld [vmem:[%s1378_s1 + $0x170] sm:$0xff] }
  0x14   :  { %v1049_v32 = vcombine.high %v72_v27, %v80_v28  ;;  %v1048_v38 = vcombine.low %v72_v27, %v80_v28  ;;  %v1005_v40 = vcombine.high %v26_v35, %v34_v36  ;;  %v1035_v56 = vcombine.high %v57_v50, %v65_v51  ;;  %v73_v58 = vld [vmem:[%s1378_s1 + $0x1b0] sm:$0xff] }
  0x15   :  { %1054 = vmatmul.mubr.msk.bf16.vlgmr.msra.gmra.mrb[0].mxu0 %vm403_vm0, %v1188_v43  ;;  %1055 = vmatmul.mubr.msk.bf16.vlgmr.msra.gmra.mrb[0].mxu1 %vm403_vm0, %v1188_v43  ;;  %v81_v59 = vld [vmem:[%s1378_s1 + $0x1f0] sm:$0xff] }
  0x16   :  { %490 = vmatpush1.bf16.msra.mxu0 %v994_v44  ;;  %531 = vmatpush1.bf16.msra.mxu1 %v996_v45  ;;  %v42_v44 = vld [vmem:[%s1378_s1 + $0xb8] sm:$0xff]  ;;  %v1051_v0 = vcombine.high %v73_v58, %v81_v59  ;;  %v1050_v2 = vcombine.low %v73_v58, %v81_v59 }
  0x17   :  { %491 = vmatprep.subr.bf16.mxu0 %v1011_v46  ;;  %532 = vmatprep.subr.bf16.mxu1 %v1013_v47  ;;  %v50_v45 = vld [vmem:[%s1378_s1 + $0xf8] sm:$0xff]  ;;  %v1002_v46 = vcombine.low %v25_v33, %v33_v34  ;;  %v1004_v47 = vcombine.low %v26_v35, %v34_v36 }
  0x18   :  { %521 = vmatprep.mubr.bf16.mxu0 %v1083_v3  ;;  %562 = vmatprep.mubr.bf16.mxu1 %v1083_v3  ;;  %v1021_v49 = vcombine.high %v42_v44, %v50_v45 }
  0x1a   :  { %492 = vmatpush1.bf16.msra.mxu0 %v1010_v52  ;;  %533 = vmatpush1.bf16.msra.mxu1 %v1012_v53  ;;  %v58_v52 = vld [vmem:[%s1378_s1 + $0x138] sm:$0xff] }
  0x1b   :  { %493 = vmatprep.subr.bf16.mxu0 %v1027_v54  ;;  %534 = vmatprep.subr.bf16.mxu1 %v1029_v55  ;;  %v66_v53 = vld [vmem:[%s1378_s1 + $0x178] sm:$0xff]  ;;  %v1018_v54 = vcombine.low %v41_v41, %v49_v42  ;;  %v1020_v55 = vcombine.low %v42_v44, %v50_v45 }
  0x1c   :  { %v1037_v57 = vcombine.high %v58_v52, %v66_v53 }
  0x1e   :  { %494 = vmatpush1.bf16.msra.mxu0 %v1026_v60  ;;  %535 = vmatpush1.bf16.msra.mxu1 %v1028_v61  ;;  %v74_v60 = vld [vmem:[%s1378_s1 + $0x1b8] sm:$0xff] }
  0x1f   :  { %495 = vmatprep.subr.bf16.mxu0 %v1043_v62  ;;  %536 = vmatprep.subr.bf16.mxu1 %v1045_v63  ;;  %v82_v61 = vld [vmem:[%s1378_s1 + $0x1f8] sm:$0xff]  ;;  %v1034_v62 = vcombine.low %v57_v50, %v65_v51  ;;  %v1036_v63 = vcombine.low %v58_v52, %v66_v53  ;;  %v822_v51 = vld [vmem:[%s1380_s2] sm:$0xff] }
  0x20   :  { %v1053_v1 = vcombine.high %v74_v60, %v82_v61  ;;  %v1052_v4 = vcombine.low %v74_v60, %v82_v61  ;;  %825 = vperm.xlu1 %1079, %v822_v51   ;;  %v844_v52 = vld [vmem:[%s1381_s3] sm:$0xff] }
  0x22   :  { %496 = vmatpush1.bf16.msra.mxu0 %v1042_v5  ;;  %537 = vmatpush1.bf16.msra.mxu1 %v1044_v6 }
  0x23   :  { %571 = vmatprep.subr.bf16.mxu0 %v999_v7  ;;  %612 = vmatprep.subr.bf16.mxu1 %v1001_v8 }
  0x24   :  { %847 = vperm.xlu1 %1079, %v844_v52  }
  0x25   :  { %1056 = vmatmul.mubr.msk.bf16.vlgmr.msra.gmra.mrb[4].mxu0 %vm403_vm0, %v1188_v43  ;;  %1057 = vmatmul.mubr.msk.bf16.vlgmr.msra.gmra.mrb[4].mxu1 %vm403_vm0, %v1188_v43 }
  0x26   :  { %572 = vmatpush1.bf16.msra.mxu0 %v998_v13  ;;  %613 = vmatpush1.bf16.msra.mxu1 %v1000_v14 }
  0x27   :  { %573 = vmatprep.subr.bf16.mxu0 %v1015_v15  ;;  %614 = vmatprep.subr.bf16.mxu1 %v1017_v16 }
  0x28   :  { %603 = vmatprep.mubr.bf16.mxu0 %v1083_v3  ;;  %644 = vmatprep.mubr.bf16.mxu1 %v1083_v3 }
  0x2a   :  { %574 = vmatpush1.bf16.msra.mxu0 %v1014_v21  ;;  %615 = vmatpush1.bf16.msra.mxu1 %v1016_v22 }
  0x2b   :  { %575 = vmatprep.subr.bf16.mxu0 %v1031_v23  ;;  %616 = vmatprep.subr.bf16.mxu1 %v1033_v24 }
  0x2e   :  { %576 = vmatpush1.bf16.msra.mxu0 %v1030_v29  ;;  %617 = vmatpush1.bf16.msra.mxu1 %v1032_v30 }
  0x2f   :  { %577 = vmatprep.subr.bf16.mxu0 %v1047_v31  ;;  %618 = vmatprep.subr.bf16.mxu1 %v1049_v32 }
  0x32   :  { %578 = vmatpush1.bf16.msra.mxu0 %v1046_v37  ;;  %619 = vmatpush1.bf16.msra.mxu1 %v1048_v38 }
  0x33   :  { %653 = vmatprep.subr.bf16.mxu0 %v1003_v39  ;;  %694 = vmatprep.subr.bf16.mxu1 %v1005_v40 }
  0x35   :  { %1058 = vmatmul.mubr.msk.bf16.vlgmr.msra.gmra.mrb[8].mxu0 %vm403_vm0, %v1188_v43  ;;  %1059 = vmatmul.mubr.msk.bf16.vlgmr.msra.gmra.mrb[8].mxu1 %vm403_vm0, %v1188_v43 }
  0x36   :  { %654 = vmatpush1.bf16.msra.mxu0 %v1002_v46  ;;  %695 = vmatpush1.bf16.msra.mxu1 %v1004_v47 }
  0x37   :  { %655 = vmatprep.subr.bf16.mxu0 %v1019_v48  ;;  %696 = vmatprep.subr.bf16.mxu1 %v1021_v49 }
  0x38   :  { %685 = vmatprep.mubr.bf16.mxu0 %v1083_v3  ;;  %726 = vmatprep.mubr.bf16.mxu1 %v1083_v3 }
  0x3a   :  { %656 = vmatpush1.bf16.msra.mxu0 %v1018_v54  ;;  %697 = vmatpush1.bf16.msra.mxu1 %v1020_v55 }
  0x3b   :  { %657 = vmatprep.subr.bf16.mxu0 %v1035_v56  ;;  %698 = vmatprep.subr.bf16.mxu1 %v1037_v57 }
  0x3e   :  { %658 = vmatpush1.bf16.msra.mxu0 %v1034_v62  ;;  %699 = vmatpush1.bf16.msra.mxu1 %v1036_v63 }
  0x3f   :  { %659 = vmatprep.subr.bf16.mxu0 %v1051_v0  ;;  %700 = vmatprep.subr.bf16.mxu1 %v1053_v1 }
  0x42   :  { %660 = vmatpush1.bf16.msra.mxu0 %v1050_v2  ;;  %701 = vmatpush1.bf16.msra.mxu1 %v1052_v4 }
  0x45   :  { %1060 = vmatmul.mubr.msk.bf16.vlgmr.msra.gmra.mrb[12].mxu0 %vm403_vm0, %v1188_v43  ;;  %1061 = vmatmul.mubr.msk.bf16.vlgmr.msra.gmra.mrb[12].mxu1 %vm403_vm0, %v1188_v43 }
  0xe8   :  { %v441_v3 = vpop.f32.mrb[0].mxu0  ;;  %v482_v6 = vpop.f32.mrb[0].mxu1 }
  0xe9   :  { %v443_v5 = vpop.f32.mrb[1].mxu0  ;;  %v484_v9 = vpop.f32.mrb[1].mxu1 }
  0xea   :  { %v735_v7 = vadd.f32 %v443_v5, %v441_v3  ;;  %v445_v8 = vpop.f32.mrb[2].mxu0  ;;  %v486_v11 = vpop.f32.mrb[2].mxu1 }
  0xeb   :  { %v446_v10 = vpop.f32.mrb[3].mxu0  ;;  %v487_v13 = vpop.f32.mrb[3].mxu1 }
  0xec   :  { %v736_v12 = vadd.f32 %v735_v7, %v482_v6 }
  0xee   :  { %v737_v14 = vadd.f32 %v736_v12, %v484_v9 }
  0xf8   :  { %v523_v15 = vpop.f32.mrb[4].mxu0  ;;  %v564_v18 = vpop.f32.mrb[4].mxu1 }
  0xf9   :  { %v738_v16 = vadd.f32 %v737_v14, %v523_v15  ;;  %v525_v17 = vpop.f32.mrb[5].mxu0  ;;  %v566_v20 = vpop.f32.mrb[5].mxu1 }
  0xfa   :  { %v527_v19 = vpop.f32.mrb[6].mxu0  ;;  %v568_v43 = vpop.f32.mrb[6].mxu1 }
  0xfb   :  { %v739_v21 = vadd.f32 %v738_v16, %v525_v17  ;;  %v528_v22 = vpop.f32.mrb[7].mxu0  ;;  %v569_v23 = vpop.f32.mrb[7].mxu1 }
  0xfd   :  { %v740_v24 = vadd.f32 %v739_v21, %v564_v18 }
  0xff   :  { %v741_v25 = vadd.f32 %v740_v24, %v566_v20 }
 0x108   :  { %v605_v26 = vpop.f32.mrb[8].mxu0  ;;  %v646_v29 = vpop.f32.mrb[8].mxu1 }
 0x109   :  { %v742_v27 = vadd.f32 %v741_v25, %v605_v26  ;;  %v607_v28 = vpop.f32.mrb[9].mxu0  ;;  %v648_v31 = vpop.f32.mrb[9].mxu1 }
 0x10a   :  { %v609_v30 = vpop.f32.mrb[10].mxu0  ;;  %v650_v34 = vpop.f32.mrb[10].mxu1 }
 0x10b   :  { %v743_v32 = vadd.f32 %v742_v27, %v607_v28  ;;  %v610_v33 = vpop.f32.mrb[11].mxu0  ;;  %v651_v35 = vpop.f32.mrb[11].mxu1 }
 0x10d   :  { %v744_v36 = vadd.f32 %v743_v32, %v646_v29 }
 0x10f   :  { %v745_v37 = vadd.f32 %v744_v36, %v648_v31 }
 0x118   :  { %v687_v38 = vpop.f32.mrb[12].mxu0  ;;  %v728_v41 = vpop.f32.mrb[12].mxu1 }
 0x119   :  { %v746_v39 = vadd.f32 %v745_v37, %v687_v38  ;;  %v689_v40 = vpop.f32.mrb[13].mxu0  ;;  %v730_v44 = vpop.f32.mrb[13].mxu1 }
 0x11a   :  { %v691_v42 = vpop.f32.mrb[14].mxu0  ;;  %v732_v47 = vpop.f32.mrb[14].mxu1 }
 0x11b   :  { %v747_v45 = vadd.f32 %v746_v39, %v689_v40  ;;  %v692_v46 = vpop.f32.mrb[15].mxu0  ;;  %v733_v48 = vpop.f32.mrb[15].mxu1 }
 0x11c   :  { %v826_v47 = vpop.permute.xlu1 %825 }
 0x11d   :  { %v748_v49 = vadd.f32 %v747_v45, %v728_v41 }
 0x11f   :  { %v749_v50 = vadd.f32 %v748_v49, %v730_v44 }
 0x121   :  { %750 = vadd.xlane.f32.xlu0 %v749_v50 }
 0x1ae   :  { %v751_v53 = vpop.xlane.xlu0 %750 }
 0x1af   :  { %v753_v54 = vmul.f32 0.00048828125, %v751_v53 }
 0x1b1   :  { %v754_v55 = vsub.f32 %v441_v3, %v753_v54  ;;  %v755_v56 = vsub.f32 %v443_v5, %v753_v54  ;;  %v756_v57 = vsub.f32 %v482_v6, %v753_v54  ;;  %v757_v60 = vsub.f32 %v484_v9, %v753_v54 }
 0x1b2   :  { %v758_v61 = vsub.f32 %v523_v15, %v753_v54  ;;  %v759_v0 = vsub.f32 %v525_v17, %v753_v54  ;;  %v760_v4 = vsub.f32 %v564_v18, %v753_v54  ;;  %v761_v10 = vsub.f32 %v566_v20, %v753_v54 }
 0x1b3   :  { %v770_v58 = vmul.f32 %v754_v55, %v754_v55  ;;  %v771_v59 = vmul.f32 %v755_v56, %v755_v56  ;;  %v772_v62 = vmul.f32 %v756_v57, %v756_v57  ;;  %v773_v1 = vmul.f32 %v757_v60, %v757_v60 }
 0x1b4   :  { %v774_v7 = vmul.f32 %v758_v61, %v758_v61  ;;  %v775_v11 = vmul.f32 %v759_v0, %v759_v0  ;;  %v762_v13 = vsub.f32 %v605_v26, %v753_v54  ;;  %v776_v14 = vmul.f32 %v760_v4, %v760_v4 }
 0x1b5   :  { %v786_v63 = vadd.f32 %v771_v59, %v770_v58  ;;  %v763_v5 = vsub.f32 %v607_v28, %v753_v54  ;;  %v777_v6 = vmul.f32 %v761_v10, %v761_v10  ;;  %v764_v19 = vsub.f32 %v646_v29, %v753_v54 }
 0x1b6   :  { %v778_v9 = vmul.f32 %v762_v13, %v762_v13  ;;  %v765_v21 = vsub.f32 %v648_v31, %v753_v54  ;;  %v766_v43 = vsub.f32 %v687_v38, %v753_v54  ;;  %v767_v24 = vsub.f32 %v689_v40, %v753_v54 }
 0x1b7   :  { %v787_v2 = vadd.f32 %v786_v63, %v772_v62  ;;  %v779_v22 = vmul.f32 %v763_v5, %v763_v5  ;;  %v780_v23 = vmul.f32 %v764_v19, %v764_v19  ;;  %v768_v27 = vsub.f32 %v728_v41, %v753_v54 }
 0x1b8   :  { %v781_v25 = vmul.f32 %v765_v21, %v765_v21  ;;  %v782_v30 = vmul.f32 %v766_v43, %v766_v43  ;;  %v769_v32 = vsub.f32 %v730_v44, %v753_v54  ;;  %v783_v33 = vmul.f32 %v767_v24, %v767_v24 }
 0x1b9   :  { %v788_v8 = vadd.f32 %v787_v2, %v773_v1  ;;  %v784_v34 = vmul.f32 %v768_v27, %v768_v27 }
 0x1ba   :  { %v785_v29 = vmul.f32 %v769_v32, %v769_v32 }
 0x1bb   :  { %v789_v12 = vadd.f32 %v788_v8, %v774_v7 }
 0x1bd   :  { %v790_v3 = vadd.f32 %v789_v12, %v775_v11  ;;  %v848_v11 = vpop.permute.xlu1 %847 }
 0x1bf   :  { %v791_v16 = vadd.f32 %v790_v3, %v776_v14 }
 0x1c1   :  { %v792_v15 = vadd.f32 %v791_v16, %v777_v6 }
 0x1c3   :  { %v793_v17 = vadd.f32 %v792_v15, %v778_v9 }
 0x1c5   :  { %v794_v18 = vadd.f32 %v793_v17, %v779_v22 }
 0x1c7   :  { %v795_v20 = vadd.f32 %v794_v18, %v780_v23 }
 0x1c9   :  { %v796_v26 = vadd.f32 %v795_v20, %v781_v25 }
 0x1cb   :  { %v797_v28 = vadd.f32 %v796_v26, %v782_v30 }
 0x1cd   :  { %v798_v35 = vadd.f32 %v797_v28, %v783_v33 }
 0x1cf   :  { %v799_v36 = vadd.f32 %v798_v35, %v784_v34 }
 0x1d1   :  { %v800_v37 = vadd.f32 %v799_v36, %v785_v29 }
 0x1d3   :  { %801 = vadd.xlane.f32.xlu0 %v800_v37 }
 0x260   :  { %v802_v31 = vpop.xlane.xlu0 %801 }
 0x261   :  { %v803_v39 = vmul.f32 0.00048828125, %v802_v31 }
 0x263   :  { %v804_v38 = vadd.f32 1e-05, %v803_v39 }
 0x265   :  { %1081 = vrsqrt.f32 %v804_v38 }
 0x26f   :  { %v1082_v42 = vpop.eup %1081 }
 0x270   :  { %v806_v40 = vmul.f32 %v1082_v42, %v754_v55  ;;  %v807_v45 = vmul.f32 %v1082_v42, %v755_v56  ;;  %v808_v46 = vmul.f32 %v1082_v42, %v756_v57  ;;  %v809_v41 = vmul.f32 %v1082_v42, %v757_v60 }
 0x271   :  { %v810_v48 = vmul.f32 %v1082_v42, %v758_v61  ;;  %v811_v44 = vmul.f32 %v1082_v42, %v759_v0  ;;  %v812_v49 = vmul.f32 %v1082_v42, %v760_v4  ;;  %v813_v50 = vmul.f32 %v1082_v42, %v761_v10 }
 0x272   :  { %v814_v51 = vmul.f32 %v1082_v42, %v762_v13  ;;  %v815_v52 = vmul.f32 %v1082_v42, %v763_v5  ;;  %v816_v53 = vmul.f32 %v1082_v42, %v764_v19  ;;  %v817_v54 = vmul.f32 %v1082_v42, %v765_v21 }
 0x273   :  { %v818_v58 = vmul.f32 %v1082_v42, %v766_v43  ;;  %v819_v59 = vmul.f32 %v1082_v42, %v767_v24  ;;  %v820_v62 = vmul.f32 %v1082_v42, %v768_v27  ;;  %v821_v63 = vmul.f32 %v1082_v42, %v769_v32 }
 0x274   :  { %v828_v1 = vmul.f32 %v826_v47, %v806_v40  ;;  %v829_v2 = vmul.f32 %v826_v47, %v807_v45  ;;  %v830_v7 = vmul.f32 %v826_v47, %v808_v46  ;;  %v831_v55 = vmul.f32 %v826_v47, %v809_v41 }
 0x275   :  { %v832_v56 = vmul.f32 %v826_v47, %v810_v48  ;;  %v833_v57 = vmul.f32 %v826_v47, %v811_v44  ;;  %v834_v60 = vmul.f32 %v826_v47, %v812_v49  ;;  %v835_v8 = vmul.f32 %v826_v47, %v813_v50 }
 0x276   :  { %v836_v61 = vmul.f32 %v826_v47, %v814_v51  ;;  %v837_v0 = vmul.f32 %v826_v47, %v815_v52  ;;  %v838_v4 = vmul.f32 %v826_v47, %v816_v53  ;;  %v839_v10 = vmul.f32 %v826_v47, %v817_v54 }
 0x277   :  { %v840_v12 = vmul.f32 %v826_v47, %v818_v58  ;;  %v841_v13 = vmul.f32 %v826_v47, %v819_v59  ;;  %v842_v14 = vmul.f32 %v826_v47, %v820_v62  ;;  %v843_v3 = vmul.f32 %v826_v47, %v821_v63 }
 0x278   :  { %v850_v5 = vadd.f32 %v848_v11, %v828_v1  ;;  %v851_v6 = vadd.f32 %v848_v11, %v829_v2  ;;  %v852_v16 = vadd.f32 %v848_v11, %v830_v7  ;;  %v853_v19 = vadd.f32 %v848_v11, %v831_v55 }
 0x279   :  { %v854_v9 = vadd.f32 %v848_v11, %v832_v56  ;;  %v855_v15 = vadd.f32 %v848_v11, %v833_v57  ;;  %v856_v21 = vadd.f32 %v848_v11, %v834_v60  ;;  %v857_v22 = vadd.f32 %v848_v11, %v835_v8 }
 0x27a   :  { %v858_v17 = vadd.f32 %v848_v11, %v836_v61  ;;  %v859_v43 = vadd.f32 %v848_v11, %v837_v0  ;;  %v860_v23 = vadd.f32 %v848_v11, %v838_v4  ;;  %v861_v18 = vadd.f32 %v848_v11, %v839_v10 }
 0x27b   :  { %v862_v24 = vadd.f32 %v848_v11, %v840_v12  ;;  %v863_v25 = vadd.f32 %v848_v11, %v841_v13  ;;  %v864_v20 = vadd.f32 %v848_v11, %v842_v14  ;;  %v865_v27 = vadd.f32 %v848_v11, %v843_v3 }
 0x27c   :  { %vm866_vm1 = vcmp.gt.f32.partialorder %v850_v5, 0.0  ;;  %vm867_vm2 = vcmp.gt.f32.partialorder %v851_v6, 0.0  ;;  %vm868_vm3 = vcmp.gt.f32.partialorder %v852_v16, 0.0  ;;  %vm869_vm4 = vcmp.gt.f32.partialorder %v853_v19, 0.0 }
 0x27d   :  { %vm870_vm5 = vcmp.gt.f32.partialorder %v854_v9, 0.0  ;;  %vm871_vm6 = vcmp.gt.f32.partialorder %v855_v15, 0.0  ;;  %vm872_vm7 = vcmp.gt.f32.partialorder %v856_v21, 0.0  ;;  %vm873_vm8 = vcmp.gt.f32.partialorder %v857_v22, 0.0 }
 0x27e   :  { %vm874_vm9 = vcmp.gt.f32.partialorder %v858_v17, 0.0  ;;  %vm875_vm10 = vcmp.gt.f32.partialorder %v859_v43, 0.0  ;;  %vm876_vm11 = vcmp.gt.f32.partialorder %v860_v23, 0.0  ;;  %vm877_vm12 = vcmp.gt.f32.partialorder %v861_v18, 0.0 }
 0x27f   :  { %vm878_vm13 = vcmp.gt.f32.partialorder %v862_v24, 0.0  ;;  %vm879_vm14 = vcmp.gt.f32.partialorder %v863_v25, 0.0  ;;  %vm880_vm15 = vcmp.gt.f32.partialorder %v864_v20, 0.0  ;;  %vm881_vm0 = vcmp.gt.f32.partialorder %v865_v27, 0.0 }
 0x280   :  { %v882_v30 = vmul.f32 0.2, %v850_v5  ;;  %v883_v26 = vmul.f32 0.2, %v851_v6  ;;  %v884_v32 = vmul.f32 0.2, %v852_v16 }
 0x281   :  { %v885_v33 = vmul.f32 0.2, %v853_v19  ;;  %v886_v28 = vmul.f32 0.2, %v854_v9  ;;  %v887_v34 = vmul.f32 0.2, %v855_v15 }
 0x282   :  { %v888_v35 = vmul.f32 0.2, %v856_v21  ;;  %v889_v29 = vmul.f32 0.2, %v857_v22  ;;  %v890_v36 = vmul.f32 0.2, %v858_v17  ;;  %v898_v37 = vsel %vm866_vm1, %v850_v5, %v882_v30 }
 0x283   :  { %v891_v31 = vmul.f32 0.2, %v859_v43  ;;  %v892_v39 = vmul.f32 0.2, %v860_v23  ;;  %v893_v38 = vmul.f32 0.2, %v861_v18  ;;  %v899_v42 = vsel %vm867_vm2, %v851_v6, %v883_v26 }
 0x284   :  { %v894_v40 = vmul.f32 0.2, %v862_v24  ;;  %v895_v45 = vmul.f32 0.2, %v863_v25  ;;  %v896_v46 = vmul.f32 0.2, %v864_v20  ;;  %v900_v41 = vsel %vm868_vm3, %v852_v16, %v884_v32 }
 0x285   :  { %v897_v47 = vmul.f32 0.2, %v865_v27  ;;  %v901_v48 = vsel %vm869_vm4, %v853_v19, %v885_v33  ;;  %v902_v44 = vsel %vm870_vm5, %v854_v9, %v886_v28  ;;  %v903_v49 = vsel %vm871_vm6, %v855_v15, %v887_v34 }
 0x286   :  { %v904_v50 = vsel %vm872_vm7, %v856_v21, %v888_v35  ;;  %v905_v51 = vsel %vm873_vm8, %v857_v22, %v889_v29  ;;  %v906_v52 = vsel %vm874_vm9, %v858_v17, %v890_v36  ;;  %v907_v53 = vsel %vm875_vm10, %v859_v43, %v891_v31 }
 0x287   :  { %v908_v54 = vsel %vm876_vm11, %v860_v23, %v892_v39  ;;  %v909_v58 = vsel %vm877_vm12, %v861_v18, %v893_v38  ;;  %v910_v59 = vsel %vm878_vm13, %v862_v24, %v894_v40  ;;  %v911_v62 = vsel %vm879_vm14, %v863_v25, %v895_v45 }
 0x288   :  { %v912_v63 = vsel %vm880_vm15, %v864_v20, %v896_v46  ;;  %v913_v1 = vsel %vm881_vm0, %v865_v27, %v897_v47  ;;  %v1070_v2 = vpack.c.bf16 %v899_v42, %v898_v37  ;;  %v1071_v7 = vpack.c.bf16 %v901_v48, %v900_v41 }
 0x289   :  { %v1072_v55 = vpack.c.bf16 %v903_v49, %v902_v44  ;;  %v1073_v56 = vpack.c.bf16 %v905_v51, %v904_v50  ;;  %v1074_v57 = vpack.c.bf16 %v907_v53, %v906_v52  ;;  %v1075_v60 = vpack.c.bf16 %v909_v58, %v908_v54 }
 0x28a   :  { %v1076_v8 = vpack.c.bf16 %v911_v62, %v910_v59  ;;  %v1077_v61 = vpack.c.bf16 %v913_v1, %v912_v63  ;;  %978 = vst [vmem:[%s1382_s4] sm:$0xff] %v1070_v2  ;;  %979 = vst [vmem:[%s1382_s4 + $0x8] sm:$0xff] %v1071_v7 }
 0x28b   :  { %980 = vst [vmem:[%s1382_s4 + $0x10] sm:$0xff] %v1072_v55  ;;  %981 = vst [vmem:[%s1382_s4 + $0x18] sm:$0xff] %v1073_v56 }
 0x28c   :  { %982 = vst [vmem:[%s1382_s4 + $0x20] sm:$0xff] %v1074_v57  ;;  %983 = vst [vmem:[%s1382_s4 + $0x28] sm:$0xff] %v1075_v60 }
 0x28d   :  { %984 = vst [vmem:[%s1382_s4 + $0x30] sm:$0xff] %v1076_v8  ;;  %985 = vst [vmem:[%s1382_s4 + $0x38] sm:$0xff] %v1077_v61 }

// kernel: discriminator_forward.7
= control target key start
LH: loop header
LB: loop body
LE: loop exit
PB: predicated region body
PF: predicated region fallthrough
CT: control target
= control target key end

     0   :  { %v550_v1 = vmov 0   ;;  %s703_s1 = inlined_call_operand.vmem [shape: bf16[128,512], index: 1, kind: input, shape index: {}]   ;;  %s704_s0 = inlined_call_operand.vmem [shape: bf16[16,128], index: 0, kind: input, shape index: {}]   ;;  %s705_s2 = inlined_call_operand.vmem [shape: f32[16,1], index: 2, kind: input, shape index: {}]   ;;  %s706_s3 = inlined_call_operand.vmem [shape: f32[16,1], index: 3, kind: input, shape index: {}]   ;;  %s707_s4 = inlined_call_operand.vmem [shape: bf16[16,512], index: 4, kind: output, shape index: {}]  }
   0x1   :  { %v497_v0 = vld [vmem:[%s703_s1 + $0x4] ss:$16 sps:$4 sm:$0xff]   ;;  %250 = vmatprep.mubr.bf16.mxu0 %v550_v1  ;;  %293 = vmatprep.mubr.bf16.mxu1 %v550_v1  ;;  %v499_v2 = vld [vmem:[%s703_s1 + $0xc] ss:$16 sps:$4 sm:$0xff]   ;;  %v501_v3 = vld [vmem:[%s703_s1] ss:$16 sps:$4 sm:$0xff]  }
   0x2   :  { %496 = vset.pattern.permute.xlu1 %v550_v1  ;;  %495 = vset.pattern.permute.xlu0 %v550_v1  ;;  %v502_v4 = vld [vmem:[%s703_s1 + $0x8] ss:$16 sps:$4 sm:$0xff]   ;;  %v503_v5 = vld [vmem:[%s703_s1 + $0x24] ss:$16 sps:$4 sm:$0xff]   ;;  %v505_v6 = vld [vmem:[%s703_s1 + $0x2c] ss:$16 sps:$4 sm:$0xff]  }
   0x3   :  { %218 = vmatprep.subr.bf16.mxu0 %v497_v0  ;;  %261 = vmatprep.subr.bf16.mxu1 %v499_v2  ;;  %v507_v7 = vld [vmem:[%s703_s1 + $0x20] ss:$16 sps:$4 sm:$0xff]   ;;  %v508_v8 = vld [vmem:[%s703_s1 + $0x28] ss:$16 sps:$4 sm:$0xff]   ;;  %v509_v9 = vld [vmem:[%s703_s1 + $0x44] ss:$16 sps:$4 sm:$0xff]  }
   0x4   :  { %219 = vmatpush1.bf16.msra.mxu0 %v501_v3  ;;  %262 = vmatpush1.bf16.msra.mxu1 %v502_v4  ;;  %v511_v10 = vld [vmem:[%s703_s1 + $0x4c] ss:$16 sps:$4 sm:$0xff]   ;;  %v513_v11 = vld [vmem:[%s703_s1 + $0x40] ss:$16 sps:$4 sm:$0xff]   ;;  %v514_v12 = vld [vmem:[%s703_s1 + $0x48] ss:$16 sps:$4 sm:$0xff]  }
   0x5   :  { %220 = vmatprep.subr.bf16.mxu0 %v503_v5  ;;  %263 = vmatprep.subr.bf16.mxu1 %v505_v6  ;;  %v515_v13 = vld [vmem:[%s703_s1 + $0x64] ss:$16 sps:$4 sm:$0xff]   ;;  %v517_v14 = vld [vmem:[%s703_s1 + $0x6c] ss:$16 sps:$4 sm:$0xff]   ;;  %v519_v15 = vld [vmem:[%s703_s1 + $0x60] ss:$16 sps:$4 sm:$0xff]  }
   0x6   :  { %v520_v16 = vld [vmem:[%s703_s1 + $0x68] ss:$16 sps:$4 sm:$0xff]   ;;  %v521_v17 = vld [vmem:[%s703_s1 + $0x84] ss:$16 sps:$4 sm:$0xff]   ;;  %v523_v18 = vld [vmem:[%s703_s1 + $0x8c] ss:$16 sps:$4 sm:$0xff]  }
   0x7   :  { %v525_v19 = vld [vmem:[%s703_s1 + $0x80] ss:$16 sps:$4 sm:$0xff]   ;;  %v526_v20 = vld [vmem:[%s703_s1 + $0x88] ss:$16 sps:$4 sm:$0xff]   ;;  %v527_v21 = vld [vmem:[%s703_s1 + $0xa4] ss:$16 sps:$4 sm:$0xff]  }
   0x8   :  { %221 = vmatpush1.bf16.msra.mxu0 %v507_v7  ;;  %264 = vmatpush1.bf16.msra.mxu1 %v508_v8  ;;  %v529_v22 = vld [vmem:[%s703_s1 + $0xac] ss:$16 sps:$4 sm:$0xff]   ;;  %v531_v23 = vld [vmem:[%s703_s1 + $0xa0] ss:$16 sps:$4 sm:$0xff]   ;;  %v532_v24 = vld [vmem:[%s703_s1 + $0xa8] ss:$16 sps:$4 sm:$0xff]  }
   0x9   :  { %222 = vmatprep.subr.bf16.mxu0 %v509_v9  ;;  %265 = vmatprep.subr.bf16.mxu1 %v511_v10  ;;  %v533_v25 = vld [vmem:[%s703_s1 + $0xc4] ss:$16 sps:$4 sm:$0xff]   ;;  %v535_v26 = vld [vmem:[%s703_s1 + $0xcc] ss:$16 sps:$4 sm:$0xff]   ;;  %v537_v27 = vld [vmem:[%s703_s1 + $0xc0] ss:$16 sps:$4 sm:$0xff]  }
   0xa   :  { %v538_v28 = vld [vmem:[%s703_s1 + $0xc8] ss:$16 sps:$4 sm:$0xff]   ;;  %v539_v29 = vld [vmem:[%s703_s1 + $0xe4] ss:$16 sps:$4 sm:$0xff]   ;;  %v541_v30 = vld [vmem:[%s703_s1 + $0xec] ss:$16 sps:$4 sm:$0xff]  }
   0xb   :  { %v543_v31 = vld [vmem:[%s703_s1 + $0xe0] ss:$16 sps:$4 sm:$0xff]   ;;  %v544_v32 = vld [vmem:[%s703_s1 + $0xe8] ss:$16 sps:$4 sm:$0xff]  }
   0xc   :  { %223 = vmatpush1.bf16.msra.mxu0 %v513_v11  ;;  %266 = vmatpush1.bf16.msra.mxu1 %v514_v12  ;;  %v545_v33 = vld [vmem:[%s704_s0] sm:$0xff]   ;;  %v358_v34 = vld [vmem:[%s705_s2 + $0x8] sm:$0xff] }
   0xd   :  { %224 = vmatprep.subr.bf16.mxu0 %v515_v13  ;;  %267 = vmatprep.subr.bf16.mxu1 %v517_v14  ;;  %v377_v35 = vld [vmem:[%s706_s3] sm:$0xff]  ;;  %v378_v13 = vld [vmem:[%s706_s3 + $0x8] sm:$0xff] }
   0xe   :  { %366 = vperm.xlu1 %496, %v358_v34   ;;  %v357_v50 = vld [vmem:[%s705_s2] sm:$0xff] }
  0x10   :  { %225 = vmatpush1.bf16.msra.mxu0 %v519_v15  ;;  %268 = vmatpush1.bf16.msra.mxu1 %v520_v16 }
  0x11   :  { %226 = vmatprep.subr.bf16.mxu0 %v521_v17  ;;  %269 = vmatprep.subr.bf16.mxu1 %v523_v18 }
  0x12   :  { %381 = vperm.xlu1 %496, %v377_v35  }
  0x14   :  { %227 = vmatpush1.bf16.msra.mxu0 %v525_v19  ;;  %270 = vmatpush1.bf16.msra.mxu1 %v526_v20 }
  0x15   :  { %228 = vmatprep.subr.bf16.mxu0 %v527_v21  ;;  %271 = vmatprep.subr.bf16.mxu1 %v529_v22 }
  0x18   :  { %229 = vmatpush1.bf16.msra.mxu0 %v531_v23  ;;  %272 = vmatpush1.bf16.msra.mxu1 %v532_v24 }
  0x19   :  { %230 = vmatprep.subr.bf16.mxu0 %v533_v25  ;;  %273 = vmatprep.subr.bf16.mxu1 %v535_v26 }
  0x1c   :  { %231 = vmatpush1.bf16.msra.mxu0 %v537_v27  ;;  %274 = vmatpush1.bf16.msra.mxu1 %v538_v28 }
  0x1d   :  { %232 = vmatprep.subr.bf16.mxu0 %v539_v29  ;;  %275 = vmatprep.subr.bf16.mxu1 %v541_v30 }
  0x20   :  { %233 = vmatpush1.bf16.msra.mxu0 %v543_v31  ;;  %276 = vmatpush1.bf16.msra.mxu1 %v544_v32 }
  0x23   :  { %251 = vmatmul.mubr.bf16.vlgmr.msra.gmra.mrb[0].mxu0 %v545_v33  ;;  %294 = vmatmul.mubr.bf16.vlgmr.msra.gmra.mrb[0].mxu1 %v545_v33 }
  0x8d   :  { %v367_v14 = vpop.permute.xlu1 %366 }
  0x91   :  { %v382_v15 = vpop.permute.xlu1 %381 }
  0xf6   :  { %v252_v36 = vpop.f32.mrb[0].mxu0  ;;  %v295_v37 = vpop.f32.mrb[0].mxu1 }
  0xf7   :  { %v254_v38 = vpop.f32.mrb[1].mxu0  ;;  %v297_v39 = vpop.f32.mrb[1].mxu1 }
  0xf8   :  { %v304_v40 = vadd.f32 %v254_v38, %v252_v36  ;;  %v256_v41 = vpop.f32.mrb[2].mxu0  ;;  %v299_v42 = vpop.f32.mrb[2].mxu1 }
  0xf9   :  { %v258_v43 = vpop.f32.mrb[3].mxu0  ;;  %v301_v44 = vpop.f32.mrb[3].mxu1 }
  0xfa   :  { %v309_v45 = vadd.f32 %v258_v43, %v256_v41  ;;  %v305_v46 = vadd.f32 %v304_v40, %v295_v37 }
  0xfc   :  { %v310_v47 = vadd.f32 %v309_v45, %v299_v42  ;;  %v306_v48 = vadd.f32 %v305_v46, %v297_v39 }
  0xfe   :  { %v311_v49 = vadd.f32 %v310_v47, %v301_v44  ;;  %307 = vadd.xlane.f32.xlu0 %v306_v48 }
 0x102   :  { %312 = vadd.xlane.f32.xlu0 %v311_v49 }
 0x118   :  { %361 = vperm.xlu0 %495, %v357_v50  }
 0x18b   :  { %v308_v51 = vpop.xlane.xlu0 %307 }
 0x18c   :  { %v315_v52 = vmul.f32 0.001953125, %v308_v51 }
 0x18e   :  { %v317_v53 = vsub.f32 %v252_v36, %v315_v52  ;;  %v318_v54 = vsub.f32 %v254_v38, %v315_v52  ;;  %v319_v55 = vsub.f32 %v295_v37, %v315_v52  ;;  %v320_v57 = vsub.f32 %v297_v39, %v315_v52 }
 0x18f   :  { %v313_v56 = vpop.xlane.xlu0 %312 }
 0x190   :  { %v316_v58 = vmul.f32 0.001953125, %v313_v56  ;;  %v325_v59 = vmul.f32 %v317_v53, %v317_v53  ;;  %v326_v60 = vmul.f32 %v318_v54, %v318_v54  ;;  %v327_v61 = vmul.f32 %v319_v55, %v319_v55 }
 0x191   :  { %v328_v2 = vmul.f32 %v320_v57, %v320_v57 }
 0x192   :  { %v321_v62 = vsub.f32 %v256_v41, %v316_v58  ;;  %v322_v63 = vsub.f32 %v258_v43, %v316_v58  ;;  %v333_v0 = vadd.f32 %v326_v60, %v325_v59  ;;  %v323_v1 = vsub.f32 %v299_v42, %v316_v58 }
 0x193   :  { %v324_v4 = vsub.f32 %v301_v44, %v316_v58 }
 0x194   :  { %v334_v3 = vadd.f32 %v333_v0, %v327_v61  ;;  %v329_v5 = vmul.f32 %v321_v62, %v321_v62  ;;  %v330_v6 = vmul.f32 %v322_v63, %v322_v63  ;;  %v331_v8 = vmul.f32 %v323_v1, %v323_v1 }
 0x195   :  { %v332_v10 = vmul.f32 %v324_v4, %v324_v4 }
 0x196   :  { %v335_v7 = vadd.f32 %v334_v3, %v328_v2  ;;  %v338_v9 = vadd.f32 %v330_v6, %v329_v5 }
 0x197   :  { %v362_v23 = vpop.permute.xlu0 %361 }
 0x198   :  { %336 = vadd.xlane.f32.xlu1 %v335_v7  ;;  %v339_v11 = vadd.f32 %v338_v9, %v331_v8 }
 0x19a   :  { %v340_v12 = vadd.f32 %v339_v11, %v332_v10 }
 0x19c   :  { %341 = vadd.xlane.f32.xlu1 %v340_v12 }
 0x1ad   :  { %386 = vperm.xlu1 %496, %v378_v13  }
 0x225   :  { %v337_v16 = vpop.xlane.xlu1 %336 }
 0x226   :  { %v343_v17 = vmul.f32 0.001953125, %v337_v16 }
 0x228   :  { %v345_v18 = vadd.f32 1e-05, %v343_v17 }
 0x229   :  { %v342_v19 = vpop.xlane.xlu1 %341 }
 0x22a   :  { %546 = vrsqrt.f32 %v345_v18  ;;  %v344_v20 = vmul.f32 0.001953125, %v342_v19 }
 0x22c   :  { %v346_v21 = vadd.f32 1e-05, %v344_v20 }
 0x22d   :  { %v387_v45 = vpop.permute.xlu1 %386 }
 0x22e   :  { %548 = vrsqrt.f32 %v346_v21 }
 0x234   :  { %v547_v22 = vpop.eup %546 }
 0x235   :  { %v349_v24 = vmul.f32 %v547_v22, %v317_v53  ;;  %v350_v25 = vmul.f32 %v547_v22, %v318_v54  ;;  %v351_v26 = vmul.f32 %v547_v22, %v319_v55  ;;  %v352_v27 = vmul.f32 %v547_v22, %v320_v57 }
 0x237   :  { %v369_v28 = vmul.f32 %v362_v23, %v349_v24  ;;  %v370_v29 = vmul.f32 %v362_v23, %v350_v25  ;;  %v371_v30 = vmul.f32 %v362_v23, %v351_v26  ;;  %v372_v31 = vmul.f32 %v362_v23, %v352_v27 }
 0x238   :  { %v549_v32 = vpop.eup %548 }
 0x239   :  { %v353_v33 = vmul.f32 %v549_v32, %v321_v62  ;;  %v354_v34 = vmul.f32 %v549_v32, %v322_v63  ;;  %v355_v35 = vmul.f32 %v549_v32, %v323_v1  ;;  %v356_v36 = vmul.f32 %v549_v32, %v324_v4 }
 0x23a   :  { %v389_v37 = vadd.f32 %v382_v15, %v369_v28  ;;  %v390_v38 = vadd.f32 %v382_v15, %v370_v29  ;;  %v391_v39 = vadd.f32 %v382_v15, %v371_v30  ;;  %v392_v40 = vadd.f32 %v382_v15, %v372_v31 }
 0x23b   :  { %v373_v41 = vmul.f32 %v367_v14, %v353_v33  ;;  %v374_v42 = vmul.f32 %v367_v14, %v354_v34  ;;  %v375_v43 = vmul.f32 %v367_v14, %v355_v35  ;;  %v376_v44 = vmul.f32 %v367_v14, %v356_v36 }
 0x23c   :  { %vm397_vm0 = vcmp.gt.f32.partialorder %v389_v37, 0.0  ;;  %vm398_vm1 = vcmp.gt.f32.partialorder %v390_v38, 0.0  ;;  %vm399_vm2 = vcmp.gt.f32.partialorder %v391_v39, 0.0  ;;  %vm400_vm3 = vcmp.gt.f32.partialorder %v392_v40, 0.0 }
 0x23d   :  { %v393_v46 = vadd.f32 %v387_v45, %v373_v41  ;;  %v394_v47 = vadd.f32 %v387_v45, %v374_v42  ;;  %v395_v48 = vadd.f32 %v387_v45, %v375_v43  ;;  %v396_v49 = vadd.f32 %v387_v45, %v376_v44 }
 0x23e   :  { %v405_v50 = vmul.f32 0.2, %v389_v37  ;;  %v406_v51 = vmul.f32 0.2, %v390_v38  ;;  %v407_v52 = vmul.f32 0.2, %v391_v39 }
 0x23f   :  { %vm401_vm4 = vcmp.gt.f32.partialorder %v393_v46, 0.0  ;;  %vm402_vm5 = vcmp.gt.f32.partialorder %v394_v47, 0.0  ;;  %vm403_vm6 = vcmp.gt.f32.partialorder %v395_v48, 0.0  ;;  %vm404_vm7 = vcmp.gt.f32.partialorder %v396_v49, 0.0 }
 0x240   :  { %v409_v53 = vmul.f32 0.2, %v393_v46  ;;  %v410_v54 = vmul.f32 0.2, %v394_v47  ;;  %v411_v55 = vmul.f32 0.2, %v395_v48  ;;  %v413_v56 = vsel %vm397_vm0, %v389_v37, %v405_v50 }
 0x241   :  { %v412_v57 = vmul.f32 0.2, %v396_v49  ;;  %v408_v58 = vmul.f32 0.2, %v392_v40  ;;  %v414_v59 = vsel %vm398_vm1, %v390_v38, %v406_v51  ;;  %v415_v60 = vsel %vm399_vm2, %v391_v39, %v407_v52 }
 0x242   :  { %v417_v61 = vsel %vm401_vm4, %v393_v46, %v409_v53  ;;  %v418_v62 = vsel %vm402_vm5, %v394_v47, %v410_v54  ;;  %v419_v63 = vsel %vm403_vm6, %v395_v48, %v411_v55  ;;  %v490_v0 = vpack.c.bf16 %v414_v59, %v413_v56 }
 0x243   :  { %v420_v1 = vsel %vm404_vm7, %v396_v49, %v412_v57  ;;  %v492_v2 = vpack.c.bf16 %v418_v62, %v417_v61  ;;  %v416_v3 = vsel %vm400_vm3, %v392_v40, %v408_v58 }
 0x244   :  { %v493_v4 = vpack.c.bf16 %v420_v1, %v419_v63  ;;  %v491_v5 = vpack.c.bf16 %v416_v3, %v415_v60  ;;  %445 = vst [vmem:[%s707_s4] sm:$0xff] %v490_v0 }
 0x245   :  { %447 = vst [vmem:[%s707_s4 + $0x10] sm:$0xff] %v492_v2 }
 0x246   :  { %448 = vst [vmem:[%s707_s4 + $0x18] sm:$0xff] %v493_v4  ;;  %446 = vst [vmem:[%s707_s4 + $0x8] sm:$0xff] %v491_v5 }

// kernel: discriminator_forward.8
= control target key start
LH: loop header
LB: loop body
LE: loop exit
PB: predicated region body
PF: predicated region fallthrough
CT: control target
= control target key end

     0   :  { %v472_v20 = vmov 0   ;;  %s588_s1 = inlined_call_operand.vmem [shape: bf16[256,128], index: 1, kind: input, shape index: {}]   ;;  %s589_s0 = inlined_call_operand.vmem [shape: bf16[32,256], index: 0, kind: input, shape index: {}]   ;;  %s590_s2 = inlined_call_operand.vmem [shape: f32[32,1], index: 2, kind: input, shape index: {}]   ;;  %s591_s3 = inlined_call_operand.vmem [shape: f32[32,1], index: 3, kind: input, shape index: {}]   ;;  %s592_s4 = inlined_call_operand.vmem [shape: bf16[32,128], index: 4, kind: output, shape index: {}]  }
   0x1   :  { %v442_v0 = vld [vmem:[%s588_s1 + $0x40] sm:$0xff]   ;;  %v444_v2 = vld [vmem:[%s588_s1 + $0x48] sm:$0xff]   ;;  %v446_v4 = vld [vmem:[%s588_s1 + $0x50] sm:$0xff]   ;;  %441 = vset.pattern.permute.xlu1 %v472_v20  ;;  %440 = vset.pattern.permute.xlu0 %v472_v20 }
   0x2   :  { %v443_v1 = vld [vmem:[%s588_s1] sm:$0xff]   ;;  %395 = vmatprep.subr.bf16.mxu0 %v442_v0  ;;  %423 = vmatprep.subr.bf16.mxu1 %v442_v0  ;;  %v445_v3 = vld [vmem:[%s588_s1 + $0x8] sm:$0xff]   ;;  %v447_v5 = vld [vmem:[%s588_s1 + $0x10] sm:$0xff]  }
   0x3   :  { %396 = vmatpush3.bf16.msra.mxu0 %v443_v1  ;;  %431 = vmatpush3.bf16.msra.mxu1 %v443_v1  ;;  %v448_v6 = vld [vmem:[%s588_s1 + $0x58] sm:$0xff]   ;;  %v450_v8 = vld [vmem:[%s588_s1 + $0x60] sm:$0xff]   ;;  %v452_v10 = vld [vmem:[%s588_s1 + $0x68] sm:$0xff]  }
   0x4   :  { %397 = vmatprep.subr.bf16.mxu0 %v444_v2  ;;  %424 = vmatprep.subr.bf16.mxu1 %v444_v2  ;;  %v449_v7 = vld [vmem:[%s588_s1 + $0x18] sm:$0xff]   ;;  %v451_v9 = vld [vmem:[%s588_s1 + $0x20] sm:$0xff]   ;;  %v453_v13 = vld [vmem:[%s588_s1 + $0x28] sm:$0xff]  }
   0x5   :  { %v460_v11 = vld [vmem:[%s589_s0 + $0x4] ss:$8 sps:$4 sm:$0xff]   ;;  %v463_v12 = vld [vmem:[%s589_s0 + $0x14] ss:$8 sps:$4 sm:$0xff]   ;;  %v458_v18 = vld [vmem:[%s589_s0] ss:$8 sps:$4 sm:$0xff]  }
   0x6   :  { %v454_v14 = vld [vmem:[%s588_s1 + $0x70] sm:$0xff]   ;;  %202 = vmatprep.mubr.bf16.mxu0 %v460_v11  ;;  %210 = vmatprep.mubr.bf16.mxu1 %v463_v12  ;;  %v456_v16 = vld [vmem:[%s588_s1 + $0x78] sm:$0xff]   ;;  %v265_v33 = vld [vmem:[%s590_s2 + $0x8] sm:$0xff] }
   0x7   :  { %398 = vmatpush3.bf16.msra.mxu0 %v445_v3  ;;  %432 = vmatpush3.bf16.msra.mxu1 %v445_v3  ;;  %v455_v15 = vld [vmem:[%s588_s1 + $0x30] sm:$0xff]   ;;  %v457_v17 = vld [vmem:[%s588_s1 + $0x38] sm:$0xff]   ;;  %v292_v36 = vld [vmem:[%s591_s3] sm:$0xff] }
   0x8   :  { %399 = vmatprep.subr.bf16.mxu0 %v446_v4  ;;  %425 = vmatprep.subr.bf16.mxu1 %v446_v4  ;;  %v461_v19 = vld [vmem:[%s589_s0 + $0x10] ss:$8 sps:$4 sm:$0xff]   ;;  %v293_v37 = vld [vmem:[%s591_s3 + $0x8] sm:$0xff]  ;;  %v264_v56 = vld [vmem:[%s590_s2] sm:$0xff] }
   0x9   :  { %v266_v34 = vld [vmem:[%s590_s2 + $0x10] sm:$0xff]  ;;  %v267_v35 = vld [vmem:[%s590_s2 + $0x18] sm:$0xff] }
   0xa   :  { %v294_v38 = vld [vmem:[%s591_s3 + $0x10] sm:$0xff]  ;;  %v295_v55 = vld [vmem:[%s591_s3 + $0x18] sm:$0xff] }
   0xb   :  { %400 = vmatpush3.bf16.msra.mxu0 %v447_v5  ;;  %433 = vmatpush3.bf16.msra.mxu1 %v447_v5 }
   0xc   :  { %401 = vmatprep.subr.bf16.mxu0 %v448_v6  ;;  %426 = vmatprep.subr.bf16.mxu1 %v448_v6 }
   0xf   :  { %402 = vmatpush3.bf16.msra.mxu0 %v449_v7  ;;  %434 = vmatpush3.bf16.msra.mxu1 %v449_v7 }
  0x10   :  { %403 = vmatprep.subr.bf16.mxu0 %v450_v8  ;;  %427 = vmatprep.subr.bf16.mxu1 %v450_v8 }
  0x13   :  { %404 = vmatpush3.bf16.msra.mxu0 %v451_v9  ;;  %435 = vmatpush3.bf16.msra.mxu1 %v451_v9 }
  0x14   :  { %405 = vmatprep.subr.bf16.mxu0 %v452_v10  ;;  %428 = vmatprep.subr.bf16.mxu1 %v452_v10 }
  0x17   :  { %406 = vmatpush3.bf16.msra.mxu0 %v453_v13  ;;  %436 = vmatpush3.bf16.msra.mxu1 %v453_v13 }
  0x18   :  { %407 = vmatprep.subr.bf16.mxu0 %v454_v14  ;;  %429 = vmatprep.subr.bf16.mxu1 %v454_v14 }
  0x1b   :  { %408 = vmatpush3.bf16.msra.mxu0 %v455_v15  ;;  %437 = vmatpush3.bf16.msra.mxu1 %v455_v15 }
  0x1c   :  { %409 = vmatprep.subr.bf16.mxu0 %v456_v16  ;;  %430 = vmatprep.subr.bf16.mxu1 %v456_v16 }
  0x1f   :  { %410 = vmatpush3.bf16.msra.mxu0 %v457_v17  ;;  %438 = vmatpush3.bf16.msra.mxu1 %v457_v17 }
  0x22   :  { %203 = vmatmul.mubr.bf16.vlgmr.msra.gmra.mrb[0].mxu0 %v458_v18  ;;  %211 = vmatmul.mubr.bf16.vlgmr.msra.gmra.mrb[0].mxu1 %v461_v19 }
  0xf5   :  { %v411_v21 = vpop.f32.mrb[0].mxu0  ;;  %v417_v22 = vpop.f32.mrb[0].mxu1 }
  0xf6   :  { %v412_v23 = vpop.f32.mrb[1].mxu0  ;;  %v418_v24 = vpop.f32.mrb[1].mxu1 }
  0xf7   :  { %v413_v25 = vadd.f32 %v412_v23, %v411_v21  ;;  %v419_v26 = vadd.f32 %v418_v24, %v417_v22  ;;  %v414_v27 = vpop.f32.mrb[2].mxu0  ;;  %v420_v28 = vpop.f32.mrb[2].mxu1 }
  0xf8   :  { %v415_v29 = vpop.f32.mrb[3].mxu0  ;;  %v421_v30 = vpop.f32.mrb[3].mxu1 }
  0xf9   :  { %v416_v31 = vadd.f32 %v415_v29, %v414_v27  ;;  %v422_v32 = vadd.f32 %v421_v30, %v420_v28  ;;  %223 = vadd.xlane.f32.xlu1 %v419_v26  ;;  %219 = vadd.xlane.f32.xlu0 %v413_v25 }
  0xfd   :  { %225 = vadd.xlane.f32.xlu1 %v422_v32  ;;  %221 = vadd.xlane.f32.xlu0 %v416_v31 }
 0x10e   :  { %275 = vperm.xlu1 %441, %v265_v33  }
 0x112   :  { %280 = vperm.xlu1 %441, %v266_v34  }
 0x116   :  { %285 = vperm.xlu1 %441, %v267_v35  }
 0x11a   :  { %298 = vperm.xlu1 %441, %v292_v36  }
 0x11e   :  { %303 = vperm.xlu1 %441, %v293_v37  }
 0x122   :  { %308 = vperm.xlu1 %441, %v294_v38  }
 0x186   :  { %v224_v39 = vpop.xlane.xlu1 %223  ;;  %v220_v40 = vpop.xlane.xlu0 %219 }
 0x187   :  { %v230_v41 = vmul.f32 0.0078125, %v224_v39  ;;  %v228_v42 = vmul.f32 0.0078125, %v220_v40 }
 0x189   :  { %v232_v43 = vsub.f32 %v413_v25, %v228_v42  ;;  %v234_v46 = vsub.f32 %v419_v26, %v230_v41 }
 0x18a   :  { %v226_v44 = vpop.xlane.xlu1 %225  ;;  %v222_v45 = vpop.xlane.xlu0 %221 }
 0x18b   :  { %v231_v47 = vmul.f32 0.0078125, %v226_v44  ;;  %v229_v48 = vmul.f32 0.0078125, %v222_v45  ;;  %v236_v49 = vmul.f32 %v232_v43, %v232_v43  ;;  %v238_v52 = vmul.f32 %v234_v46, %v234_v46 }
 0x18d   :  { %v233_v50 = vsub.f32 %v416_v31, %v229_v48  ;;  %240 = vadd.xlane.f32.xlu0 %v236_v49  ;;  %v235_v51 = vsub.f32 %v422_v32, %v231_v47 }
 0x18e   :  { %v276_v57 = vpop.permute.xlu1 %275 }
 0x18f   :  { %v237_v53 = vmul.f32 %v233_v50, %v233_v50  ;;  %v239_v54 = vmul.f32 %v235_v51, %v235_v51 }
 0x191   :  { %244 = vadd.xlane.f32.xlu0 %v238_v52  ;;  %242 = vadd.xlane.f32.xlu1 %v237_v53 }
 0x192   :  { %v281_v58 = vpop.permute.xlu1 %280 }
 0x195   :  { %246 = vadd.xlane.f32.xlu1 %v239_v54 }
 0x196   :  { %v286_v59 = vpop.permute.xlu1 %285 }
 0x19a   :  { %v299_v60 = vpop.permute.xlu1 %298 }
 0x19e   :  { %v304_v61 = vpop.permute.xlu1 %303 }
 0x1a2   :  { %v309_v62 = vpop.permute.xlu1 %308 }
 0x1a6   :  { %313 = vperm.xlu1 %441, %v295_v55  }
 0x1a7   :  { %270 = vperm.xlu0 %440, %v264_v56  }
 0x21a   :  { %v241_v63 = vpop.xlane.xlu0 %240 }
 0x21b   :  { %v248_v0 = vmul.f32 0.0078125, %v241_v63 }
 0x21d   :  { %v252_v1 = vadd.f32 1e-05, %v248_v0 }
 0x21e   :  { %v243_v2 = vpop.xlane.xlu1 %242  ;;  %v245_v3 = vpop.xlane.xlu0 %244 }
 0x21f   :  { %464 = vrsqrt.f32 %v252_v1  ;;  %v249_v4 = vmul.f32 0.0078125, %v243_v2  ;;  %v250_v5 = vmul.f32 0.0078125, %v245_v3 }
 0x221   :  { %v253_v6 = vadd.f32 1e-05, %v249_v4  ;;  %v254_v7 = vadd.f32 1e-05, %v250_v5 }
 0x222   :  { %v247_v8 = vpop.xlane.xlu1 %246 }
 0x223   :  { %466 = vrsqrt.f32 %v253_v6  ;;  %v251_v9 = vmul.f32 0.0078125, %v247_v8 }
 0x224   :  { %468 = vrsqrt.f32 %v254_v7 }
 0x225   :  { %v255_v10 = vadd.f32 1e-05, %v251_v9 }
 0x226   :  { %v271_v12 = vpop.permute.xlu0 %270  ;;  %v314_v29 = vpop.permute.xlu1 %313 }
 0x227   :  { %470 = vrsqrt.f32 %v255_v10 }
 0x229   :  { %v465_v11 = vpop.eup %464 }
 0x22a   :  { %v260_v13 = vmul.f32 %v465_v11, %v232_v43 }
 0x22c   :  { %v288_v14 = vmul.f32 %v271_v12, %v260_v13 }
 0x22d   :  { %v467_v15 = vpop.eup %466 }
 0x22e   :  { %v469_v16 = vpop.eup %468  ;;  %v261_v17 = vmul.f32 %v467_v15, %v233_v50  ;;  %v316_v18 = vadd.f32 %v299_v60, %v288_v14 }
 0x22f   :  { %v262_v19 = vmul.f32 %v469_v16, %v234_v46 }
 0x230   :  { %v289_v20 = vmul.f32 %v276_v57, %v261_v17  ;;  %v324_v25 = vmul.f32 0.2, %v316_v18  ;;  %vm320_vm0 = vcmp.gt.f32.partialorder %v316_v18, 0.0 }
 0x231   :  { %v471_v21 = vpop.eup %470  ;;  %v290_v22 = vmul.f32 %v281_v58, %v262_v19 }
 0x232   :  { %v263_v23 = vmul.f32 %v471_v21, %v235_v51  ;;  %v317_v24 = vadd.f32 %v304_v61, %v289_v20  ;;  %v328_v33 = vsel %vm320_vm0, %v316_v18, %v324_v25 }
 0x233   :  { %v318_v26 = vadd.f32 %v309_v62, %v290_v22 }
 0x234   :  { %v291_v27 = vmul.f32 %v286_v59, %v263_v23  ;;  %vm321_vm1 = vcmp.gt.f32.partialorder %v317_v24, 0.0  ;;  %v325_v28 = vmul.f32 0.2, %v317_v24 }
 0x235   :  { %v326_v31 = vmul.f32 0.2, %v318_v26  ;;  %vm322_vm2 = vcmp.gt.f32.partialorder %v318_v26, 0.0 }
 0x236   :  { %v319_v30 = vadd.f32 %v314_v29, %v291_v27  ;;  %v329_v32 = vsel %vm321_vm1, %v317_v24, %v325_v28 }
 0x237   :  { %v387_v34 = vpack.c.bf16 %v329_v32, %v328_v33  ;;  %v330_v36 = vsel %vm322_vm2, %v318_v26, %v326_v31 }
 0x238   :  { %vm323_vm3 = vcmp.gt.f32.partialorder %v319_v30, 0.0  ;;  %v327_v35 = vmul.f32 0.2, %v319_v30 }
 0x239   :  { %388 = vst [vmem:[%s592_s4] sm:$0xff] %v387_v34  }
 0x23a   :  { %v331_v37 = vsel %vm323_vm3, %v319_v30, %v327_v35 }
 0x23b   :  { %v392_v38 = vpack.c.bf16 %v331_v37, %v330_v36 }
 0x23d   :  { %394 = vst [vmem:[%s592_s4 + $0x8] sm:$0xff] %v392_v38  }

// kernel: discriminator_forward.9
= control target key start
LH: loop header
LB: loop body
LE: loop exit
PB: predicated region body
PF: predicated region fallthrough
CT: control target
= control target key end

     0   :  { %v1368_v5 = vmov 0   ;;  %v1369_v35 = vmov 0.0   ;;  %s1817_s0 = inlined_call_operand.vmem [shape: bf16[64,512], index: 0, kind: input, shape index: {}]   ;;  %s1818_s1 = inlined_call_operand.vmem [shape: bf16[512,32], index: 1, kind: input, shape index: {}]   ;;  %s1819_s2 = inlined_call_operand.vmem [shape: f32[64,1], index: 2, kind: input, shape index: {}]   ;;  %s1820_s3 = inlined_call_operand.vmem [shape: f32[64,1], index: 3, kind: input, shape index: {}]   ;;  %s1821_s4 = inlined_call_operand.vmem [shape: f32[8,8], index: 4, kind: input, shape index: {}]   ;;  %s1822_s5 = inlined_call_operand.vmem [shape: f32[8,1], index: 5, kind: input, shape index: {}]   ;;  %s1823_s6 = inlined_call_operand.vmem [shape: f32[8,1], index: 6, kind: input, shape index: {}]   ;;  %s1824_s7 = inlined_call_operand.vmem [shape: f32[8,1], index: 7, kind: input, shape index: {}]   ;;  %s1825_s8 = inlined_call_operand.vmem [shape: f32[8,2], index: 8, kind: input, shape index: {}]   ;;  %s1826_s9 = inlined_call_operand.vmem [shape: f32[64,32], index: 9, kind: input, shape index: {}]   ;;  %s1827_s10 = inlined_call_operand.vmem [shape: f32[1,8], index: 10, kind: input, shape index: {}]   ;;  %s1828_s11 = inlined_call_operand.vmem [shape: f32[32,2], index: 11, kind: input, shape index: {}]   ;;  %s1829_s12 = inlined_call_operand.hbm [shape: f32[1,2], index: 12, kind: output, shape index: {}]  }
   0x1   :  { %v1266_v0 = vld [vmem:[%s1818_s1 + $0x40] sm:$0xff]   ;;  %v1270_v4 = vld [vmem:[%s1818_s1 + $0x48] sm:$0xff]   ;;  %1264 = vset.pattern.permute.xlu0 %v1368_v5  ;;  %1265 = vset.pattern.permute.xlu1 %v1368_v5  ;;  %v1274_v9 = vld [vmem:[%s1818_s1 + $0x50] sm:$0xff]  }
   0x2   :  { %v1267_v1 = vld [vmem:[%s1818_s1 + $0xc0] sm:$0xff]   ;;  %1142 = vmatprep.subr.bf16.mxu0 %v1266_v0  ;;  %v1271_v6 = vld [vmem:[%s1818_s1 + $0xc8] sm:$0xff]   ;;  %v1275_v10 = vld [vmem:[%s1818_s1 + $0xd0] sm:$0xff]  }
   0x3   :  { %v1268_v2 = vld [vmem:[%s1818_s1] sm:$0xff]   ;;  %1182 = vmatprep.subr.bf16.mxu1 %v1267_v1  ;;  %v1272_v7 = vld [vmem:[%s1818_s1 + $0x8] sm:$0xff]   ;;  %v1276_v11 = vld [vmem:[%s1818_s1 + $0x10] sm:$0xff]  }
   0x4   :  { %v1269_v3 = vld [vmem:[%s1818_s1 + $0x80] sm:$0xff]   ;;  %1143 = vmatpush3.bf16.msra.mxu0 %v1268_v2  ;;  %v1273_v8 = vld [vmem:[%s1818_s1 + $0x88] sm:$0xff]   ;;  %v1277_v12 = vld [vmem:[%s1818_s1 + $0x90] sm:$0xff]  }
   0x5   :  { %1183 = vmatpush3.bf16.msra.mxu1 %v1269_v3  ;;  %1144 = vmatprep.subr.bf16.mxu0 %v1270_v4  ;;  %v1278_v13 = vld [vmem:[%s1818_s1 + $0x58] sm:$0xff]   ;;  %v1282_v17 = vld [vmem:[%s1818_s1 + $0x60] sm:$0xff]   ;;  %v1286_v21 = vld [vmem:[%s1818_s1 + $0x68] sm:$0xff]  }
   0x6   :  { %1184 = vmatprep.subr.bf16.mxu1 %v1271_v6  ;;  %v1279_v14 = vld [vmem:[%s1818_s1 + $0xd8] sm:$0xff]   ;;  %v1283_v18 = vld [vmem:[%s1818_s1 + $0xe0] sm:$0xff]   ;;  %v1287_v22 = vld [vmem:[%s1818_s1 + $0xe8] sm:$0xff]  }
   0x7   :  { %v1280_v15 = vld [vmem:[%s1818_s1 + $0x18] sm:$0xff]   ;;  %v1284_v19 = vld [vmem:[%s1818_s1 + $0x20] sm:$0xff]   ;;  %v1288_v23 = vld [vmem:[%s1818_s1 + $0x28] sm:$0xff]  }
   0x8   :  { %1145 = vmatpush3.bf16.msra.mxu0 %v1272_v7  ;;  %v1281_v16 = vld [vmem:[%s1818_s1 + $0x98] sm:$0xff]   ;;  %v1285_v20 = vld [vmem:[%s1818_s1 + $0xa0] sm:$0xff]   ;;  %v1289_v24 = vld [vmem:[%s1818_s1 + $0xa8] sm:$0xff]  }
   0x9   :  { %1185 = vmatpush3.bf16.msra.mxu1 %v1273_v8  ;;  %1146 = vmatprep.subr.bf16.mxu0 %v1274_v9  ;;  %v1290_v25 = vld [vmem:[%s1818_s1 + $0x70] sm:$0xff]   ;;  %v1294_v29 = vld [vmem:[%s1818_s1 + $0x78] sm:$0xff]   ;;  %v768_v44 = vld [vmem:[%s1825_s8] sm:$0xff] }
   0xa   :  { %1186 = vmatprep.subr.bf16.mxu1 %v1275_v10  ;;  %v1291_v26 = vld [vmem:[%s1818_s1 + $0xf0] sm:$0xff]   ;;  %v1295_v30 = vld [vmem:[%s1818_s1 + $0xf8] sm:$0xff]   ;;  %v769_v45 = vld [vmem:[%s1822_s5] sm:$0xff] }
   0xb   :  { %v1292_v27 = vld [vmem:[%s1818_s1 + $0x30] sm:$0xff]   ;;  %v1296_v31 = vld [vmem:[%s1818_s1 + $0x38] sm:$0xff]   ;;  %v631_v46 = vld [vmem:[%s1819_s2] sm:$0xff]  ;;  %772 = vperm.xlu0 %1264, %v769_v45  }
   0xc   :  { %1147 = vmatpush3.bf16.msra.mxu0 %v1276_v11  ;;  %v1293_v28 = vld [vmem:[%s1818_s1 + $0xb0] sm:$0xff]   ;;  %v1297_v32 = vld [vmem:[%s1818_s1 + $0xb8] sm:$0xff]  }
   0xd   :  { %1187 = vmatpush3.bf16.msra.mxu1 %v1277_v12  ;;  %1148 = vmatprep.subr.bf16.mxu0 %v1278_v13  ;;  %v1298_v33 = vld [vmem:[%s1817_s0] ss:$16 sps:$4 sm:$0xff]   ;;  %v1300_v34 = vld [vmem:[%s1817_s0 + $0x4] ss:$16 sps:$4 sm:$0xff]   ;;  %v1301_v36 = vld [vmem:[%s1817_s0 + $0x8] ss:$16 sps:$4 sm:$0xff]  }
   0xe   :  { %1188 = vmatprep.subr.bf16.mxu1 %v1279_v14  ;;  %v1303_v37 = vld [vmem:[%s1817_s0 + $0xc] ss:$16 sps:$4 sm:$0xff]   ;;  %427 = vmatprep.mubr.bf16.mxu0 %v1300_v34  ;;  %v1304_v38 = vld [vmem:[%s1817_s0 + $0x24] ss:$16 sps:$4 sm:$0xff]   ;;  %v1308_v40 = vld [vmem:[%s1817_s0 + $0x20] ss:$16 sps:$4 sm:$0xff]  }
   0xf   :  { %492 = vmatprep.mubr.bf16.mxu1 %v1303_v37  ;;  %v1306_v39 = vld [vmem:[%s1817_s0 + $0x2c] ss:$16 sps:$4 sm:$0xff]   ;;  %v1309_v41 = vld [vmem:[%s1817_s0 + $0x28] ss:$16 sps:$4 sm:$0xff]   ;;  %v1310_v42 = vld [vmem:[%s1817_s0 + $0x44] ss:$16 sps:$4 sm:$0xff]  }
  0x10   :  { %1149 = vmatpush3.bf16.msra.mxu0 %v1280_v15  ;;  %v1312_v43 = vld [vmem:[%s1817_s0 + $0x4c] ss:$16 sps:$4 sm:$0xff]  }
  0x11   :  { %1189 = vmatpush3.bf16.msra.mxu1 %v1281_v16  ;;  %1150 = vmatprep.subr.bf16.mxu0 %v1282_v17 }
  0x12   :  { %1190 = vmatprep.subr.bf16.mxu1 %v1283_v18 }
  0x14   :  { %1151 = vmatpush3.bf16.msra.mxu0 %v1284_v19 }
  0x15   :  { %1191 = vmatpush3.bf16.msra.mxu1 %v1285_v20  ;;  %1152 = vmatprep.subr.bf16.mxu0 %v1286_v21 }
  0x16   :  { %1192 = vmatprep.subr.bf16.mxu1 %v1287_v22 }
  0x18   :  { %1153 = vmatpush3.bf16.msra.mxu0 %v1288_v23 }
  0x19   :  { %1193 = vmatpush3.bf16.msra.mxu1 %v1289_v24  ;;  %1154 = vmatprep.subr.bf16.mxu0 %v1290_v25 }
  0x1a   :  { %1194 = vmatprep.subr.bf16.mxu1 %v1291_v26 }
  0x1c   :  { %1155 = vmatpush3.bf16.msra.mxu0 %v1292_v27 }
  0x1d   :  { %1195 = vmatpush3.bf16.msra.mxu1 %v1293_v28  ;;  %1156 = vmatprep.subr.bf16.mxu0 %v1294_v29 }
  0x1e   :  { %1196 = vmatprep.subr.bf16.mxu1 %v1295_v30 }
  0x20   :  { %1157 = vmatpush3.bf16.msra.mxu0 %v1296_v31 }
  0x21   :  { %1197 = vmatpush3.bf16.msra.mxu1 %v1297_v32  ;;  %1231 = vmatprep.subr.mxu0 %v1369_v35 }
  0x23   :  { %428 = vmatmul.mubr.bf16.vlgmr.msra.gmra.mrb[0].mxu0 %v1298_v33 }
  0x24   :  { %493 = vmatmul.mubr.bf16.vlgmr.msra.gmra.mrb[0].mxu1 %v1301_v36  ;;  %435 = vmatprep.mubr.bf16.mxu0 %v1304_v38 }
  0x25   :  { %500 = vmatprep.mubr.bf16.mxu1 %v1306_v39  ;;  %1232 = vmatpush3.msra.mxu0 %v768_v44 }
  0x2b   :  { %436 = vmatmul.mubr.bf16.gmra.mrb[4].mxu0 %v1308_v40 }
  0x2c   :  { %17 = vsyncpa [#allocation3], 0  ;;  %501 = vmatmul.mubr.bf16.gmra.mrb[4].mxu1 %v1309_v41  ;;  %443 = vmatprep.mubr.bf16.mxu0 %v1310_v42  ;;  %v632_v47 = vld [vmem:[%s1819_s2 + $0x8] sm:$0xff]  ;;  %v633_v48 = vld [vmem:[%s1819_s2 + $0x10] sm:$0xff]  ;;  %vm1370_vm0 = vmmov 0   ;;  %vm775_vm1 = vcmask 64512  }
  0x2d   :  { %508 = vmatprep.mubr.bf16.mxu1 %v1312_v43  ;;  %641 = vperm.xlu1 %1265, %v631_v46   ;;  %v1314_v49 = vld [vmem:[%s1817_s0 + $0x40] ss:$16 sps:$4 sm:$0xff]   ;;  %v1315_v50 = vld [vmem:[%s1817_s0 + $0x48] ss:$16 sps:$4 sm:$0xff]   ;;  %v1316_v51 = vld [vmem:[%s1817_s0 + $0x64] ss:$16 sps:$4 sm:$0xff]  }
  0x2e   :  { %1236 = vmatprep.subr.mxu0 %v1369_v35  ;;  %646 = vperm.xlu0 %1264, %v632_v47   ;;  %v1318_v52 = vld [vmem:[%s1817_s0 + $0x6c] ss:$16 sps:$4 sm:$0xff]   ;;  %v1320_v53 = vld [vmem:[%s1817_s0 + $0x60] ss:$16 sps:$4 sm:$0xff]   ;;  %v1321_v54 = vld [vmem:[%s1817_s0 + $0x68] ss:$16 sps:$4 sm:$0xff]  }
  0x2f   :  { %v767_v55 = vld [vmem:[%s1821_s4] sm:$0xff]  ;;  %vm525_vm2 = vcmask 261120   ;;  %vm849_vm3 = vcmask 15360   ;;  %vm1075_vm13 = vcmask 8192  }
  0x31   :  { %651 = vperm.xlu1 %1265, %v633_v48  }
  0x33   :  { %444 = vmatmul.mubr.bf16.gmra.mrb[8].mxu0 %v1314_v49  ;;  %v688_v49 = vld [vmem:[%s1820_s3 + $0x8] sm:$0xff] }
  0x34   :  { %509 = vmatmul.mubr.bf16.gmra.mrb[8].mxu1 %v1315_v50  ;;  %451 = vmatprep.mubr.bf16.mxu0 %v1316_v51 }
  0x35   :  { %516 = vmatprep.mubr.bf16.mxu1 %v1318_v52 }
  0x3b   :  { %452 = vmatmul.mubr.bf16.gmra.mrb[12].mxu0 %v1320_v53 }
  0x3c   :  { %517 = vmatmul.mubr.bf16.gmra.mrb[12].mxu1 %v1321_v54  ;;  %1233 = vmatprep.mubr.msk.f32.mxu0 %vm1370_vm0, %v1369_v35 }
  0x3d   :  { %1249 = vmatprep.mubr.msk.f32.mxu1 %vm1370_vm0, %v1369_v35 }
  0x43   :  { %1234 = vmatmul.mubr.msk.f32.vlgmr.msra.gmra.mrb[16].mxu0 %vm775_vm1, %v767_v55 }
  0x44   :  { %1238 = vmatprep.mubr.msk.f32.mxu0 %vm1370_vm0, %v1369_v35 }
  0xf6   :  { %v1158_v56 = vpop.f32.mrb[0].mxu0 }
  0xf7   :  { %v1198_v57 = vpop.f32.mrb[0].mxu1  ;;  %v1159_v58 = vpop.f32.mrb[1].mxu0 }
  0xf8   :  { %v1160_v59 = vadd.f32 %v1159_v58, %v1158_v56  ;;  %v1199_v60 = vpop.f32.mrb[1].mxu1  ;;  %v1161_v61 = vpop.f32.mrb[2].mxu0 }
  0xf9   :  { %v1200_v62 = vadd.f32 %v1199_v60, %v1198_v57  ;;  %v1201_v63 = vpop.f32.mrb[2].mxu1  ;;  %v1162_v0 = vpop.f32.mrb[3].mxu0 }
  0xfa   :  { %v1163_v1 = vadd.f32 %v1162_v0, %v1161_v61  ;;  %v1202_v2 = vpop.f32.mrb[3].mxu1  ;;  %v773_v60 = vpop.permute.xlu0 %772 }
  0xfb   :  { %v1203_v3 = vadd.f32 %v1202_v2, %v1201_v63  ;;  %v1601_v4 = vadd.f32 %v1200_v62, %v1160_v59  ;;  %v687_v59 = vld [vmem:[%s1820_s3] sm:$0xff]  ;;  %v1637_v63 = vpop.permute.xlu1 %641 }
  0xfd   :  { %v526_v5 = vsel %vm525_vm2, %v1601_v4, 0.0  ;;  %v1605_v6 = vadd.f32 %v1203_v3, %v1163_v1 }
  0xfe   :  { %527 = vadd.xlane.f32.xlu0 %v526_v5  ;;  %v1164_v7 = vpop.f32.mrb[4].mxu0  ;;  %v1639_v0 = vpop.permute.xlu0 %646 }
  0xff   :  { %v1204_v8 = vpop.f32.mrb[4].mxu1  ;;  %v1165_v9 = vpop.f32.mrb[5].mxu0  ;;  %v529_v10 = vsel %vm525_vm2, %v1605_v6, 0.0 }
 0x100   :  { %v1166_v11 = vadd.f32 %v1165_v9, %v1164_v7  ;;  %v1205_v12 = vpop.f32.mrb[5].mxu1  ;;  %530 = vadd.xlane.f32.xlu1 %v529_v10  ;;  %v1167_v13 = vpop.f32.mrb[6].mxu0 }
 0x101   :  { %v1206_v14 = vadd.f32 %v1205_v12, %v1204_v8  ;;  %v1207_v15 = vpop.f32.mrb[6].mxu1  ;;  %v1168_v16 = vpop.f32.mrb[7].mxu0 }
 0x102   :  { %v1169_v17 = vadd.f32 %v1168_v16, %v1167_v13  ;;  %v1208_v18 = vpop.f32.mrb[7].mxu1  ;;  %v1641_v1 = vpop.permute.xlu1 %651 }
 0x103   :  { %v1209_v19 = vadd.f32 %v1208_v18, %v1207_v15  ;;  %v1609_v20 = vadd.f32 %v1206_v14, %v1166_v11 }
 0x105   :  { %v532_v21 = vsel %vm525_vm2, %v1609_v20, 0.0  ;;  %v1613_v22 = vadd.f32 %v1209_v19, %v1169_v17 }
 0x106   :  { %533 = vadd.xlane.f32.xlu1 %v532_v21  ;;  %v1170_v23 = vpop.f32.mrb[8].mxu0 }
 0x107   :  { %v1210_v24 = vpop.f32.mrb[8].mxu1  ;;  %v1171_v25 = vpop.f32.mrb[9].mxu0  ;;  %v535_v32 = vsel %vm525_vm2, %v1613_v22, 0.0 }
 0x108   :  { %v1172_v26 = vadd.f32 %v1171_v25, %v1170_v23  ;;  %v1211_v27 = vpop.f32.mrb[9].mxu1  ;;  %v1173_v28 = vpop.f32.mrb[10].mxu0 }
 0x109   :  { %v1212_v29 = vadd.f32 %v1211_v27, %v1210_v24  ;;  %v1213_v30 = vpop.f32.mrb[10].mxu1  ;;  %v1174_v31 = vpop.f32.mrb[11].mxu0 }
 0x10a   :  { %v1175_v33 = vadd.f32 %v1174_v31, %v1173_v28  ;;  %v1214_v34 = vpop.f32.mrb[11].mxu1  ;;  %536 = vadd.xlane.f32.xlu1 %v535_v32 }
 0x10b   :  { %v1215_v35 = vadd.f32 %v1214_v34, %v1213_v30  ;;  %v511_v36 = vadd.f32 %v1212_v29, %v1172_v26 }
 0x10d   :  { %v538_v37 = vsel %vm525_vm2, %v511_v36, 0.0  ;;  %v1618_v38 = vadd.f32 %v1215_v35, %v1175_v33 }
 0x10e   :  { %539 = vadd.xlane.f32.xlu1 %v538_v37  ;;  %v1176_v39 = vpop.f32.mrb[12].mxu0  ;;  %v634_v37 = vld [vmem:[%s1819_s2 + $0x18] sm:$0xff] }
 0x10f   :  { %v1216_v40 = vpop.f32.mrb[12].mxu1  ;;  %v1177_v41 = vpop.f32.mrb[13].mxu0  ;;  %v541_v46 = vsel %vm525_vm2, %v1618_v38, 0.0 }
 0x110   :  { %v1178_v42 = vadd.f32 %v1177_v41, %v1176_v39  ;;  %v1217_v43 = vpop.f32.mrb[13].mxu1  ;;  %v1179_v44 = vpop.f32.mrb[14].mxu0  ;;  %v635_v39 = vld [vmem:[%s1819_s2 + $0x20] sm:$0xff]  ;;  %v636_v41 = vld [vmem:[%s1819_s2 + $0x28] sm:$0xff] }
 0x111   :  { %v1218_v45 = vadd.f32 %v1217_v43, %v1216_v40  ;;  %v1219_v47 = vpop.f32.mrb[14].mxu1  ;;  %v1180_v48 = vpop.f32.mrb[15].mxu0  ;;  %v690_v40 = vld [vmem:[%s1820_s3 + $0x18] sm:$0xff]  ;;  %v637_v43 = vld [vmem:[%s1819_s2 + $0x30] sm:$0xff] }
 0x112   :  { %542 = vadd.xlane.f32.xlu1 %v541_v46  ;;  %v1181_v50 = vadd.f32 %v1180_v48, %v1179_v44  ;;  %v1220_v51 = vpop.f32.mrb[15].mxu1  ;;  %v638_v46 = vld [vmem:[%s1819_s2 + $0x38] sm:$0xff]  ;;  %v693_v48 = vld [vmem:[%s1820_s3 + $0x30] sm:$0xff] }
 0x113   :  { %v1221_v52 = vadd.f32 %v1220_v51, %v1219_v47  ;;  %v519_v53 = vadd.f32 %v1218_v45, %v1178_v42  ;;  %v691_v42 = vld [vmem:[%s1820_s3 + $0x20] sm:$0xff]  ;;  %v692_v45 = vld [vmem:[%s1820_s3 + $0x28] sm:$0xff] }
 0x114   :  { %702 = vperm.xlu0 %1264, %v688_v49  }
 0x115   :  { %v544_v54 = vsel %vm525_vm2, %v519_v53, 0.0  ;;  %v1626_v55 = vadd.f32 %v1221_v52, %v1181_v50 }
 0x116   :  { %545 = vadd.xlane.f32.xlu1 %v544_v54  ;;  %v845_v56 = vpop.f32.mrb[16].mxu0 }
 0x117   :  { %v547_v57 = vsel %vm525_vm2, %v1626_v55, 0.0  ;;  %v1235_v58 = vpop.f32.mrb[17].mxu0  ;;  %v1633_v61 = vadd.f32 %v845_v56, %v773_v60  ;;  %v864_v56 = vld [vmem:[%s1823_s6] sm:$0xff]  ;;  %v694_v60 = vld [vmem:[%s1820_s3 + $0x38] sm:$0xff] }
 0x119   :  { %v850_v62 = vsel %vm849_vm3, %v1633_v61, 0.0 }
 0x11a   :  { %548 = vadd.xlane.f32.xlu1 %v547_v57 }
 0x12b   :  { %697 = vperm.xlu1 %1265, %v687_v59  }
 0x14f   :  { %851 = vadd.xlane.f32.xlu1 %v850_v62  ;;  %v919_v62 = vld [vmem:[%s1828_s11 + $0x8] sm:$0xff] }
 0x18b   :  { %v528_v2 = vpop.xlane.xlu0 %527 }
 0x18c   :  { %v551_v3 = vmul.f32 0.03125, %v528_v2 }
 0x18d   :  { %v531_v5 = vpop.xlane.xlu1 %530 }
 0x18e   :  { %v1644_v7 = vsub.f32 %v1601_v4, %v551_v3  ;;  %v552_v8 = vmul.f32 0.03125, %v531_v5  ;;  %v1371_v3 = vmov 0.0|0.0   ;;  %v920_v5 = vld [vmem:[%s1828_s11 + $0x10] sm:$0xff] }
 0x18f   :  { %1252 = vmatprep.subr.bf16.mxu1 %v1371_v3 }
 0x190   :  { %v1647_v9 = vsub.f32 %v1605_v6, %v552_v8  ;;  %v567_v10 = vmul.f32 %v1644_v7, %v1644_v7  ;;  %v921_v8 = vld [vmem:[%s1828_s11 + $0x18] sm:$0xff] }
 0x192   :  { %v575_v11 = vsel %vm525_vm2, %v567_v10, 0.0  ;;  %v568_v12 = vmul.f32 %v1647_v9, %v1647_v9  ;;  %v1256_v10 = vpack.c.bf16 %v921_v8, %v920_v5 }
 0x193   :  { %v534_v13 = vpop.xlane.xlu1 %533  ;;  %576 = vadd.xlane.f32.xlu1 %v575_v11  ;;  %v703_v11 = vpop.permute.xlu0 %702 }
 0x194   :  { %v553_v14 = vmul.f32 0.03125, %v534_v13  ;;  %v578_v15 = vsel %vm525_vm2, %v568_v12, 0.0 }
 0x195   :  { %579 = vadd.xlane.f32.xlu0 %v578_v15 }
 0x196   :  { %v1656_v4 = vsub.f32 %v1609_v20, %v553_v14 }
 0x197   :  { %v537_v16 = vpop.xlane.xlu1 %536 }
 0x198   :  { %v554_v6 = vmul.f32 0.03125, %v537_v16  ;;  %v569_v17 = vmul.f32 %v1656_v4, %v1656_v4 }
 0x19a   :  { %v1661_v18 = vsub.f32 %v1613_v22, %v554_v6  ;;  %v581_v19 = vsel %vm525_vm2, %v569_v17, 0.0 }
 0x19b   :  { %v540_v21 = vpop.xlane.xlu1 %539  ;;  %582 = vadd.xlane.f32.xlu1 %v581_v19 }
 0x19c   :  { %v555_v23 = vmul.f32 0.03125, %v540_v21  ;;  %v570_v24 = vmul.f32 %v1661_v18, %v1661_v18 }
 0x19e   :  { %v1666_v25 = vsub.f32 %v511_v36, %v555_v23  ;;  %v584_v20 = vsel %vm525_vm2, %v570_v24, 0.0 }
 0x19f   :  { %v543_v26 = vpop.xlane.xlu1 %542  ;;  %585 = vadd.xlane.f32.xlu0 %v584_v20 }
 0x1a0   :  { %v556_v27 = vmul.f32 0.03125, %v543_v26  ;;  %v571_v28 = vmul.f32 %v1666_v25, %v1666_v25 }
 0x1a2   :  { %v1672_v22 = vsub.f32 %v1618_v38, %v556_v27  ;;  %v587_v29 = vsel %vm525_vm2, %v571_v28, 0.0  ;;  %v689_v38 = vld [vmem:[%s1820_s3 + $0x10] sm:$0xff] }
 0x1a3   :  { %v546_v30 = vpop.xlane.xlu1 %545  ;;  %588 = vadd.xlane.f32.xlu1 %v587_v29 }
 0x1a4   :  { %v557_v31 = vmul.f32 0.03125, %v546_v30  ;;  %v572_v32 = vmul.f32 %v1672_v22, %v1672_v22 }
 0x1a6   :  { %v1677_v33 = vsub.f32 %v519_v53, %v557_v31  ;;  %v590_v34 = vsel %vm525_vm2, %v572_v32, 0.0 }
 0x1a7   :  { %591 = vadd.xlane.f32.xlu0 %v590_v34  ;;  %v549_v44 = vpop.xlane.xlu1 %548 }
 0x1a8   :  { %v573_v35 = vmul.f32 %v1677_v33, %v1677_v33  ;;  %v558_v54 = vmul.f32 0.03125, %v549_v44 }
 0x1aa   :  { %v593_v36 = vsel %vm525_vm2, %v573_v35, 0.0  ;;  %v1725_v57 = vsub.f32 %v1626_v55, %v558_v54  ;;  %v918_v55 = vld [vmem:[%s1828_s11] sm:$0xff] }
 0x1ab   :  { %594 = vadd.xlane.f32.xlu1 %v593_v36  ;;  %v1710_v47 = vpop.permute.xlu1 %697  ;;  %v1253_v2 = vpack.c.bf16 %v919_v62, %v918_v55 }
 0x1ac   :  { %v574_v58 = vmul.f32 %v1725_v57, %v1725_v57 }
 0x1ad   :  { %1254 = vmatpush3.bf16.msra.mxu1 %v1253_v2 }
 0x1ae   :  { %v596_v59 = vsel %vm525_vm2, %v574_v58, 0.0  ;;  %1255 = vmatprep.subr.bf16.mxu1 %v1371_v3 }
 0x1b1   :  { %1257 = vmatpush3.bf16.msra.mxu1 %v1256_v10 }
 0x1bc   :  { %656 = vperm.xlu1 %1265, %v634_v37  }
 0x1bd   :  { %707 = vperm.xlu0 %1264, %v689_v38  }
 0x1c1   :  { %661 = vperm.xlu0 %1264, %v635_v39  }
 0x1c5   :  { %712 = vperm.xlu0 %1264, %v690_v40  }
 0x1c9   :  { %666 = vperm.xlu0 %1264, %v636_v41  }
 0x1cd   :  { %717 = vperm.xlu0 %1264, %v691_v42  }
 0x1d1   :  { %671 = vperm.xlu0 %1264, %v637_v43  }
 0x1d5   :  { %722 = vperm.xlu0 %1264, %v692_v45  }
 0x1d9   :  { %676 = vperm.xlu0 %1264, %v638_v46  }
 0x1dc   :  { %v852_v49 = vpop.xlane.xlu1 %851 }
 0x1dd   :  { %v854_v50 = vmul.f32 0.5, %v852_v49  ;;  %727 = vperm.xlu0 %1264, %v693_v48  }
 0x1df   :  { %v1716_v51 = vsub.f32 %v1633_v61, %v854_v50  ;;  %v871_v61 = vld [vmem:[%s1824_s7] sm:$0xff] }
 0x1e1   :  { %v856_v52 = vmul.f32 %v1716_v51, %v1716_v51 }
 0x1e3   :  { %v857_v53 = vsel %vm849_vm3, %v856_v52, 0.0 }
 0x1e4   :  { %858 = vadd.xlane.f32.xlu1 %v857_v53 }
 0x1f5   :  { %867 = vperm.xlu1 %1265, %v864_v56  }
 0x1fc   :  { %597 = vadd.xlane.f32.xlu0 %v596_v59 }
 0x212   :  { %732 = vperm.xlu0 %1264, %v694_v60  }
 0x216   :  { %874 = vperm.xlu0 %1264, %v871_v61  }
 0x220   :  { %v577_v17 = vpop.xlane.xlu1 %576 }
 0x221   :  { %v599_v20 = vmul.f32 0.03125, %v577_v17 }
 0x222   :  { %v580_v12 = vpop.xlane.xlu0 %579 }
 0x223   :  { %v600_v23 = vmul.f32 0.03125, %v580_v12  ;;  %v607_v30 = vadd.f32 1e-05, %v599_v20 }
 0x225   :  { %v608_v28 = vadd.f32 1e-05, %v600_v23 }
 0x227   :  { %1322 = vrsqrt.f32 %v608_v28 }
 0x228   :  { %v583_v19 = vpop.xlane.xlu1 %582  ;;  %1324 = vrsqrt.f32 %v607_v30 }
 0x229   :  { %v601_v26 = vmul.f32 0.03125, %v583_v19 }
 0x22b   :  { %v609_v31 = vadd.f32 1e-05, %v601_v26  ;;  %v881_v26 = vld [vmem:[%s1826_s9] sm:$0xff] }
 0x22c   :  { %v586_v13 = vpop.xlane.xlu0 %585 }
 0x22d   :  { %v602_v32 = vmul.f32 0.03125, %v586_v13  ;;  %1326 = vrsqrt.f32 %v609_v31 }
 0x22f   :  { %v610_v36 = vadd.f32 1e-05, %v602_v32 }
 0x230   :  { %v589_v24 = vpop.xlane.xlu1 %588 }
 0x231   :  { %v603_v34 = vmul.f32 0.03125, %v589_v24  ;;  %1328 = vrsqrt.f32 %v610_v36  ;;  %v1323_v45 = vpop.eup %1322 }
 0x232   :  { %v1325_v48 = vpop.eup %1324  ;;  %v624_v50 = vmul.f32 %v1323_v45, %v1647_v9 }
 0x233   :  { %v611_v38 = vadd.f32 1e-05, %v603_v34  ;;  %v623_v54 = vmul.f32 %v1325_v48, %v1644_v7  ;;  %v884_v34 = vld [vmem:[%s1826_s9 + $0x18] sm:$0xff]  ;;  %v886_v48 = vld [vmem:[%s1826_s9 + $0x28] sm:$0xff] }
 0x234   :  { %v592_v14 = vpop.xlane.xlu0 %591  ;;  %v680_v59 = vmul.f32 %v1639_v0, %v624_v50 }
 0x235   :  { %v604_v39 = vmul.f32 0.03125, %v592_v14  ;;  %1330 = vrsqrt.f32 %v611_v38  ;;  %v679_v61 = vmul.f32 %v1637_v63, %v623_v54 }
 0x236   :  { %v736_v2 = vadd.f32 %v703_v11, %v680_v59  ;;  %v887_v59 = vld [vmem:[%s1826_s9 + $0x30] sm:$0xff] }
 0x237   :  { %v612_v43 = vadd.f32 1e-05, %v604_v39  ;;  %v1327_v49 = vpop.eup %1326  ;;  %v735_v7 = vadd.f32 %v1710_v47, %v679_v61  ;;  %v885_v39 = vld [vmem:[%s1826_s9 + $0x20] sm:$0xff] }
 0x238   :  { %v595_v29 = vpop.xlane.xlu1 %594  ;;  %v625_v56 = vmul.f32 %v1327_v49, %v1656_v4  ;;  %v752_v13 = vmul.f32 0.2, %v736_v2  ;;  %vm744_vm5 = vcmp.gt.f32.partialorder %v736_v2, 0.0 }
 0x239   :  { %v605_v40 = vmul.f32 0.03125, %v595_v29  ;;  %1332 = vrsqrt.f32 %v612_v43  ;;  %vm743_vm4 = vcmp.gt.f32.partialorder %v735_v7, 0.0 }
 0x23a   :  { %v681_v62 = vmul.f32 %v1641_v1, %v625_v56  ;;  %v751_v1 = vmul.f32 0.2, %v735_v7 }
 0x23b   :  { %v613_v46 = vadd.f32 1e-05, %v605_v40  ;;  %v1329_v58 = vpop.eup %1328 }
 0x23c   :  { %v708_v15 = vpop.permute.xlu0 %707  ;;  %v657_v37 = vpop.permute.xlu1 %656  ;;  %v626_v55 = vmul.f32 %v1329_v58, %v1661_v18  ;;  %v759_v20 = vsel %vm743_vm4, %v735_v7, %v751_v1 }
 0x23d   :  { %1334 = vrsqrt.f32 %v613_v46  ;;  %v737_v4 = vadd.f32 %v708_v15, %v681_v62  ;;  %v760_v15 = vsel %vm744_vm5, %v736_v2, %v752_v13  ;;  %v889_v32 = vmul.f32 %v881_v26, %v759_v20 }
 0x23e   :  { %v682_v8 = vmul.f32 %v657_v37, %v626_v55  ;;  %v922_v55 = vld [vmem:[%s1827_s10] sm:$0x1] }
 0x23f   :  { %v1331_v60 = vpop.eup %1330  ;;  %v753_v19 = vmul.f32 0.2, %v737_v4  ;;  %vm745_vm6 = vcmp.gt.f32.partialorder %v737_v4, 0.0  ;;  %v897_v46 = vsel %vm525_vm2, %v889_v32, 0.0 }
 0x240   :  { %v662_v16 = vpop.permute.xlu0 %661  ;;  %v627_v3 = vmul.f32 %v1331_v60, %v1666_v25 }
 0x242   :  { %v683_v14 = vmul.f32 %v662_v16, %v627_v3  ;;  %v882_v16 = vld [vmem:[%s1826_s9 + $0x8] sm:$0xff] }
 0x243   :  { %v1333_v5 = vpop.eup %1332  ;;  %v890_v31 = vmul.f32 %v882_v16, %v760_v15 }
 0x244   :  { %v713_v6 = vpop.permute.xlu0 %712  ;;  %v628_v63 = vmul.f32 %v1333_v5, %v1672_v22 }
 0x245   :  { %v738_v17 = vadd.f32 %v713_v6, %v682_v8  ;;  %v898_v43 = vsel %vm525_vm2, %v890_v31, 0.0 }
 0x246   :  { %v899_v58 = vadd.f32 %v898_v43, %v897_v46 }
 0x247   :  { %v1335_v12 = vpop.eup %1334  ;;  %v754_v6 = vmul.f32 0.2, %v738_v17  ;;  %vm746_vm7 = vcmp.gt.f32.partialorder %v738_v17, 0.0 }
 0x248   :  { %v1748_v21 = vpop.permute.xlu0 %666  ;;  %v629_v47 = vmul.f32 %v1335_v12, %v1677_v33  ;;  %v883_v33 = vld [vmem:[%s1826_s9 + $0x10] sm:$0xff] }
 0x249   :  { %v684_v25 = vmul.f32 %v1748_v21, %v628_v63 }
 0x24c   :  { %v718_v27 = vpop.permute.xlu0 %717 }
 0x24d   :  { %v739_v23 = vadd.f32 %v718_v27, %v683_v14  ;;  %v761_v27 = vsel %vm745_vm6, %v737_v4, %v753_v19 }
 0x24e   :  { %v891_v38 = vmul.f32 %v883_v33, %v761_v27 }
 0x24f   :  { %v755_v28 = vmul.f32 0.2, %v739_v23  ;;  %vm747_vm8 = vcmp.gt.f32.partialorder %v739_v23, 0.0 }
 0x250   :  { %v672_v35 = vpop.permute.xlu0 %671 }
 0x251   :  { %v685_v22 = vmul.f32 %v672_v35, %v629_v47  ;;  %v762_v35 = vsel %vm746_vm7, %v738_v17, %v754_v6  ;;  %v763_v40 = vsel %vm747_vm8, %v739_v23, %v755_v28 }
 0x252   :  { %v893_v54 = vmul.f32 %v885_v39, %v763_v40 }
 0x254   :  { %v723_v42 = vpop.permute.xlu0 %722  ;;  %v904_v7 = vsel %vm525_vm2, %v893_v54, 0.0 }
 0x255   :  { %v740_v24 = vadd.f32 %v723_v42, %v684_v25 }
 0x257   :  { %v756_v36 = vmul.f32 0.2, %v740_v24  ;;  %vm748_vm9 = vcmp.gt.f32.partialorder %v740_v24, 0.0 }
 0x258   :  { %v1751_v52 = vpop.permute.xlu0 %676 }
 0x259   :  { %v764_v49 = vsel %vm748_vm9, %v740_v24, %v756_v36 }
 0x25c   :  { %v728_v9 = vpop.permute.xlu0 %727 }
 0x25d   :  { %v741_v29 = vadd.f32 %v728_v9, %v685_v22  ;;  %v894_v9 = vmul.f32 %v886_v48, %v764_v49 }
 0x25f   :  { %vm749_vm10 = vcmp.gt.f32.partialorder %v741_v29, 0.0 }
 0x271   :  { %v859_v41 = vpop.xlane.xlu1 %858 }
 0x272   :  { %v860_v44 = vmul.f32 0.5, %v859_v41  ;;  %v757_v41 = vmul.f32 0.2, %v741_v29 }
 0x274   :  { %v861_v53 = vadd.f32 1e-05, %v860_v44  ;;  %v892_v44 = vmul.f32 %v884_v34, %v762_v35  ;;  %v765_v60 = vsel %vm749_vm10, %v741_v29, %v757_v41 }
 0x275   :  { %v868_v37 = vpop.permute.xlu1 %867  ;;  %v895_v8 = vmul.f32 %v887_v59, %v765_v60 }
 0x276   :  { %1336 = vrsqrt.f32 %v861_v53  ;;  %v900_v53 = vsel %vm525_vm2, %v891_v38, 0.0  ;;  %v902_v62 = vsel %vm525_vm2, %v892_v44, 0.0 }
 0x277   :  { %v901_v3 = vadd.f32 %v900_v53, %v899_v58  ;;  %v908_v14 = vsel %vm525_vm2, %v895_v8, 0.0 }
 0x279   :  { %v903_v4 = vadd.f32 %v902_v62, %v901_v3 }
 0x27b   :  { %v905_v12 = vadd.f32 %v904_v7, %v903_v4 }
 0x280   :  { %v1337_v11 = vpop.eup %1336 }
 0x281   :  { %v863_v21 = vmul.f32 %v1337_v11, %v1716_v51 }
 0x283   :  { %v870_v51 = vmul.f32 %v868_v37, %v863_v21 }
 0x289   :  { %v598_v10 = vpop.xlane.xlu0 %597 }
 0x28a   :  { %v606_v0 = vmul.f32 0.03125, %v598_v10 }
 0x28c   :  { %v614_v18 = vadd.f32 1e-05, %v606_v0  ;;  %v888_v0 = vld [vmem:[%s1826_s9 + $0x38] sm:$0xff]  ;;  %s1372_s9 = smov [#allocation2]  }
 0x28d   :  { %s1083_s18 = sshll.u32 %s1372_s9, 4  ;;  %s1084_s18 = int_to_ptr.vmem [resolvable:$true] %s1083_s18 }
 0x28e   :  { %1338 = vrsqrt.f32 %v614_v18  ;;  %s1344_s19 = scalar_lea.vmem %s1084_s18, 16  ;;  %s1348_s20 = scalar_lea.vmem %s1084_s18, 32 }
 0x28f   :  { %p1345_p0 = scmp.ne.s32.totalorder %s1084_s18, %s1344_s19  ;;  %p1349_p1 = scmp.lt.s32.totalorder %s1084_s18, %s1084_s18 }
 0x290   :  { %p1350_p2 = scmp.lt.s32.totalorder %s1348_s20, %s1344_s19 }
 0x291   :  { %v733_v30 = vpop.permute.xlu0 %732 }
 0x292   :  { %p1351_p3 = por %p1350_p2, %p1349_p1 }
 0x294   :  { %p1352_p4 = pnand %p1351_p3, %p1345_p0 }
 0x295   :  { %v875_v42 = vpop.permute.xlu0 %874 }
 0x296   :  { %v877_v45 = vadd.f32 %v875_v42, %v870_v51 }
 0x298   :  { %v1339_v50 = vpop.eup %1338  ;;  %vm878_vm11 = vcmp.gt.f32.partialorder %v877_v45, 0.0  ;;  %v879_v56 = vmul.f32 0.2, %v877_v45 }
 0x299   :  { %v630_v61 = vmul.f32 %v1339_v50, %v1725_v57  ;;  %v906_v57 = vsel %vm525_vm2, %v894_v9, 0.0 }
 0x29a   :  { %v880_v2 = vsel %vm878_vm11, %v877_v45, %v879_v56 }
 0x29b   :  { %v686_v5 = vmul.f32 %v1751_v52, %v630_v61  ;;  %1237 = vmatpush3.msra.mxu0 %v880_v2  ;;  %v907_v52 = vadd.f32 %v906_v57, %v905_v12 }
 0x29c   :  { %1239 = vmatmul.mubr.msk.f32.vlgmr.msra.gmra.mrb[18].mxu0 %vm775_vm1, %v922_v55 }
 0x29d   :  { %v742_v10 = vadd.f32 %v733_v30, %v686_v5  ;;  %v909_v1 = vadd.f32 %v908_v14, %v907_v52 }
 0x29f   :  { %vm750_vm12 = vcmp.gt.f32.partialorder %v742_v10, 0.0  ;;  %v758_v13 = vmul.f32 0.2, %v742_v10 }
 0x2a1   :  { %v766_v17 = vsel %vm750_vm12, %v742_v10, %v758_v13 }
 0x2a2   :  { %v896_v63 = vmul.f32 %v888_v0, %v766_v17 }
 0x2a4   :  { %v910_v18 = vsel %vm525_vm2, %v896_v63, 0.0 }
 0x2a5   :  { %v911_v11 = vadd.f32 %v910_v18, %v909_v1 }
 0x2a7   :  { %v912_v19 = vrot.slane %v911_v11, 4 }
 0x2a9   :  { %v913_v25 = vadd.f32 %v912_v19, %v911_v11 }
 0x2ab   :  { %v914_v23 = vrot.slane %v913_v25, 2 }
 0x2ad   :  { %v915_v47 = vadd.f32 %v914_v23, %v913_v25 }
 0x2af   :  { %v916_v15 = vrot.slane %v915_v47, 1 }
 0x2b1   :  { %v917_v16 = vadd.f32 %v916_v15, %v915_v47 }
 0x2b3   :  { %1250 = vmatmul.mubr.msk.f32.vlgmr.msra.gmra.mrb[16].mxu1 %vm525_vm2, %v917_v16 }
 0x36f   :  { %v992_v6 = vpop.f32.mrb[18].mxu0 }
 0x370   :  { %v1240_v22 = vpop.f32.mrb[19].mxu0 }
 0x386   :  { %v1065_v24 = vpop.f32.mrb[16].mxu1 }
 0x387   :  { %v1066_v20 = vadd.f32 %v1065_v24, %v992_v6  ;;  %v1251_v26 = vpop.f32.mrb[17].mxu1 }
 0x389   :  { %v1069_v21 = vsub.f32 0.0, %v1066_v20 }
 0x38b   :  { %v1070_v33 = vmul.f32 1.442695, %v1069_v21 }
 0x38d   :  { %1340 = vpow2.f32 %v1070_v33 }
 0x397   :  { %v1341_v27 = vpop.eup %1340 }
 0x398   :  { %v1072_v28 = vadd.f32 1.0, %v1341_v27 }
 0x39a   :  { %1342 = vrcp.f32 %v1072_v28 }
 0x3a4   :  { %v1343_v29 = vpop.eup %1342 }
 0x3a5   :  { %1076 = vst.msk [vmem:[#allocation2] sm:$0x1] %vm1075_vm13, %v1343_v29 }
 0x3a6   :  { %1355 = shalt.err (!%p1352_p4)
}
 0x3a7   :  { %s1356_s8 = scalar_lea.hbm %s1829_s12, 16 }
 0x3a8   :  { %p1357_p5 = scmp.ne.s32.totalorder %s1829_s12, %s1356_s8  ;;  %p1360_p6 = scmp.lt.u32.totalorder %s1356_s8, %s1829_s12 }
 0x3aa   :  { %p1362_p7 = pnand %p1360_p6, %p1357_p5 }
 0x3ac   :  { %1365 = shalt.err (!%p1362_p7)
}
 0x3ad   :  { %1086 = dma.vmem_to_hbm [thread:$0]  %s1084_s18, 16, %s1829_s12, [#allocation3]  }
 0x3ae   :  { %1366 = dma.done.wait [#allocation3], 16  }
 0x3af   :  { %1367 = vsyncadd [#allocation3], 4294967280 }
 0x3b0   :  { %1090 = vsyncpa [#allocation3], 1 }

</bundles_post_ra>
